<compile_context>
chip_gen: v7x
topology: tpu7x:2x2x1
jax: 0.10.0
libtpu: 0.0.40
codegen_flags: <defaults>
</compile_context>

<pallas_src>
import functools

import jax
import jax.numpy as jnp
from jax.experimental import pallas as pl
from jax.experimental.pallas import tpu as pltpu


def _round_up(x, m):
    return ((x + m - 1) // m) * m


# ----------------------------------------------------------------------------
# Kernel: one (dst-tile, edge-tile) step = one MXU matmul into an f32 scratch;
# finalize (per-head divide + head mean) on the last edge tile.
# ----------------------------------------------------------------------------
def _edge_attention_kernel(inc_ref, rhs_ref, o_ref, acc_ref, *, n_heads, f_feats):
    k = pl.program_id(1)

    @pl.when(k == 0)
    def _():
        acc_ref[...] = jnp.zeros_like(acc_ref)

    # Single MXU matmul per step: (t_dst, t_e) bf16 @ (t_e, rhs_w) bf16 -> f32 acc.
    acc_ref[...] += jnp.dot(inc_ref[...], rhs_ref[...],
                            preferred_element_type=jnp.float32)

    @pl.when(k == pl.num_programs(1) - 1)
    def _():
        acc = acc_ref[...]                                # (t_dst, rhs_w) f32
        stride = f_feats + 1
        res = jnp.zeros((acc.shape[0], f_feats), jnp.float32)
        for h in range(n_heads):                          # n_heads is tiny -> unrolled
            num = acc[:, h * stride:h * stride + f_feats]                  # (t_dst, F)
            den = acc[:, h * stride + f_feats:h * stride + f_feats + 1]    # (t_dst, 1)
            inv = pl.reciprocal(jnp.maximum(den, 1e-20), approx=True)      # EUP slot
            res = res + num * inv                         # padded / isolated dst rows stay 0
        res = res * (1.0 / n_heads)                       # mean over heads
        pad = o_ref.shape[1] - f_feats
        if pad > 0:
            res = jnp.concatenate(
                [res, jnp.zeros((res.shape[0], pad), jnp.float32)], axis=1)
        o_ref[...] = res                                  # full-lane (unmasked) store


def edge_attention_forward(edge_feat, att, dst_idx, n_nodes, *,
                           tile_dst=256, tile_edge=2048):
    """EdgeAttentionLayer.forward.

    edge_feat: (E, F) f32 per-edge features
    att:       (H, F) f32 attention parameter (reference stores it as (1, H, F))
    dst_idx:   (E,)   int32 destination node of each edge
    n_nodes:   number of nodes N
    returns:   (N, F) f32 node features
    """
    e_edges, f_feats = edge_feat.shape
    n_heads = att.shape[0]
    packed_w = n_heads * (f_feats + 1)          # per-head [p*feat, p] blocks, head-major

    rhs_w = _round_up(packed_w, 128)            # lane width of the packed RHS / accumulator
    out_w = _round_up(f_feats, 128)             # lane width of the padded output

    t_dst = min(tile_dst, _round_up(n_nodes, 8))
    t_e = min(tile_edge, _round_up(max(e_edges, 1), 128))
    n_pad = _round_up(n_nodes, t_dst)
    e_pad = _round_up(max(e_edges, 1), t_e)
    n_dst_tiles = n_pad // t_dst
    n_e_tiles = e_pad // t_e

    edge_feat = edge_feat.astype(jnp.float32)
    att = att.astype(jnp.float32)
    dst_idx = dst_idx.astype(jnp.int32)

    # ---- Hoisted O(E*H) preamble in plain XLA: scores, per-dst max shift, exp --------------
    scores = edge_feat @ att.T                                              # (E, H)
    seg_max = jax.ops.segment_max(scores, dst_idx, num_segments=n_nodes)    # (N, H)
    p = jnp.exp(scores - seg_max[dst_idx])                                  # (E, H), <= 1
    # Packed RHS: head h owns lanes [h*(F+1), (h+1)*(F+1)) = p_h * [feat, 1]; the trailing
    # "1" lane yields the softmax denominator from the same matmul as the numerator.
    feat_aug = jnp.concatenate(
        [edge_feat, jnp.ones((e_edges, 1), jnp.float32)], axis=1)           # (E, F+1)
    rhs = (p[:, :, None] * feat_aug[:, None, :]).reshape(e_edges, packed_w)
    rhs_p = (jnp.zeros((e_pad, rhs_w), jnp.float32)
             .at[:e_edges, :packed_w].set(rhs)).astype(jnp.bfloat16)

    # Dense dst-incidence M[dst, edge] in {0,1}, built directly in bf16 (no f32 temporary).
    # TODO(synk): for production-scale graphs (ogbn-proteins: ~40M edges) replace the dense
    # (N, E) incidence with a dst-sorted edge list + scalar-prefetch segment kernel.
    inc = (jnp.zeros((n_pad, e_pad), jnp.bfloat16)
           .at[dst_idx, jnp.arange(e_edges)].set(1.0))

    cost = pl.CostEstimate(
        flops=int(2 * n_pad * e_pad * rhs_w),
        transcendentals=int(n_dst_tiles * t_dst * n_heads),
        bytes_accessed=int(n_pad * e_pad * 2                   # incidence streamed once
                           + n_dst_tiles * e_pad * rhs_w * 2   # RHS re-streamed per dst tile
                           + n_pad * out_w * 4),
    )

    # Explicit VMEM budget: double-buffered inc/rhs/out tiles + f32 accumulator scratch,
    # with generous headroom but capped well below v7x's 64 MiB physical VMEM.
    vmem_bytes = (2 * t_dst * t_e * 2
                  + 2 * t_e * rhs_w * 2
                  + 2 * t_dst * out_w * 4
                  + t_dst * rhs_w * 4)
    vmem_limit = int(min(max(32 << 20, 2 * vmem_bytes), 48 << 20))

    out_pad = pl.pallas_call(
        functools.partial(_edge_attention_kernel, n_heads=n_heads, f_feats=f_feats),
        out_shape=jax.ShapeDtypeStruct((n_pad, out_w), jnp.float32),
        grid=(n_dst_tiles, n_e_tiles),
        in_specs=[
            pl.BlockSpec((t_dst, t_e), lambda i, k: (i, k)),   # incidence tile (varies i, k)
            pl.BlockSpec((t_e, rhs_w), lambda i, k: (k, 0)),   # packed p*[feat,1] tile (varies k)
        ],
        out_specs=pl.BlockSpec((t_dst, out_w), lambda i, k: (i, 0)),
        scratch_shapes=[pltpu.VMEM((t_dst, rhs_w), jnp.float32)],
        compiler_params=pltpu.CompilerParams(
            dimension_semantics=("parallel", "arbitrary"),
            vmem_limit_bytes=vmem_limit),
        cost_estimate=cost,
    )(inc, rhs_p)

    return out_pad[:n_nodes, :f_feats]


# ----------------------------------------------------------------------------
# Pure-JAX reference (segment edge_softmax + copy_e/sum + head mean)
# ----------------------------------------------------------------------------
def reference_forward(edge_feat, att, dst_idx, n_nodes):
    e = edge_feat @ att.T                                                # (E, H)
    m = jax.ops.segment_max(e, dst_idx, num_segments=n_nodes)           # (N, H)
    ex = jnp.exp(e - m[dst_idx])
    denom = jax.ops.segment_sum(ex, dst_idx, num_segments=n_nodes)      # (N, H)
    a = ex / denom[dst_idx]                                             # (E, H)
    f = a[:, :, None] * edge_feat[:, None, :]                           # (E, H, F)
    h = jax.ops.segment_sum(f, dst_idx, num_segments=n_nodes)           # (N, H, F)
    return h.mean(axis=1)                                               # (N, F)


# ----------------------------------------------------------------------------
# Deterministic example
# ----------------------------------------------------------------------------
if __name__ == "__main__":
    N = 512          # nodes  -> 2 dst tiles of 256 rows
    E_FEATS = 8      # edge feature dim (ogbn-proteins)
    HEADS = 4

    # Deterministic graph: every node receives 6 in-edges.
    # (Source nodes are irrelevant to this layer: it only uses edge features + dst grouping.)
    in_degree = 6
    dst_idx = jnp.concatenate([jnp.arange(N)] * in_degree).astype(jnp.int32)
    E = int(dst_idx.shape[0])    # 3072 edges -> 2 edge tiles of 2048 (padded)

    key = jax.random.PRNGKey(0)
    k_feat, k_att = jax.random.split(key)
    edge_feat = jax.random.normal(k_feat, (E, E_FEATS), jnp.float32)
    # The reference module zero-inits `att`; small random values here so the
    # attention/softmax path is actually exercised (zeros => uniform weights).
    att = 0.1 * jax.random.normal(k_att, (HEADS, E_FEATS), jnp.float32)

    out = edge_attention_forward(edge_feat, att, dst_idx, N)
    out = jax.block_until_ready(out)

    ref = reference_forward(edge_feat, att, dst_idx, N)
    assert out.shape == (N, E_FEATS)
    assert bool(jnp.all(jnp.isfinite(out)))
    max_err = float(jnp.max(jnp.abs(out - ref)))
    assert max_err < 0.1, f"max abs error vs reference too large: {max_err}"
    print("KERNEL_OK")
</pallas_src>

<mosaic_0001>
module attributes {stable_mosaic.version = 11 : i64} {
  func.func @_edge_attention_kernel(%arg0: i32, %arg1: i32, %arg2: memref<256x2048xbf16, #tpu.memory_space<vmem>>, %arg3: memref<2048x128xbf16, #tpu.memory_space<vmem>>, %arg4: memref<256x128xf32, #tpu.memory_space<vmem>>, %arg5: memref<256x128xf32, #tpu.memory_space<vmem>>) attributes {dimension_semantics = [#tpu.dimension_semantics<parallel>, #tpu.dimension_semantics<arbitrary>], iteration_bounds = array<i64: 2, 2>, scalar_prefetch = 0 : i64, scratch_operands = 1 : i64, tpu.core_type = #tpu.core_type<tc>, window_params = [{transform_indices = @transform_0, window_bounds = array<i64: 256, 2048>}, {transform_indices = @transform_1, window_bounds = array<i64: 2048, 128>}, {transform_indices = @transform_2, window_bounds = array<i64: 256, 128>}]} {
    %c0_i32 = arith.constant 0 : i32
    %0 = arith.cmpi eq, %arg1, %c0_i32 : i32
    %1 = arith.extui %0 : i1 to i32
    %c0_i32_0 = arith.constant 0 : i32
    %2 = arith.cmpi ne, %1, %c0_i32_0 : i32
    scf.if %2 {
      %cst_9 = arith.constant 0.000000e+00 : f32
      %12 = vector.broadcast %cst_9 : f32 to vector<256x128xf32>
      %c0_10 = arith.constant 0 : index
      %c0_11 = arith.constant 0 : index
      %13 = vector.load %arg5[%c0_10, %c0_11] : memref<256x128xf32, #tpu.memory_space<vmem>>, vector<256x128xf32>
      tpu.vector_store %arg5[%c0_10, %c0_11], %12 {strides = array<i32>} : memref<256x128xf32, #tpu.memory_space<vmem>>, vector<256x128xf32>,
    } else {
    }
    %c0 = arith.constant 0 : index
    %c0_1 = arith.constant 0 : index
    %3 = vector.load %arg5[%c0, %c0_1] : memref<256x128xf32, #tpu.memory_space<vmem>>, vector<256x128xf32>
    %c0_2 = arith.constant 0 : index
    %c0_3 = arith.constant 0 : index
    %4 = vector.load %arg2[%c0_2, %c0_3] : memref<256x2048xbf16, #tpu.memory_space<vmem>>, vector<256x2048xbf16>
    %c0_4 = arith.constant 0 : index
    %c0_5 = arith.constant 0 : index
    %5 = vector.load %arg3[%c0_4, %c0_5] : memref<2048x128xbf16, #tpu.memory_space<vmem>>, vector<2048x128xbf16>
    %cst = arith.constant dense<0.000000e+00> : vector<256x128xf32>
    %6 = tpu.matmul %4, %5, %cst {dimension_numbers = #tpu.dot_dimension_numbers<[1], [0], [0], [1], [0, 0, 1, 1], [], []>} : vector<256x2048xbf16>, vector<2048x128xbf16>, vector<256x128xf32> -> vector<256x128xf32>
    %7 = arith.addf %3, %6 : vector<256x128xf32>
    %c0_6 = arith.constant 0 : index
    %c0_7 = arith.constant 0 : index
    %8 = vector.load %arg5[%c0_6, %c0_7] : memref<256x128xf32, #tpu.memory_space<vmem>>, vector<256x128xf32>
    tpu.vector_store %arg5[%c0_6, %c0_7], %7 {strides = array<i32>} : memref<256x128xf32, #tpu.memory_space<vmem>>, vector<256x128xf32>,
    %c1_i32 = arith.constant 1 : i32
    %9 = arith.cmpi eq, %arg1, %c1_i32 : i32
    %10 = arith.extui %9 : i1 to i32
    %c0_i32_8 = arith.constant 0 : i32
    %11 = arith.cmpi ne, %10, %c0_i32_8 : i32
    scf.if %11 {
      %c0_9 = arith.constant 0 : index
      %c0_10 = arith.constant 0 : index
      %12 = vector.load %arg5[%c0_9, %c0_10] : memref<256x128xf32, #tpu.memory_space<vmem>>, vector<256x128xf32>
      %cst_11 = arith.constant 0.000000e+00 : f32
      %13 = vector.broadcast %cst_11 : f32 to vector<256x8xf32>
      %14 = vector.extract_strided_slice %12 {offsets = [0, 0], sizes = [256, 8], strides = [1, 1]} : vector<256x128xf32> to vector<256x8xf32>
      %15 = vector.extract_strided_slice %12 {offsets = [0, 8], sizes = [256, 1], strides = [1, 1]} : vector<256x128xf32> to vector<256x1xf32>
      %cst_12 = arith.constant 9.99999968E-21 : f32
      %16 = vector.broadcast %cst_12 : f32 to vector<256x1xf32>
      %17 = arith.maximumf %15, %16 : vector<256x1xf32>
      %18 = tpu.reciprocal %17 {approx = true} : vector<256x1xf32> -> vector<256x1xf32>
      %19 = vector.broadcast %18 : vector<256x1xf32> to vector<256x8xf32>
      %20 = arith.mulf %14, %19 : vector<256x8xf32>
      %21 = arith.addf %13, %20 : vector<256x8xf32>
      %22 = vector.extract_strided_slice %12 {offsets = [0, 9], sizes = [256, 8], strides = [1, 1]} : vector<256x128xf32> to vector<256x8xf32>
      %23 = vector.extract_strided_slice %12 {offsets = [0, 17], sizes = [256, 1], strides = [1, 1]} : vector<256x128xf32> to vector<256x1xf32>
      %cst_13 = arith.constant 9.99999968E-21 : f32
      %24 = vector.broadcast %cst_13 : f32 to vector<256x1xf32>
      %25 = arith.maximumf %23, %24 : vector<256x1xf32>
      %26 = tpu.reciprocal %25 {approx = true} : vector<256x1xf32> -> vector<256x1xf32>
      %27 = vector.broadcast %26 : vector<256x1xf32> to vector<256x8xf32>
      %28 = arith.mulf %22, %27 : vector<256x8xf32>
      %29 = arith.addf %21, %28 : vector<256x8xf32>
      %30 = vector.extract_strided_slice %12 {offsets = [0, 18], sizes = [256, 8], strides = [1, 1]} : vector<256x128xf32> to vector<256x8xf32>
      %31 = vector.extract_strided_slice %12 {offsets = [0, 26], sizes = [256, 1], strides = [1, 1]} : vector<256x128xf32> to vector<256x1xf32>
      %cst_14 = arith.constant 9.99999968E-21 : f32
      %32 = vector.broadcast %cst_14 : f32 to vector<256x1xf32>
      %33 = arith.maximumf %31, %32 : vector<256x1xf32>
      %34 = tpu.reciprocal %33 {approx = true} : vector<256x1xf32> -> vector<256x1xf32>
      %35 = vector.broadcast %34 : vector<256x1xf32> to vector<256x8xf32>
      %36 = arith.mulf %30, %35 : vector<256x8xf32>
      %37 = arith.addf %29, %36 : vector<256x8xf32>
      %38 = vector.extract_strided_slice %12 {offsets = [0, 27], sizes = [256, 8], strides = [1, 1]} : vector<256x128xf32> to vector<256x8xf32>
      %39 = vector.extract_strided_slice %12 {offsets = [0, 35], sizes = [256, 1], strides = [1, 1]} : vector<256x128xf32> to vector<256x1xf32>
      %cst_15 = arith.constant 9.99999968E-21 : f32
      %40 = vector.broadcast %cst_15 : f32 to vector<256x1xf32>
      %41 = arith.maximumf %39, %40 : vector<256x1xf32>
      %42 = tpu.reciprocal %41 {approx = true} : vector<256x1xf32> -> vector<256x1xf32>
      %43 = vector.broadcast %42 : vector<256x1xf32> to vector<256x8xf32>
      %44 = arith.mulf %38, %43 : vector<256x8xf32>
      %45 = arith.addf %37, %44 : vector<256x8xf32>
      %cst_16 = arith.constant 2.500000e-01 : f32
      %46 = vector.broadcast %cst_16 : f32 to vector<256x8xf32>
      %47 = arith.mulf %45, %46 : vector<256x8xf32>
      %cst_17 = arith.constant 0.000000e+00 : f32
      %48 = vector.broadcast %cst_17 : f32 to vector<256x120xf32>
      %49 = tpu.concatenate %47, %48 in 1 : vector<256x8xf32>, vector<256x120xf32> -> vector<256x128xf32>
      %c0_18 = arith.constant 0 : index
      %c0_19 = arith.constant 0 : index
      %50 = vector.load %arg4[%c0_18, %c0_19] : memref<256x128xf32, #tpu.memory_space<vmem>>, vector<256x128xf32>
      tpu.vector_store %arg4[%c0_18, %c0_19], %49 {strides = array<i32>} : memref<256x128xf32, #tpu.memory_space<vmem>>, vector<256x128xf32>,
    } else {
    }
    return
  }
  func.func @transform_0(%arg0: i32, %arg1: i32) -> (i32, i32) {
    %c0_i32 = arith.constant 0 : i32
    return %arg0, %arg1 : i32, i32
  }
  func.func @transform_1(%arg0: i32, %arg1: i32) -> (i32, i32) {
    %c0_i32 = arith.constant 0 : i32
    %c0_i32_0 = arith.constant 0 : i32
    return %arg1, %c0_i32 : i32, i32
  }
  func.func @transform_2(%arg0: i32, %arg1: i32) -> (i32, i32) {
    %c0_i32 = arith.constant 0 : i32
    %c0_i32_0 = arith.constant 0 : i32
    return %arg0, %c0_i32 : i32, i32
  }
}

</mosaic_0001>

<bundles_post_ra>
// kernel: tpu_custom_call.1
= control target key start
LH: loop header
LB: loop body
LE: loop exit
PB: predicated region body
PF: predicated region fallthrough
CT: control target
= control target key end

     0   :  { %s9648_s0 = inlined_call_operand.hbm [shape: bf16[512,4096], index: 0, kind: input, shape index: {}]   ;;  %s9649_s1 = inlined_call_operand.hbm [shape: bf16[4096,128], index: 1, kind: input, shape index: {}]   ;;  %s9650_s2 = inlined_call_operand.hbm [shape: f32[512,128], index: 2, kind: output, shape index: {}]  }
   0x1   :  { %9690 = sst [smem:[#allocation96_spill]] %s9650_s2 }
   0x2   :  { %7 = vsyncpa [#allocation4], 0 }
   0x3   :  { %9 = vsyncpa [#allocation4 + $0x1], 0 }
   0x4   :  { %10 = vsyncpa [#allocation7], 0 }
   0x5   :  { %12 = vsyncpa [#allocation7 + $0x1], 0 }
   0x6   :  { %13 = vsyncpa [#allocation5], 0 }
   0x7   :  { %15 = vsyncpa [#allocation5 + $0x1], 0  ;;  %s7636_s9 = smov 0   ;;  %s7638_s10 = smov 0  }
   0x8   :  { %s7640_s11 = smov 0   ;;  %s7642_s12 = smov 0  }
   0x9   :  { %s7644_s13 = smov 0   ;;  %s7646_s14 = smov 0  }
   0xa   :  { %s7648_s15 = smov 0   ;;  %s7650_s16 = smov 0  }
   0xb   :  { %s7652_s17 = smov 0   ;;  %s7654_s18 = smov 0  }
   0xc   :  { %s7656_s19 = smov 0   ;;  %s7658_s20 = smov 0  }
   0xd   :  { %s7660_s21 = smov 0   ;;  %s7662_s22 = smov 0  }
   0xe LB: > { %9691 = sst [smem:[#allocation12_spill]] %s7586_s18  ;;  %s30_s23 = sadd.s32 1, %s7594_s20  ;;  %s7602_s22 = sphi %s7662_s22, %s21_s22   ;;  %s7598_s21 = sphi %s7660_s21, %s9927_s21   ;;  %s7594_s20 = sphi %s7658_s20, %s9926_s20   ;;  %s7590_s19 = sphi %s7656_s19, %s9925_s19   ;;  %s7586_s18 = sphi %s7654_s18, %s9924_s18   ;;  %s7582_s17 = sphi %s7652_s17, %s9923_s17   ;;  %s7578_s16 = sphi %s7650_s16, %s9922_s16   ;;  %s7574_s15 = sphi %s7648_s15, %s9921_s15   ;;  %s7570_s14 = sphi %s7646_s14, %s9920_s14   ;;  %s7566_s13 = sphi %s7644_s13, %s9919_s13   ;;  %s7562_s12 = sphi %s7642_s12, %s9918_s12   ;;  %s7558_s11 = sphi %s7640_s11, %s9917_s11   ;;  %s7554_s10 = sphi %s7638_s10, %s9916_s10   ;;  %s7550_s9 = sphi %s7636_s9, %s9915_s9  }
   0xf   : > { %9692 = sst [smem:[#allocation13_spill]] %s7590_s19  ;;  %s33_s24 = sadd.s32 1, %s7598_s21 }
  0x10   : > { %p31_p0 = scmp.ge.s32.totalorder %s30_s23, 2  ;;  %s42_s25 = sadd.s32 1, %s7582_s17 }
  0x11   : > { %p49_p1 = scmp.ne.s32.totalorder %s7582_s17, %s7578_s16  ;;  %p9655_p2 = scmp.eq.s32.totalorder %s7602_s22, 0 }
  0x12   : > { %s9929_s23 = smov (%p31_p0, %s30_s23), 0  ;;  %s9931_s24 = smov (!%p31_p0, %s33_s24), %s7598_s21 }
  0x13   : > { %9693 = sst [smem:[#allocation14_spill]] %s9929_s23  ;;  %s7717_s26 = ssub.s32 %s7594_s20, %s9929_s23 }
  0x14   : > { %p7721_p3 = por %p9655_p2, %p49_p1  ;;  %p35_p4 = scmp.ge.s32.totalorder %s9931_s24, 2 }
  0x15   : > { %s94_s28 = sadd.s32 1, %s7558_s11  ;;  %p9654_p6 = scmp.lt.s32.totalorder %s7602_s22, 4 }
  0x16   : > { %s9933_s24 = smov (%p35_p4, %s9931_s24), 0  ;;  %s131_s29 = sand.u32 1, %s7582_s17  }
  0x17   : > { %9695 = sst [smem:[#allocation15_spill]] %s9933_s24  ;;  %s37_s30 = ssub.s32 %s7598_s21, %s9933_s24 }
  0x18   : > { %s39_s3 = sor.u32 %s7717_s26, %s37_s30  ;;  %p92_p7 = scmp.eq.s32.totalorder %s37_s30, 0 }
  0x19   : > { %p40_p8 = scmp.eq.s32.totalorder %s39_s3, 0  ;;  %s5713_s4 = sshll.u32 %s131_s29, 11 }
  0x1a   : > { %s7736_s5 = scalar_select %p92_p7, %s7558_s11, %s94_s28  }
  0x1b   : > { %s7739_s6 = scalar_select %p40_p8, %s7582_s17, %s42_s25  }
  0x1c   : > { %s5715_s7 = sshll.u32 %s7594_s20, 4  ;;  %s6116_s8 = sshll.u32 %s7598_s21, 10 }
  0x1d   : > { %s135_s23 = scalar_lea.vmem [#allocation3], %s5713_s4  ;;  %s142_s19 = sadd.s32 %s6116_s8, %s5715_s7 }
  0x1e   : > { %s145_s2 = sshll.u32 %s135_s23, 4  ;;  %s5717_s18 = sshll.u32 %s142_s19, 6  ;;  %s7743_s2 = int_to_ptr.vmem [resolvable:$true] %s145_s2 }
  0x1f   : > { %p7749_p9 = pnand %p9654_p6, %p7721_p3  ;;  %s7756_s25 = scalar_lea.hbm %s9648_s0, %s5717_s18 }
  0x20   : > { %p5721_p10 = scmp.ge.s32.totalorder %s7602_s22, 1  ;;  %s7759_s23 = scalar_lea.sflag [#allocation4], %s131_s29 }
  0x21   : > { %s7392_s19 = scalar_lea.hbm %s7756_s25, 32768  ;;  %p7394_p12 = pneg %p7749_p9 }
  0x22   : > { %p7393_p11 = scmp.ne.s32.totalorder %s7756_s25, %s7392_s19  ;;  %s7397_s18 = scalar_lea.hbm %s9648_s0, 131072 }
  0x23   : > { %p7398_p1 = scmp.lt.u32.totalorder %s7756_s25, %s9648_s0  ;;  %p7399_p3 = scmp.lt.u32.totalorder %s7397_s18, %s7392_s19 }
  0x24   : > { %p7395_p13 = pnand %p7394_p12, %p7393_p11  ;;  %p7401_p7 = scmp.lt.u32.totalorder %s7392_s19, %s7756_s25 }
  0x25   : > { %p7400_p4 = por %p7399_p3, %p7398_p1 }
  0x26   : > { %p7396_p0 = pneg %p7395_p13 }
  0x27   : > { %p7402_p8 = por %p7401_p7, %p7400_p4 }
  0x29   : > { %p7403_p6 = pnand %p7402_p8, %p7396_p0 }
  0x2b   : > { %7406 = shalt.err (!%p7403_p6)
}
  0x2c   : > { %s7407_s29 = scalar_lea.vmem %s7743_s2, 32768  ;;  %s7604_s8 = smov [#allocation3]  }
  0x2d   : > { %p7408_p11 = scmp.ne.s32.totalorder %s7743_s2, %s7407_s29  ;;  %s7412_s30 = sshll.u32 %s7604_s8, 4  ;;  %s7413_s30 = int_to_ptr.vmem [resolvable:$false] %s7412_s30 }
  0x2e   : > { %s7414_s3 = scalar_lea.vmem %s7413_s30, 65536  ;;  %p7415_p5 = scmp.lt.s32.totalorder %s7743_s2, %s7413_s30 }
  0x2f   : > { %p7410_p13 = pnand %p7408_p11, %p7394_p12  ;;  %p7416_p1 = scmp.lt.s32.totalorder %s7414_s3, %s7407_s29 }
  0x31   : > { %p7411_p2 = pneg %p7410_p13  ;;  %p7417_p3 = por %p7416_p1, %p7415_p5 }
  0x33   : > { %p7418_p4 = pnand %p7417_p3, %p7411_p2 }
  0x35   : > { %7421 = shalt.err (!%p7418_p4)
}
  0x36   : > { %s7605_s19 = smov 2048   ;;  %s7606_s27 = smov 1024  }
  0x37   : > { %s9656_s28 = smov 64   ;;  %p174_p2 = scmp.lt.s32.totalorder %s7602_s22, 5 }
  0x38   : > { %7024 = dma.hbm_to_vmem [thread:$0]  (!%p7749_p9), %s7756_s25, 32768, %s7743_s2, %s7759_s23, %s7605_s19, %s7606_s27, %s9656_s28  }
  0x39   : > { %p7791_p5 = pnand %p5721_p10, %p174_p2  ;;  %s5709_s4 = sadd.s32 4294967295, %s7602_s22  }
  0x3a   : > { %s5710_s7 = sadd.s32 4294967294, %s7602_s22   ;;  %p56_p6 = scmp.eq.s32.totalorder %s5709_s4, 0 }
  0x3b   : > { %p66_p12 = scmp.eq.s32.totalorder %s7717_s26, 0  ;;  %s68_s29 = sadd.s32 1, %s7570_s14 }
  0x3c   : > { %p75_p0 = scmp.ne.s32.totalorder %s7570_s14, %s7566_s13  ;;  %p9698_p7 = scmp.ne.s32.totalorder %s7578_s16, %s7574_s15 }
  0x3d   : > { %p81_p9 = scmp.ne.s32.totalorder %s7566_s13, %s7562_s12  ;;  %p9700_p10 = scmp.eq.s32.totalorder %s7602_s22, 0 }
  0x3e   : > { %p7804_p8 = por %p56_p6, %p9698_p7  ;;  %p104_p1 = scmp.ne.s32.totalorder %s7558_s11, %s7554_s10 }
  0x3f   : > { %s7811_s2 = scalar_select %p66_p12, %s7570_s14, %s68_s29  }
  0x40   : > { %s9699_s24 = scalar_select %p7804_p8, 1, 0 }
  0x41   : > { %p7815_p11 = por %p75_p0, %p9700_p10  ;;  %p7819_p13 = por %p81_p9, %p56_p6 }
  0x42   : > { %p105_p3 = scmp.eq.s32.totalorder %s5709_s4, 3  ;;  %p110_p4 = scmp.ne.s32.totalorder %s7554_s10, %s7550_s9 }
  0x43   : > { %s9702_s26 = scalar_select %p7819_p13, 1, 0 }
  0x44   : > { %p111_p2 = scmp.eq.s32.totalorder %s5710_s7, 3  ;;  %p7827_p7 = por %p105_p3, %p104_p1 }
  0x45   : > { %s155_s12 = sand.u32 1, %s7570_s14   ;;  %s6117_s30 = sshll.u32 %s7594_s20, 14 }
  0x46   : > { %s9703_s15 = scalar_select %p7827_p7, 1, 0 }
  0x47   : > { %p7832_p12 = por %p111_p2, %p110_p4  ;;  %s5718_s8 = sshll.u32 %s155_s12, 10 }
  0x48   : > { %s7840_s27 = scalar_lea.hbm %s9649_s1, %s6117_s30  ;;  %s159_s4 = scalar_lea.vmem [#allocation6], %s5718_s8 }
  0x49   : > { %s9704_s23 = scalar_select %p7832_p12, 1, 0 }
  0x4a   : > { %s166_s7 = sshll.u32 %s159_s4, 4  ;;  %p9705_p6 = scmp.lt.s32.totalorder %s7602_s22, 4  ;;  %s7850_s7 = int_to_ptr.vmem [resolvable:$true] %s166_s7 }
  0x4b   : > { %s7852_s28 = scalar_lea.sflag [#allocation7], %s155_s12  ;;  %s7422_s30 = scalar_lea.hbm %s7840_s27, 16384 }
  0x4c   : > { %p7846_p0 = pnand %p9705_p6, %p7815_p11  ;;  %p7423_p9 = scmp.ne.s32.totalorder %s7840_s27, %s7422_s30 }
  0x4d   : > { %s7427_s3 = scalar_lea.hbm %s9649_s1, 32768  ;;  %p7428_p11 = scmp.lt.u32.totalorder %s7840_s27, %s9649_s1 }
  0x4e   : > { %p7424_p10 = pneg %p7846_p0  ;;  %p7429_p4 = scmp.lt.u32.totalorder %s7427_s3, %s7422_s30 }
  0x4f   : > { %p7431_p6 = scmp.lt.u32.totalorder %s7422_s30, %s7840_s27 }
  0x50   : > { %p7425_p1 = pnand %p7424_p10, %p7423_p9  ;;  %p7430_p2 = por %p7429_p4, %p7428_p11 }
  0x52   : > { %p7426_p3 = pneg %p7425_p1  ;;  %p7432_p12 = por %p7431_p6, %p7430_p2 }
  0x54   : > { %p7433_p7 = pnand %p7432_p12, %p7426_p3 }
  0x56   : > { %7436 = shalt.err (!%p7433_p7)
}
  0x57   : > { %s7437_s12 = scalar_lea.vmem %s7850_s7, 16384  ;;  %s7608_s25 = smov [#allocation6]  }
  0x58   : > { %p7438_p9 = scmp.ne.s32.totalorder %s7850_s7, %s7437_s12  ;;  %s7442_s8 = sshll.u32 %s7608_s25, 4  ;;  %s7443_s8 = int_to_ptr.vmem [resolvable:$false] %s7442_s8 }
  0x59   : > { %s7444_s19 = scalar_lea.vmem %s7443_s8, 32768  ;;  %p7445_p8 = scmp.lt.s32.totalorder %s7850_s7, %s7443_s8 }
  0x5a   : > { %p7440_p1 = pnand %p7438_p9, %p7424_p10  ;;  %p7446_p11 = scmp.lt.s32.totalorder %s7444_s19, %s7437_s12 }
  0x5c   : > { %p7441_p13 = pneg %p7440_p1  ;;  %p7447_p4 = por %p7446_p11, %p7445_p8 }
  0x5e   : > { %p7448_p2 = pnand %p7447_p4, %p7441_p13 }
  0x60   : > { %7451 = shalt.err (!%p7448_p2)
}
  0x61   : > { %s7609_s30 = smov 4   ;;  %s9707_s3 = smov 64  }
  0x62   : > { %7027 = dma.hbm_to_vmem [thread:$0]  (!%p7846_p0), %s7840_s27, 16384, %s7850_s7, %s7852_s28, %s9707_s3, %s9707_s3, %s7609_s30  }
  0x63   : > { %178 = sbr.rel (%p7791_p5) target bundleno = 1708 (0x6ac), region = 28  ;;  %s180_s4 = sand.u32 (!%p7791_p5), 1, %s7578_s16  }
  0x64   : > { %s5722_s25 = sshll.u32 (!%p7791_p5), %s180_s4, 11  ;;  %s181_s12 = scalar_lea.sflag (!%p7791_p5), [#allocation4], %s180_s4 }
  0x65   : > { %s7885_s8 = scalar_lea.vmem (!%p7791_p5), [#allocation3], %s5722_s25  ;;  %p9708_p8 = scmp.ne.s32.totalorder (!%p7791_p5), %s9699_s24, 0 }
  0x6a   : > { %7537 = dma.done.wait (%p9708_p8), %s181_s12, 32768  }
  0x6b   : > { %7539 = vsyncadd (%p9708_p8), %s181_s12, 4294934528  ;;  %s189_s29 = sand.u32 1, %s7566_s13   ;;  %p9709_p5 = scmp.ne.s32.totalorder %s9702_s26, 0 }
  0x6c   : > { %s5723_s19 = sshll.u32 %s189_s29, 10  ;;  %s190_s28 = scalar_lea.sflag [#allocation7], %s189_s29 }
  0x6d   : > { %s7892_s27 = scalar_lea.vmem [#allocation6], %s5723_s19 }
  0x6e   : > { %7541 = dma.done.wait (%p9709_p5), %s190_s28, 16384  }
  0x6f   : > { %7543 = vsyncadd (%p9709_p5), %s190_s28, 4294950912  ;;  %s216_s18 = sand.u32 1, %s7554_s10   ;;  %s9710_s24 = sld [smem:[#allocation12_spill]] }
  0x70   : > { %s5724_s7 = sshll.u32 %s216_s18, 8 }
  0x71   : > { %s7901_s30 = scalar_lea.vmem [#allocation8], %s5724_s7 }
  0x75   : > { %p5725_p13 = scmp.ne.s32.totalorder %s9710_s24, 0 }
  0x76   : > { %v7610_v0 = vmov (!%p5725_p13), 0.0  }
  0x77   : > { %227 = sbr.rel (%p5725_p13) target bundleno = 135 (0x87), region = 40  ;;  %228 = vst [vmem:[#allocation2] sm:$0xff] (!%p5725_p13), %v7610_v0  ;;  %229 = vst [vmem:[#allocation2 + $0x8] sm:$0xff] (!%p5725_p13), %v7610_v0 }
  0x78   : > { %230 = vst [vmem:[#allocation2 + $0x10] sm:$0xff] (!%p5725_p13), %v7610_v0  ;;  %231 = vst [vmem:[#allocation2 + $0x18] sm:$0xff] (!%p5725_p13), %v7610_v0 }
  0x79   : > { %232 = vst [vmem:[#allocation2 + $0x20] sm:$0xff] (!%p5725_p13), %v7610_v0  ;;  %233 = vst [vmem:[#allocation2 + $0x28] sm:$0xff] (!%p5725_p13), %v7610_v0 }
  0x7a   : > { %234 = vst [vmem:[#allocation2 + $0x30] sm:$0xff] (!%p5725_p13), %v7610_v0  ;;  %235 = vst [vmem:[#allocation2 + $0x38] sm:$0xff] (!%p5725_p13), %v7610_v0 }
  0x7b   : > { %236 = vst [vmem:[#allocation2 + $0x40] sm:$0xff] (!%p5725_p13), %v7610_v0  ;;  %237 = vst [vmem:[#allocation2 + $0x48] sm:$0xff] (!%p5725_p13), %v7610_v0 }
  0x7c   : > { %238 = vst [vmem:[#allocation2 + $0x50] sm:$0xff] (!%p5725_p13), %v7610_v0  ;;  %239 = vst [vmem:[#allocation2 + $0x58] sm:$0xff] (!%p5725_p13), %v7610_v0 }
  0x7d   : > { %240 = vst [vmem:[#allocation2 + $0x60] sm:$0xff] (!%p5725_p13), %v7610_v0  ;;  %241 = vst [vmem:[#allocation2 + $0x68] sm:$0xff] (!%p5725_p13), %v7610_v0 }
  0x7e   : > { %242 = vst [vmem:[#allocation2 + $0x70] sm:$0xff] %v7610_v0  ;;  %243 = vst [vmem:[#allocation2 + $0x78] sm:$0xff] %v7610_v0 }
  0x7f   : > { %244 = vst [vmem:[#allocation2 + $0x80] sm:$0xff] %v7610_v0  ;;  %245 = vst [vmem:[#allocation2 + $0x88] sm:$0xff] %v7610_v0 }
  0x80   : > { %246 = vst [vmem:[#allocation2 + $0x90] sm:$0xff] %v7610_v0  ;;  %247 = vst [vmem:[#allocation2 + $0x98] sm:$0xff] %v7610_v0 }
  0x81   : > { %248 = vst [vmem:[#allocation2 + $0xa0] sm:$0xff] %v7610_v0  ;;  %249 = vst [vmem:[#allocation2 + $0xa8] sm:$0xff] %v7610_v0 }
  0x82   : > { %250 = vst [vmem:[#allocation2 + $0xb0] sm:$0xff] %v7610_v0  ;;  %251 = vst [vmem:[#allocation2 + $0xb8] sm:$0xff] %v7610_v0 }
  0x83   : > { %252 = vst [vmem:[#allocation2 + $0xc0] sm:$0xff] %v7610_v0  ;;  %253 = vst [vmem:[#allocation2 + $0xc8] sm:$0xff] %v7610_v0 }
  0x84   : > { %254 = vst [vmem:[#allocation2 + $0xd0] sm:$0xff] %v7610_v0  ;;  %255 = vst [vmem:[#allocation2 + $0xd8] sm:$0xff] %v7610_v0 }
  0x85   : > { %256 = vst [vmem:[#allocation2 + $0xe0] sm:$0xff] %v7610_v0  ;;  %257 = vst [vmem:[#allocation2 + $0xe8] sm:$0xff] %v7610_v0 }
  0x86   : > { %258 = vst [vmem:[#allocation2 + $0xf0] sm:$0xff] %v7610_v0  ;;  %259 = vst [vmem:[#allocation2 + $0xf8] sm:$0xff] %v7610_v0 }
  0x87 PF: > { %v7160_v1 = vld [vmem:[%s7892_s27 + $0x40] sm:$0xff]   ;;  %v7164_v5 = vld [vmem:[%s7892_s27 + $0x48] sm:$0xff]   ;;  %v7168_v9 = vld [vmem:[%s7892_s27 + $0x50] sm:$0xff]   ;;  %s9711_s26 = sld [smem:[#allocation12_spill]] }
  0x88   : > { %v7161_v2 = vld [vmem:[%s7892_s27 + $0xc0] sm:$0xff]   ;;  %6119 = vmatprep.subr.bf16.mxu0 %v7160_v1  ;;  %v7165_v6 = vld [vmem:[%s7892_s27 + $0xc8] sm:$0xff]   ;;  %v7169_v10 = vld [vmem:[%s7892_s27 + $0xd0] sm:$0xff]  }
  0x89   : > { %v7162_v3 = vld [vmem:[%s7892_s27] sm:$0xff]   ;;  %6231 = vmatprep.subr.bf16.mxu1 %v7161_v2  ;;  %v7166_v7 = vld [vmem:[%s7892_s27 + $0x8] sm:$0xff]   ;;  %v7170_v11 = vld [vmem:[%s7892_s27 + $0x10] sm:$0xff]  }
  0x8a   : > { %v7163_v4 = vld [vmem:[%s7892_s27 + $0x80] sm:$0xff]   ;;  %6120 = vmatpush3.bf16.msra.mxu0 %v7162_v3  ;;  %v7167_v8 = vld [vmem:[%s7892_s27 + $0x88] sm:$0xff]   ;;  %v7171_v12 = vld [vmem:[%s7892_s27 + $0x90] sm:$0xff]  }
  0x8b   : > { %6232 = vmatpush3.bf16.msra.mxu1 %v7163_v4  ;;  %6121 = vmatprep.subr.bf16.mxu0 %v7164_v5  ;;  %v7172_v13 = vld [vmem:[%s7892_s27 + $0x58] sm:$0xff]   ;;  %v7176_v17 = vld [vmem:[%s7892_s27 + $0x60] sm:$0xff]   ;;  %v7180_v21 = vld [vmem:[%s7892_s27 + $0x68] sm:$0xff]  }
  0x8c   : > { %6233 = vmatprep.subr.bf16.mxu1 %v7165_v6  ;;  %v7173_v14 = vld [vmem:[%s7892_s27 + $0xd8] sm:$0xff]   ;;  %v7177_v18 = vld [vmem:[%s7892_s27 + $0xe0] sm:$0xff]   ;;  %v7181_v22 = vld [vmem:[%s7892_s27 + $0xe8] sm:$0xff]  }
  0x8d   : > { %v7174_v15 = vld [vmem:[%s7892_s27 + $0x18] sm:$0xff]   ;;  %v7178_v19 = vld [vmem:[%s7892_s27 + $0x20] sm:$0xff]   ;;  %v7182_v23 = vld [vmem:[%s7892_s27 + $0x28] sm:$0xff]   ;;  %p6110_p7 = scmp.ne.s32.totalorder %s9711_s26, 1 }
  0x8e   : > { %6122 = vmatpush3.bf16.msra.mxu0 %v7166_v7  ;;  %v7175_v16 = vld [vmem:[%s7892_s27 + $0x98] sm:$0xff]   ;;  %v7179_v20 = vld [vmem:[%s7892_s27 + $0xa0] sm:$0xff]   ;;  %v7183_v24 = vld [vmem:[%s7892_s27 + $0xa8] sm:$0xff]  }
  0x8f   : > { %6234 = vmatpush3.bf16.msra.mxu1 %v7167_v8  ;;  %6123 = vmatprep.subr.bf16.mxu0 %v7168_v9  ;;  %v7184_v25 = vld [vmem:[%s7892_s27 + $0x70] sm:$0xff]   ;;  %v7188_v29 = vld [vmem:[%s7892_s27 + $0x78] sm:$0xff]   ;;  %v292_v33 = vld [vmem:[%s7885_s8] sm:$0xff] }
  0x90   : > { %6235 = vmatprep.subr.bf16.mxu1 %v7169_v10  ;;  %v7185_v26 = vld [vmem:[%s7892_s27 + $0xf0] sm:$0xff]   ;;  %v7189_v30 = vld [vmem:[%s7892_s27 + $0xf8] sm:$0xff]   ;;  %v300_v34 = vld [vmem:[%s7885_s8 + $0x40] sm:$0xff] }
  0x91   : > { %v7186_v27 = vld [vmem:[%s7892_s27 + $0x30] sm:$0xff]   ;;  %v7190_v31 = vld [vmem:[%s7892_s27 + $0x38] sm:$0xff]   ;;  %v293_v35 = vld [vmem:[%s7885_s8 + $0x8] sm:$0xff]  ;;  %v5726_v36 = vcombine.low %v292_v33, %v300_v34  ;;  %v5727_v37 = vcombine.high %v292_v33, %v300_v34 }
  0x92   : > { %6124 = vmatpush3.bf16.msra.mxu0 %v7170_v11  ;;  %v7187_v28 = vld [vmem:[%s7892_s27 + $0xb0] sm:$0xff]   ;;  %v7191_v32 = vld [vmem:[%s7892_s27 + $0xb8] sm:$0xff]   ;;  %v301_v38 = vld [vmem:[%s7885_s8 + $0x48] sm:$0xff] }
  0x93   : > { %6236 = vmatpush3.bf16.msra.mxu1 %v7171_v12  ;;  %6125 = vmatprep.subr.bf16.mxu0 %v7172_v13  ;;  %v5728_v39 = vcombine.low %v293_v35, %v301_v38  ;;  %v5729_v40 = vcombine.high %v293_v35, %v301_v38  ;;  %v7192_v41 = vld [vmem:[%s7892_s27 + $0x140] sm:$0xff]   ;;  %v309_v48 = vld [vmem:[%s7885_s8 + $0x88] sm:$0xff]  ;;  %v7200_v3 = vld [vmem:[%s7892_s27 + $0x150] sm:$0xff]  }
  0x94   : > { %6237 = vmatprep.subr.bf16.mxu1 %v7173_v14  ;;  %2884 = vmatprep.mubr.bf16.mxu0 %v5727_v37  ;;  %v7193_v42 = vld [vmem:[%s7892_s27 + $0x100] sm:$0xff]   ;;  %v317_v49 = vld [vmem:[%s7885_s8 + $0xc8] sm:$0xff]  ;;  %v7201_v5 = vld [vmem:[%s7892_s27 + $0x110] sm:$0xff]  }
  0x95   : > { %3045 = vmatprep.mubr.bf16.mxu1 %v5729_v40  ;;  %v7194_v43 = vld [vmem:[%s7892_s27 + $0x1c0] sm:$0xff]   ;;  %v5745_v51 = vcombine.high %v309_v48, %v317_v49  ;;  %v325_v53 = vld [vmem:[%s7885_s8 + $0x108] sm:$0xff]  ;;  %v5744_v57 = vcombine.low %v309_v48, %v317_v49  ;;  %v7202_v8 = vld [vmem:[%s7892_s27 + $0x1d0] sm:$0xff]  }
  0x96   : > { %6126 = vmatpush3.bf16.msra.mxu0 %v7174_v15  ;;  %v7195_v44 = vld [vmem:[%s7892_s27 + $0x180] sm:$0xff]   ;;  %v333_v54 = vld [vmem:[%s7885_s8 + $0x148] sm:$0xff]  ;;  %v7203_v10 = vld [vmem:[%s7892_s27 + $0x190] sm:$0xff]  }
  0x97   : > { %6238 = vmatpush3.bf16.msra.mxu1 %v7175_v16  ;;  %6127 = vmatprep.subr.bf16.mxu0 %v7176_v17  ;;  %v308_v45 = vld [vmem:[%s7885_s8 + $0x80] sm:$0xff]  ;;  %v7196_v56 = vld [vmem:[%s7892_s27 + $0x148] sm:$0xff]   ;;  %v5761_v60 = vcombine.high %v325_v53, %v333_v54  ;;  %v5760_v6 = vcombine.low %v325_v53, %v333_v54  ;;  %v7204_v15 = vld [vmem:[%s7892_s27 + $0x158] sm:$0xff]  }
  0x98   : > { %6239 = vmatprep.subr.bf16.mxu1 %v7177_v18  ;;  %v316_v46 = vld [vmem:[%s7885_s8 + $0xc0] sm:$0xff]  ;;  %v7197_v59 = vld [vmem:[%s7892_s27 + $0x108] sm:$0xff]   ;;  %v7205_v16 = vld [vmem:[%s7892_s27 + $0x118] sm:$0xff]  }
  0x99   : > { %v5743_v47 = vcombine.high %v308_v45, %v316_v46  ;;  %v324_v50 = vld [vmem:[%s7885_s8 + $0x100] sm:$0xff]  ;;  %v5742_v55 = vcombine.low %v308_v45, %v316_v46  ;;  %v7198_v61 = vld [vmem:[%s7892_s27 + $0x1c8] sm:$0xff]   ;;  %v7206_v18 = vld [vmem:[%s7892_s27 + $0x1d8] sm:$0xff]  }
  0x9a   : > { %6128 = vmatpush3.bf16.msra.mxu0 %v7178_v19  ;;  %v332_v52 = vld [vmem:[%s7885_s8 + $0x140] sm:$0xff]  ;;  %v7199_v62 = vld [vmem:[%s7892_s27 + $0x188] sm:$0xff]   ;;  %v7217_v48 = vld [vmem:[%s7892_s27 + $0x130] sm:$0xff]  }
  0x9b   : > { %6240 = vmatpush3.bf16.msra.mxu1 %v7179_v20  ;;  %6129 = vmatprep.subr.bf16.mxu0 %v7180_v21  ;;  %v5759_v58 = vcombine.high %v324_v50, %v332_v52  ;;  %v340_v63 = vld [vmem:[%s7885_s8 + $0x180] sm:$0xff]  ;;  %v341_v1 = vld [vmem:[%s7885_s8 + $0x188] sm:$0xff]  ;;  %v5758_v4 = vcombine.low %v324_v50, %v332_v52  ;;  %v7207_v21 = vld [vmem:[%s7892_s27 + $0x198] sm:$0xff]  }
  0x9c   : > { %6241 = vmatprep.subr.bf16.mxu1 %v7181_v22  ;;  %v348_v0 = vld [vmem:[%s7885_s8 + $0x1c0] sm:$0xff]  ;;  %v349_v2 = vld [vmem:[%s7885_s8 + $0x1c8] sm:$0xff]  ;;  %v7218_v49 = vld [vmem:[%s7892_s27 + $0x1f0] sm:$0xff]  }
  0x9d   : > { %v5775_v7 = vcombine.high %v340_v63, %v348_v0  ;;  %v5777_v9 = vcombine.high %v341_v1, %v349_v2  ;;  %v356_v11 = vld [vmem:[%s7885_s8 + $0x200] sm:$0xff]  ;;  %v357_v13 = vld [vmem:[%s7885_s8 + $0x208] sm:$0xff]  ;;  %v5774_v17 = vcombine.low %v340_v63, %v348_v0  ;;  %v5776_v19 = vcombine.low %v341_v1, %v349_v2  ;;  %v7219_v50 = vld [vmem:[%s7892_s27 + $0x1b0] sm:$0xff]  }
  0x9e   : > { %6130 = vmatpush3.bf16.msra.mxu0 %v7182_v23  ;;  %v364_v12 = vld [vmem:[%s7885_s8 + $0x240] sm:$0xff]  ;;  %v365_v14 = vld [vmem:[%s7885_s8 + $0x248] sm:$0xff] }
  0x9f   : > { %6242 = vmatpush3.bf16.msra.mxu1 %v7183_v24  ;;  %6131 = vmatprep.subr.bf16.mxu0 %v7184_v25  ;;  %v5791_v20 = vcombine.high %v356_v11, %v364_v12  ;;  %v5793_v22 = vcombine.high %v357_v13, %v365_v14  ;;  %v372_v23 = vld [vmem:[%s7885_s8 + $0x280] sm:$0xff]  ;;  %v7212_v35 = vld [vmem:[%s7892_s27 + $0x168] sm:$0xff]  }
  0xa0   : > { %6243 = vmatprep.subr.bf16.mxu1 %v7185_v26  ;;  %v380_v24 = vld [vmem:[%s7885_s8 + $0x2c0] sm:$0xff]  ;;  %v373_v26 = vld [vmem:[%s7885_s8 + $0x288] sm:$0xff] }
  0xa1   : > { %v7208_v25 = vld [vmem:[%s7892_s27 + $0x160] sm:$0xff]   ;;  %v5807_v33 = vcombine.high %v372_v23, %v380_v24  ;;  %v7213_v37 = vld [vmem:[%s7892_s27 + $0x128] sm:$0xff]  }
  0xa2   : > { %6132 = vmatpush3.bf16.msra.mxu0 %v7186_v27  ;;  %v381_v27 = vld [vmem:[%s7885_s8 + $0x2c8] sm:$0xff]  ;;  %v412_v52 = vld [vmem:[%s7885_s8 + $0x3c0] sm:$0xff] }
  0xa3   : > { %6244 = vmatpush3.bf16.msra.mxu1 %v7187_v28  ;;  %6133 = vmatprep.subr.bf16.mxu0 %v7188_v29  ;;  %v7209_v28 = vld [vmem:[%s7892_s27 + $0x120] sm:$0xff]   ;;  %v5809_v34 = vcombine.high %v373_v26, %v381_v27  ;;  %v7214_v38 = vld [vmem:[%s7892_s27 + $0x1e8] sm:$0xff]  }
  0xa4   : > { %6245 = vmatprep.subr.bf16.mxu1 %v7189_v30  ;;  %v7210_v29 = vld [vmem:[%s7892_s27 + $0x1e0] sm:$0xff]   ;;  %v7215_v40 = vld [vmem:[%s7892_s27 + $0x1a8] sm:$0xff]  }
  0xa5   : > { %v7211_v30 = vld [vmem:[%s7892_s27 + $0x1a0] sm:$0xff]   ;;  %v405_v53 = vld [vmem:[%s7885_s8 + $0x388] sm:$0xff] }
  0xa6   : > { %6134 = vmatpush3.bf16.msra.mxu0 %v7190_v31  ;;  %v5790_v31 = vcombine.low %v356_v11, %v364_v12  ;;  %v413_v54 = vld [vmem:[%s7885_s8 + $0x3c8] sm:$0xff]  ;;  %v420_v63 = vld [vmem:[%s7885_s8 + $0x400] sm:$0xff] }
  0xa7   : > { %6246 = vmatpush3.bf16.msra.mxu1 %v7191_v32  ;;  %6343 = vmatprep.subr.bf16.mxu0 %v7192_v41  ;;  %v5792_v32 = vcombine.low %v357_v13, %v365_v14  ;;  %v389_v41 = vld [vmem:[%s7885_s8 + $0x308] sm:$0xff]  ;;  %v428_v0 = vld [vmem:[%s7885_s8 + $0x440] sm:$0xff] }
  0xa8   : > { %6455 = vmatprep.subr.bf16.mxu1 %v7194_v43  ;;  %v5806_v43 = vcombine.low %v372_v23, %v380_v24  ;;  %v421_v1 = vld [vmem:[%s7885_s8 + $0x408] sm:$0xff]  ;;  %v5854_v13 = vcombine.low %v420_v63, %v428_v0 }
  0xa9   : > { %2885 = vmatmul.mubr.bf16.vlgmr.msra.gmra.mrb[0].mxu0 %v5726_v36  ;;  %v388_v36 = vld [vmem:[%s7885_s8 + $0x300] sm:$0xff]  ;;  %v429_v2 = vld [vmem:[%s7885_s8 + $0x448] sm:$0xff] }
  0xaa   : > { %3046 = vmatmul.mubr.bf16.vlgmr.msra.gmra.mrb[0].mxu1 %v5728_v39  ;;  %6344 = vmatpush3.bf16.msra.mxu0 %v7193_v42  ;;  %v396_v39 = vld [vmem:[%s7885_s8 + $0x340] sm:$0xff]  ;;  %v397_v42 = vld [vmem:[%s7885_s8 + $0x348] sm:$0xff]  ;;  %v5856_v14 = vcombine.low %v421_v1, %v429_v2 }
  0xab   : > { %6456 = vmatpush3.bf16.msra.mxu1 %v7195_v44  ;;  %2892 = vmatprep.mubr.bf16.mxu0 %v5743_v47  ;;  %v5808_v44 = vcombine.low %v373_v26, %v381_v27  ;;  %v5823_v45 = vcombine.high %v388_v36, %v396_v39  ;;  %v5825_v46 = vcombine.high %v389_v41, %v397_v42  ;;  %v7216_v47 = vld [vmem:[%s7892_s27 + $0x170] sm:$0xff]   ;;  %v437_v11 = vld [vmem:[%s7885_s8 + $0x488] sm:$0xff]  ;;  %v476_v26 = vld [vmem:[%s7885_s8 + $0x5c0] sm:$0xff] }
  0xac   : > { %3053 = vmatprep.mubr.bf16.mxu1 %v5745_v51  ;;  %6345 = vmatprep.subr.bf16.mxu0 %v7196_v56  ;;  %v404_v51 = vld [vmem:[%s7885_s8 + $0x380] sm:$0xff]  ;;  %v7220_v56 = vld [vmem:[%s7892_s27 + $0x178] sm:$0xff]   ;;  %v445_v12 = vld [vmem:[%s7885_s8 + $0x4c8] sm:$0xff] }
  0xad   : > { %6457 = vmatprep.subr.bf16.mxu1 %v7198_v61  ;;  %v7222_v61 = vld [vmem:[%s7892_s27 + $0x1f8] sm:$0xff]   ;;  %v469_v27 = vld [vmem:[%s7885_s8 + $0x588] sm:$0xff] }
  0xae   : > { %6346 = vmatpush3.bf16.msra.mxu0 %v7197_v59  ;;  %v7221_v59 = vld [vmem:[%s7892_s27 + $0x138] sm:$0xff]  }
  0xaf   : > { %6458 = vmatpush3.bf16.msra.mxu1 %v7199_v62  ;;  %6347 = vmatprep.subr.bf16.mxu0 %v7200_v3  ;;  %v7223_v62 = vld [vmem:[%s7892_s27 + $0x1b8] sm:$0xff]   ;;  %v7224_v3 = vld [vmem:[%s7892_s27 + $0x240] sm:$0xff]  }
  0xb0   : > { %6459 = vmatprep.subr.bf16.mxu1 %v7202_v8  ;;  %v5857_v8 = vcombine.high %v421_v1, %v429_v2  ;;  %v294_v1 = vld [vmem:[%s7885_s8 + $0x10] sm:$0xff] }
  0xb1   : > { %2893 = vmatmul.mubr.bf16.gmra.mrb[4].mxu0 %v5742_v55  ;;  %v5822_v55 = vcombine.low %v388_v36, %v396_v39  ;;  %v493_v36 = vld [vmem:[%s7885_s8 + $0x648] sm:$0xff]  ;;  %v302_v2 = vld [vmem:[%s7885_s8 + $0x50] sm:$0xff] }
  0xb2   : > { %3054 = vmatmul.mubr.bf16.gmra.mrb[4].mxu1 %v5744_v57  ;;  %2900 = vmatprep.mubr.bf16.mxu0 %v5759_v58  ;;  %v5824_v57 = vcombine.low %v389_v41, %v397_v42  ;;  %v5839_v58 = vcombine.high %v404_v51, %v412_v52  ;;  %v500_v41 = vld [vmem:[%s7885_s8 + $0x680] sm:$0xff] }
  0xb3   : > { %3061 = vmatprep.mubr.bf16.mxu1 %v5761_v60  ;;  %6348 = vmatpush3.bf16.msra.mxu0 %v7201_v5  ;;  %v5841_v60 = vcombine.high %v405_v53, %v413_v54  ;;  %v5840_v5 = vcombine.low %v405_v53, %v413_v54  ;;  %v508_v42 = vld [vmem:[%s7885_s8 + $0x6c0] sm:$0xff] }
  0xb4   : > { %6460 = vmatpush3.bf16.msra.mxu1 %v7203_v10  ;;  %6349 = vmatprep.subr.bf16.mxu0 %v7204_v15  ;;  %v444_v10 = vld [vmem:[%s7885_s8 + $0x4c0] sm:$0xff]  ;;  %v5934_v53 = vcombine.low %v500_v41, %v508_v42 }
  0xb5   : > { %6461 = vmatprep.subr.bf16.mxu1 %v7206_v18  ;;  %v460_v18 = vld [vmem:[%s7885_s8 + $0x540] sm:$0xff] }
  0xb7   : > { %6350 = vmatpush3.bf16.msra.mxu0 %v7205_v16  ;;  %v5873_v16 = vcombine.high %v437_v11, %v445_v12 }
  0xb8   : > { %6462 = vmatpush3.bf16.msra.mxu1 %v7207_v21  ;;  %6351 = vmatprep.subr.bf16.mxu0 %v7208_v25  ;;  %v468_v25 = vld [vmem:[%s7885_s8 + $0x580] sm:$0xff] }
  0xb9   : > { %2901 = vmatmul.mubr.bf16.gmra.mrb[8].mxu0 %v5758_v4  ;;  %6463 = vmatprep.subr.bf16.mxu1 %v7210_v29  ;;  %v5838_v4 = vcombine.low %v404_v51, %v412_v52  ;;  %v517_v51 = vld [vmem:[%s7885_s8 + $0x708] sm:$0xff] }
  0xba   : > { %3062 = vmatmul.mubr.bf16.gmra.mrb[8].mxu1 %v5760_v6  ;;  %2908 = vmatprep.mubr.bf16.mxu0 %v5775_v7  ;;  %v5855_v6 = vcombine.high %v420_v63, %v428_v0  ;;  %v7226_v7 = vld [vmem:[%s7892_s27 + $0x2c0] sm:$0xff]   ;;  %v525_v52 = vld [vmem:[%s7885_s8 + $0x748] sm:$0xff] }
  0xbb   : > { %3069 = vmatprep.mubr.bf16.mxu1 %v5777_v9  ;;  %6352 = vmatpush3.bf16.msra.mxu0 %v7209_v28  ;;  %v436_v9 = vld [vmem:[%s7885_s8 + $0x480] sm:$0xff]  ;;  %v477_v28 = vld [vmem:[%s7885_s8 + $0x5c8] sm:$0xff] }
  0xbc   : > { %6464 = vmatpush3.bf16.msra.mxu1 %v7211_v30  ;;  %6353 = vmatprep.subr.bf16.mxu0 %v7212_v35  ;;  %v5871_v15 = vcombine.high %v436_v9, %v444_v10  ;;  %v5870_v21 = vcombine.low %v436_v9, %v444_v10  ;;  %v485_v35 = vld [vmem:[%s7885_s8 + $0x608] sm:$0xff]  ;;  %v310_v9 = vld [vmem:[%s7885_s8 + $0x90] sm:$0xff] }
  0xbd   : > { %6465 = vmatprep.subr.bf16.mxu1 %v7214_v38  ;;  %v5904_v38 = vcombine.low %v469_v27, %v477_v28  ;;  %v318_v10 = vld [vmem:[%s7885_s8 + $0xd0] sm:$0xff] }
  0xbf   : > { %6354 = vmatpush3.bf16.msra.mxu0 %v7213_v37  ;;  %v5902_v37 = vcombine.low %v468_v25, %v476_v26 }
  0xc0   : > { %6466 = vmatpush3.bf16.msra.mxu1 %v7215_v40  ;;  %6355 = vmatprep.subr.bf16.mxu0 %v7216_v47  ;;  %v5921_v40 = vcombine.high %v485_v35, %v493_v36  ;;  %v5935_v47 = vcombine.high %v500_v41, %v508_v42  ;;  %v351_v41 = vld [vmem:[%s7885_s8 + $0x1d8] sm:$0xff] }
  0xc1   : > { %2909 = vmatmul.mubr.bf16.gmra.mrb[12].mxu0 %v5774_v17  ;;  %6467 = vmatprep.subr.bf16.mxu1 %v7218_v49  ;;  %v452_v17 = vld [vmem:[%s7885_s8 + $0x500] sm:$0xff]  ;;  %v7239_v42 = vld [vmem:[%s7892_s27 + $0x298] sm:$0xff]  }
  0xc2   : > { %3070 = vmatmul.mubr.bf16.gmra.mrb[12].mxu1 %v5776_v19  ;;  %2916 = vmatprep.mubr.bf16.mxu0 %v5791_v20  ;;  %v453_v19 = vld [vmem:[%s7885_s8 + $0x508] sm:$0xff]  ;;  %v5887_v23 = vcombine.high %v452_v17, %v460_v18  ;;  %v5886_v29 = vcombine.low %v452_v17, %v460_v18  ;;  %v516_v49 = vld [vmem:[%s7885_s8 + $0x700] sm:$0xff]  ;;  %v5747_v17 = vcombine.high %v310_v9, %v318_v10 }
  0xc3   : > { %3077 = vmatprep.mubr.bf16.mxu1 %v5793_v22  ;;  %6356 = vmatpush3.bf16.msra.mxu0 %v7217_v48  ;;  %v461_v20 = vld [vmem:[%s7885_s8 + $0x548] sm:$0xff]  ;;  %v5872_v22 = vcombine.low %v437_v11, %v445_v12  ;;  %v5730_v11 = vcombine.low %v294_v1, %v302_v2  ;;  %v311_v12 = vld [vmem:[%s7885_s8 + $0x98] sm:$0xff] }
  0xc4   : > { %6468 = vmatpush3.bf16.msra.mxu1 %v7219_v50  ;;  %6357 = vmatprep.subr.bf16.mxu0 %v7220_v56  ;;  %v5889_v24 = vcombine.high %v453_v19, %v461_v20  ;;  %v5888_v30 = vcombine.low %v453_v19, %v461_v20  ;;  %v524_v50 = vld [vmem:[%s7885_s8 + $0x740] sm:$0xff]  ;;  %v5953_v56 = vcombine.high %v517_v51, %v525_v52  ;;  %v7228_v19 = vld [vmem:[%s7892_s27 + $0x248] sm:$0xff]  }
  0xc5   : > { %6469 = vmatprep.subr.bf16.mxu1 %v7222_v61  ;;  %v5950_v61 = vcombine.low %v516_v49, %v524_v50  ;;  %v7230_v20 = vld [vmem:[%s7892_s27 + $0x2c8] sm:$0xff]  }
  0xc7   : > { %6358 = vmatpush3.bf16.msra.mxu0 %v7221_v59  ;;  %v533_v59 = vld [vmem:[%s7885_s8 + $0x788] sm:$0xff] }
  0xc8   : > { %6470 = vmatpush3.bf16.msra.mxu1 %v7223_v62  ;;  %6567 = vmatprep.subr.bf16.mxu0 %v7224_v3  ;;  %v5952_v62 = vcombine.low %v517_v51, %v525_v52  ;;  %v295_v3 = vld [vmem:[%s7885_s8 + $0x18] sm:$0xff]  ;;  %v7244_v51 = vld [vmem:[%s7892_s27 + $0x268] sm:$0xff]  }
  0xc9   : > { %2917 = vmatmul.mubr.bf16.gmra.mrb[16].mxu0 %v5790_v31  ;;  %6679 = vmatprep.subr.bf16.mxu1 %v7226_v7  ;;  %v5903_v31 = vcombine.high %v468_v25, %v476_v26  ;;  %v5731_v7 = vcombine.high %v294_v1, %v302_v2  ;;  %v7232_v25 = vld [vmem:[%s7892_s27 + $0x250] sm:$0xff]   ;;  %v327_v26 = vld [vmem:[%s7885_s8 + $0x118] sm:$0xff]  ;;  %v7246_v52 = vld [vmem:[%s7892_s27 + $0x2e8] sm:$0xff]  }
  0xca   : > { %3078 = vmatmul.mubr.bf16.gmra.mrb[16].mxu1 %v5792_v32  ;;  %2924 = vmatprep.mubr.bf16.mxu0 %v5807_v33  ;;  %v5905_v32 = vcombine.high %v469_v27, %v477_v28  ;;  %v484_v33 = vld [vmem:[%s7885_s8 + $0x600] sm:$0xff]  ;;  %v335_v27 = vld [vmem:[%s7885_s8 + $0x158] sm:$0xff]  ;;  %v7234_v28 = vld [vmem:[%s7892_s27 + $0x2d0] sm:$0xff]  }
  0xcb   : > { %3085 = vmatprep.mubr.bf16.mxu1 %v5809_v34  ;;  %v492_v34 = vld [vmem:[%s7885_s8 + $0x640] sm:$0xff]  ;;  %v7249_v1 = vld [vmem:[%s7892_s27 + $0x230] sm:$0xff]  }
  0xcc   : > { %v5919_v39 = vcombine.high %v484_v33, %v492_v34  ;;  %v7251_v2 = vld [vmem:[%s7892_s27 + $0x2b0] sm:$0xff]  }
  0xd1   : > { %2925 = vmatmul.mubr.bf16.gmra.mrb[20].mxu0 %v5806_v43  ;;  %v501_v43 = vld [vmem:[%s7885_s8 + $0x688] sm:$0xff] }
  0xd2   : > { %3086 = vmatmul.mubr.bf16.gmra.mrb[20].mxu1 %v5808_v44  ;;  %2932 = vmatprep.mubr.bf16.mxu0 %v5823_v45  ;;  %v509_v44 = vld [vmem:[%s7885_s8 + $0x6c8] sm:$0xff]  ;;  %v5918_v45 = vcombine.low %v484_v33, %v492_v34  ;;  %v7233_v33 = vld [vmem:[%s7892_s27 + $0x210] sm:$0xff]  }
  0xd3   : > { %3093 = vmatprep.mubr.bf16.mxu1 %v5825_v46  ;;  %v5920_v46 = vcombine.low %v485_v35, %v493_v36  ;;  %v5937_v48 = vcombine.high %v501_v43, %v509_v44  ;;  %v5936_v54 = vcombine.low %v501_v43, %v509_v44  ;;  %v7235_v34 = vld [vmem:[%s7892_s27 + $0x290] sm:$0xff]   ;;  %v7236_v35 = vld [vmem:[%s7892_s27 + $0x258] sm:$0xff]   ;;  %v7240_v43 = vld [vmem:[%s7892_s27 + $0x260] sm:$0xff]  }
  0xd4   : > { %v7238_v36 = vld [vmem:[%s7892_s27 + $0x2d8] sm:$0xff]  }
  0xd9   : > { %2933 = vmatmul.mubr.bf16.gmra.mrb[24].mxu0 %v5822_v55  ;;  %v5951_v55 = vcombine.high %v516_v49, %v524_v50  ;;  %v7241_v49 = vld [vmem:[%s7892_s27 + $0x220] sm:$0xff]  }
  0xda   : > { %3094 = vmatmul.mubr.bf16.gmra.mrb[24].mxu1 %v5824_v57  ;;  %2940 = vmatprep.mubr.bf16.mxu0 %v5839_v58  ;;  %v532_v57 = vld [vmem:[%s7885_s8 + $0x780] sm:$0xff] }
  0xdb   : > { %3101 = vmatprep.mubr.bf16.mxu1 %v5841_v60  ;;  %v540_v58 = vld [vmem:[%s7885_s8 + $0x7c0] sm:$0xff]  ;;  %v541_v60 = vld [vmem:[%s7885_s8 + $0x7c8] sm:$0xff] }
  0xdc   : > { %v5967_v63 = vcombine.high %v532_v57, %v540_v58  ;;  %v5969_v0 = vcombine.high %v533_v59, %v541_v60  ;;  %v7243_v50 = vld [vmem:[%s7892_s27 + $0x2a0] sm:$0xff]  }
  0xe1   : > { %2941 = vmatmul.mubr.bf16.gmra.mrb[28].mxu0 %v5838_v4  ;;  %v303_v4 = vld [vmem:[%s7885_s8 + $0x58] sm:$0xff] }
  0xe2   : > { %3102 = vmatmul.mubr.bf16.gmra.mrb[28].mxu1 %v5840_v5  ;;  %2948 = vmatprep.mubr.bf16.mxu0 %v5855_v6  ;;  %v5966_v5 = vcombine.low %v532_v57, %v540_v58  ;;  %v5968_v6 = vcombine.low %v533_v59, %v541_v60  ;;  %v367_v57 = vld [vmem:[%s7885_s8 + $0x258] sm:$0xff]  ;;  %v7247_v58 = vld [vmem:[%s7892_s27 + $0x2a8] sm:$0xff]   ;;  %v7248_v59 = vld [vmem:[%s7892_s27 + $0x270] sm:$0xff]  }
  0xe3   : > { %3109 = vmatprep.mubr.bf16.mxu1 %v5857_v8  ;;  %v5733_v8 = vcombine.high %v295_v3, %v303_v4 }
  0xe9   : > { %2949 = vmatmul.mubr.bf16.gmra.mrb[32].mxu0 %v5854_v13  ;;  %v319_v13 = vld [vmem:[%s7885_s8 + $0xd8] sm:$0xff] }
  0xea   : > { %3110 = vmatmul.mubr.bf16.gmra.mrb[32].mxu1 %v5856_v14  ;;  %2956 = vmatprep.mubr.bf16.mxu0 %v5871_v15  ;;  %v5732_v14 = vcombine.low %v295_v3, %v303_v4  ;;  %v7225_v15 = vld [vmem:[%s7892_s27 + $0x200] sm:$0xff]   ;;  %v5749_v18 = vcombine.high %v311_v12, %v319_v13  ;;  %v7252_v3 = vld [vmem:[%s7892_s27 + $0x278] sm:$0xff]  }
  0xeb   : > { %3117 = vmatprep.mubr.bf16.mxu1 %v5873_v16  ;;  %v7227_v16 = vld [vmem:[%s7892_s27 + $0x280] sm:$0xff]   ;;  %v7254_v4 = vld [vmem:[%s7892_s27 + $0x2f8] sm:$0xff]  }
  0xf1   : > { %2957 = vmatmul.mubr.bf16.gmra.mrb[36].mxu0 %v5870_v21  ;;  %v326_v21 = vld [vmem:[%s7885_s8 + $0x110] sm:$0xff] }
  0xf2   : > { %3118 = vmatmul.mubr.bf16.gmra.mrb[36].mxu1 %v5872_v22  ;;  %2964 = vmatprep.mubr.bf16.mxu0 %v5887_v23  ;;  %v7229_v22 = vld [vmem:[%s7892_s27 + $0x208] sm:$0xff]   ;;  %v334_v23 = vld [vmem:[%s7885_s8 + $0x150] sm:$0xff] }
  0xf3   : > { %3125 = vmatprep.mubr.bf16.mxu1 %v5889_v24  ;;  %v7231_v24 = vld [vmem:[%s7892_s27 + $0x288] sm:$0xff]   ;;  %v5762_v44 = vcombine.low %v326_v21, %v334_v23 }
  0xf9   : > { %2965 = vmatmul.mubr.bf16.gmra.mrb[40].mxu0 %v5886_v29  ;;  %v5746_v29 = vcombine.low %v310_v9, %v318_v10  ;;  %v383_v9 = vld [vmem:[%s7885_s8 + $0x2d8] sm:$0xff] }
  0xfa   : > { %3126 = vmatmul.mubr.bf16.gmra.mrb[40].mxu1 %v5888_v30  ;;  %2972 = vmatprep.mubr.bf16.mxu0 %v5903_v31  ;;  %v5748_v30 = vcombine.low %v311_v12, %v319_v13  ;;  %v5763_v31 = vcombine.high %v326_v21, %v334_v23  ;;  %v7255_v10 = vld [vmem:[%s7892_s27 + $0x2b8] sm:$0xff]   ;;  %v7258_v13 = vld [vmem:[%s7892_s27 + $0x3c0] sm:$0xff]  }
  0xfb   : > { %3133 = vmatprep.mubr.bf16.mxu1 %v5905_v32  ;;  %v5765_v32 = vcombine.high %v327_v26, %v335_v27 }
 0x101   : > { %2973 = vmatmul.mubr.bf16.gmra.mrb[44].mxu0 %v5902_v37  ;;  %v342_v37 = vld [vmem:[%s7885_s8 + $0x190] sm:$0xff] }
 0x102   : > { %3134 = vmatmul.mubr.bf16.gmra.mrb[44].mxu1 %v5904_v38  ;;  %2980 = vmatprep.mubr.bf16.mxu0 %v5919_v39  ;;  %v350_v38 = vld [vmem:[%s7885_s8 + $0x1d0] sm:$0xff]  ;;  %v343_v39 = vld [vmem:[%s7885_s8 + $0x198] sm:$0xff] }
 0x103   : > { %3141 = vmatprep.mubr.bf16.mxu1 %v5921_v40  ;;  %v7237_v40 = vld [vmem:[%s7892_s27 + $0x218] sm:$0xff]   ;;  %v5778_v60 = vcombine.low %v342_v37, %v350_v38 }
 0x109   : > { %2981 = vmatmul.mubr.bf16.gmra.mrb[48].mxu0 %v5918_v45  ;;  %v7242_v45 = vld [vmem:[%s7892_s27 + $0x2e0] sm:$0xff]  }
 0x10a   : > { %3142 = vmatmul.mubr.bf16.gmra.mrb[48].mxu1 %v5920_v46  ;;  %2988 = vmatprep.mubr.bf16.mxu0 %v5935_v47  ;;  %v5764_v46 = vcombine.low %v327_v26, %v335_v27  ;;  %v5779_v47 = vcombine.high %v342_v37, %v350_v38  ;;  %v414_v26 = vld [vmem:[%s7885_s8 + $0x3d0] sm:$0xff]  ;;  %v407_v27 = vld [vmem:[%s7885_s8 + $0x398] sm:$0xff] }
 0x10b   : > { %3149 = vmatprep.mubr.bf16.mxu1 %v5937_v48  ;;  %v5781_v48 = vcombine.high %v343_v39, %v351_v41 }
 0x111   : > { %2989 = vmatmul.mubr.bf16.gmra.mrb[52].mxu0 %v5934_v53  ;;  %v358_v53 = vld [vmem:[%s7885_s8 + $0x210] sm:$0xff] }
 0x112   : > { %3150 = vmatmul.mubr.bf16.gmra.mrb[52].mxu1 %v5936_v54  ;;  %2996 = vmatprep.mubr.bf16.mxu0 %v5951_v55  ;;  %v366_v54 = vld [vmem:[%s7885_s8 + $0x250] sm:$0xff]  ;;  %v359_v55 = vld [vmem:[%s7885_s8 + $0x218] sm:$0xff] }
 0x113   : > { %3157 = vmatprep.mubr.bf16.mxu1 %v5953_v56  ;;  %v7245_v56 = vld [vmem:[%s7892_s27 + $0x228] sm:$0xff]   ;;  %v5794_v12 = vcombine.low %v358_v53, %v366_v54 }
 0x119   : > { %2997 = vmatmul.mubr.bf16.gmra.mrb[56].mxu0 %v5950_v61  ;;  %v7250_v61 = vld [vmem:[%s7892_s27 + $0x2f0] sm:$0xff]  }
 0x11a   : > { %3158 = vmatmul.mubr.bf16.gmra.mrb[56].mxu1 %v5952_v62  ;;  %3004 = vmatprep.mubr.bf16.mxu0 %v5967_v63  ;;  %v5780_v62 = vcombine.low %v343_v39, %v351_v41  ;;  %v5795_v63 = vcombine.high %v358_v53, %v366_v54  ;;  %v438_v41 = vld [vmem:[%s7885_s8 + $0x490] sm:$0xff] }
 0x11b   : > { %3165 = vmatprep.mubr.bf16.mxu1 %v5969_v0  ;;  %v5797_v0 = vcombine.high %v359_v55, %v367_v57 }
 0x121   : > { %3005 = vmatmul.mubr.bf16.gmra.mrb[60].mxu0 %v5966_v5  ;;  %v374_v5 = vld [vmem:[%s7885_s8 + $0x290] sm:$0xff] }
 0x122   : > { %3166 = vmatmul.mubr.bf16.gmra.mrb[60].mxu1 %v5968_v6  ;;  %3206 = vmatprep.mubr.bf16.mxu0 %v5731_v7  ;;  %v382_v6 = vld [vmem:[%s7885_s8 + $0x2d0] sm:$0xff]  ;;  %v375_v7 = vld [vmem:[%s7885_s8 + $0x298] sm:$0xff] }
 0x123   : > { %3367 = vmatprep.mubr.bf16.mxu1 %v5733_v8  ;;  %v7253_v8 = vld [vmem:[%s7892_s27 + $0x238] sm:$0xff]   ;;  %v5810_v21 = vcombine.low %v374_v5, %v382_v6 }
 0x129   : > { %3207 = vmatmul.mubr.bf16.vlgmr.msra.gmra.mrb[64].mxu0 %v5730_v11  ;;  %v7256_v11 = vld [vmem:[%s7892_s27 + $0x340] sm:$0xff]  }
 0x12a   : > { %3368 = vmatmul.mubr.bf16.vlgmr.msra.gmra.mrb[64].mxu1 %v5732_v14  ;;  %6568 = vmatpush3.bf16.msra.mxu0 %v7225_v15  ;;  %v5796_v14 = vcombine.low %v359_v55, %v367_v57  ;;  %v5811_v15 = vcombine.high %v374_v5, %v382_v6  ;;  %v470_v57 = vld [vmem:[%s7885_s8 + $0x590] sm:$0xff]  ;;  %v495_v5 = vld [vmem:[%s7885_s8 + $0x658] sm:$0xff] }
 0x12b   : > { %6680 = vmatpush3.bf16.msra.mxu1 %v7227_v16  ;;  %3214 = vmatprep.mubr.bf16.mxu0 %v5747_v17  ;;  %v5813_v16 = vcombine.high %v375_v7, %v383_v9  ;;  %v390_v17 = vld [vmem:[%s7885_s8 + $0x310] sm:$0xff] }
 0x12c   : > { %3375 = vmatprep.mubr.bf16.mxu1 %v5749_v18  ;;  %6569 = vmatprep.subr.bf16.mxu0 %v7228_v19  ;;  %v398_v18 = vld [vmem:[%s7885_s8 + $0x350] sm:$0xff]  ;;  %v391_v19 = vld [vmem:[%s7885_s8 + $0x318] sm:$0xff] }
 0x12d   : > { %6681 = vmatprep.subr.bf16.mxu1 %v7230_v20  ;;  %v399_v20 = vld [vmem:[%s7885_s8 + $0x358] sm:$0xff]  ;;  %v5827_v23 = vcombine.high %v390_v17, %v398_v18 }
 0x12e   : > { %6570 = vmatpush3.bf16.msra.mxu0 %v7229_v22  ;;  %v5812_v22 = vcombine.low %v375_v7, %v383_v9 }
 0x12f   : > { %6682 = vmatpush3.bf16.msra.mxu1 %v7231_v24  ;;  %6571 = vmatprep.subr.bf16.mxu0 %v7232_v25  ;;  %v5829_v24 = vcombine.high %v391_v19, %v399_v20  ;;  %v406_v25 = vld [vmem:[%s7885_s8 + $0x390] sm:$0xff] }
 0x130   : > { %6683 = vmatprep.subr.bf16.mxu1 %v7234_v28  ;;  %v415_v28 = vld [vmem:[%s7885_s8 + $0x3d8] sm:$0xff]  ;;  %v5842_v37 = vcombine.low %v406_v25, %v414_v26 }
 0x131   : > { %3215 = vmatmul.mubr.bf16.gmra.mrb[68].mxu0 %v5746_v29  ;;  %v5826_v29 = vcombine.low %v390_v17, %v398_v18  ;;  %v5844_v38 = vcombine.low %v407_v27, %v415_v28 }
 0x132   : > { %3376 = vmatmul.mubr.bf16.gmra.mrb[68].mxu1 %v5748_v30  ;;  %3222 = vmatprep.mubr.bf16.mxu0 %v5763_v31  ;;  %v5828_v30 = vcombine.low %v391_v19, %v399_v20  ;;  %v5843_v31 = vcombine.high %v406_v25, %v414_v26  ;;  %v503_v26 = vld [vmem:[%s7885_s8 + $0x698] sm:$0xff] }
 0x133   : > { %3383 = vmatprep.mubr.bf16.mxu1 %v5765_v32  ;;  %6572 = vmatpush3.bf16.msra.mxu0 %v7233_v33  ;;  %v5845_v32 = vcombine.high %v407_v27, %v415_v28  ;;  %v422_v33 = vld [vmem:[%s7885_s8 + $0x410] sm:$0xff]  ;;  %v511_v27 = vld [vmem:[%s7885_s8 + $0x6d8] sm:$0xff] }
 0x134   : > { %6684 = vmatpush3.bf16.msra.mxu1 %v7235_v34  ;;  %6573 = vmatprep.subr.bf16.mxu0 %v7236_v35  ;;  %v430_v34 = vld [vmem:[%s7885_s8 + $0x450] sm:$0xff]  ;;  %v423_v35 = vld [vmem:[%s7885_s8 + $0x418] sm:$0xff] }
 0x135   : > { %6685 = vmatprep.subr.bf16.mxu1 %v7238_v36  ;;  %v431_v36 = vld [vmem:[%s7885_s8 + $0x458] sm:$0xff]  ;;  %v5859_v39 = vcombine.high %v422_v33, %v430_v34 }
 0x137   : > { %6574 = vmatpush3.bf16.msra.mxu0 %v7237_v40  ;;  %v5861_v40 = vcombine.high %v423_v35, %v431_v36 }
 0x138   : > { %6686 = vmatpush3.bf16.msra.mxu1 %v7239_v42  ;;  %6575 = vmatprep.subr.bf16.mxu0 %v7240_v43  ;;  %v446_v42 = vld [vmem:[%s7885_s8 + $0x4d0] sm:$0xff]  ;;  %v439_v43 = vld [vmem:[%s7885_s8 + $0x498] sm:$0xff] }
 0x139   : > { %3223 = vmatmul.mubr.bf16.gmra.mrb[72].mxu0 %v5762_v44  ;;  %6687 = vmatprep.subr.bf16.mxu1 %v7242_v45  ;;  %v447_v44 = vld [vmem:[%s7885_s8 + $0x4d8] sm:$0xff]  ;;  %v5858_v45 = vcombine.low %v422_v33, %v430_v34  ;;  %v5874_v53 = vcombine.low %v438_v41, %v446_v42 }
 0x13a   : > { %3384 = vmatmul.mubr.bf16.gmra.mrb[72].mxu1 %v5764_v46  ;;  %3230 = vmatprep.mubr.bf16.mxu0 %v5779_v47  ;;  %v5860_v46 = vcombine.low %v423_v35, %v431_v36  ;;  %v5875_v47 = vcombine.high %v438_v41, %v446_v42  ;;  %v5876_v54 = vcombine.low %v439_v43, %v447_v44 }
 0x13b   : > { %3391 = vmatprep.mubr.bf16.mxu1 %v5781_v48  ;;  %6576 = vmatpush3.bf16.msra.mxu0 %v7241_v49  ;;  %v5877_v48 = vcombine.high %v439_v43, %v447_v44  ;;  %v454_v49 = vld [vmem:[%s7885_s8 + $0x510] sm:$0xff] }
 0x13c   : > { %6688 = vmatpush3.bf16.msra.mxu1 %v7243_v50  ;;  %6577 = vmatprep.subr.bf16.mxu0 %v7244_v51  ;;  %v462_v50 = vld [vmem:[%s7885_s8 + $0x550] sm:$0xff]  ;;  %v455_v51 = vld [vmem:[%s7885_s8 + $0x518] sm:$0xff] }
 0x13d   : > { %6689 = vmatprep.subr.bf16.mxu1 %v7246_v52  ;;  %v463_v52 = vld [vmem:[%s7885_s8 + $0x558] sm:$0xff]  ;;  %v5891_v55 = vcombine.high %v454_v49, %v462_v50 }
 0x13f   : > { %6578 = vmatpush3.bf16.msra.mxu0 %v7245_v56  ;;  %v5893_v56 = vcombine.high %v455_v51, %v463_v52 }
 0x140   : > { %6690 = vmatpush3.bf16.msra.mxu1 %v7247_v58  ;;  %6579 = vmatprep.subr.bf16.mxu0 %v7248_v59  ;;  %v478_v58 = vld [vmem:[%s7885_s8 + $0x5d0] sm:$0xff]  ;;  %v471_v59 = vld [vmem:[%s7885_s8 + $0x598] sm:$0xff] }
 0x141   : > { %3231 = vmatmul.mubr.bf16.gmra.mrb[76].mxu0 %v5778_v60  ;;  %6691 = vmatprep.subr.bf16.mxu1 %v7250_v61  ;;  %v479_v60 = vld [vmem:[%s7885_s8 + $0x5d8] sm:$0xff]  ;;  %v5890_v61 = vcombine.low %v454_v49, %v462_v50 }
 0x142   : > { %3392 = vmatmul.mubr.bf16.gmra.mrb[76].mxu1 %v5780_v62  ;;  %3238 = vmatprep.mubr.bf16.mxu0 %v5795_v63  ;;  %v5892_v62 = vcombine.low %v455_v51, %v463_v52  ;;  %v5907_v63 = vcombine.high %v470_v57, %v478_v58  ;;  %v527_v49 = vld [vmem:[%s7885_s8 + $0x758] sm:$0xff] }
 0x143   : > { %3399 = vmatprep.mubr.bf16.mxu1 %v5797_v0  ;;  %6580 = vmatpush3.bf16.msra.mxu0 %v7249_v1  ;;  %v5909_v0 = vcombine.high %v471_v59, %v479_v60  ;;  %v486_v1 = vld [vmem:[%s7885_s8 + $0x610] sm:$0xff] }
 0x144   : > { %6692 = vmatpush3.bf16.msra.mxu1 %v7251_v2  ;;  %6581 = vmatprep.subr.bf16.mxu0 %v7252_v3  ;;  %v494_v2 = vld [vmem:[%s7885_s8 + $0x650] sm:$0xff] }
 0x145   : > { %6693 = vmatprep.subr.bf16.mxu1 %v7254_v4  ;;  %v487_v4 = vld [vmem:[%s7885_s8 + $0x618] sm:$0xff] }
 0x146   : > { %v5925_v17 = vcombine.high %v487_v4, %v495_v5  ;;  %v5924_v34 = vcombine.low %v487_v4, %v495_v5  ;;  %v542_v4 = vld [vmem:[%s7885_s8 + $0x7d0] sm:$0xff] }
 0x147   : > { %6582 = vmatpush3.bf16.msra.mxu0 %v7253_v8  ;;  %v5906_v8 = vcombine.low %v470_v57, %v478_v58 }
 0x148   : > { %6694 = vmatpush3.bf16.msra.mxu1 %v7255_v10  ;;  %6791 = vmatprep.subr.bf16.mxu0 %v7256_v11 }
 0x149   : > { %3239 = vmatmul.mubr.bf16.gmra.mrb[80].mxu0 %v5794_v12  ;;  %6903 = vmatprep.subr.bf16.mxu1 %v7258_v13  ;;  %v5908_v12 = vcombine.low %v471_v59, %v479_v60  ;;  %v5923_v13 = vcombine.high %v486_v1, %v494_v2 }
 0x14a   : > { %3400 = vmatmul.mubr.bf16.gmra.mrb[80].mxu1 %v5796_v14  ;;  %3246 = vmatprep.mubr.bf16.mxu0 %v5811_v15 }
 0x14b   : > { %3407 = vmatprep.mubr.bf16.mxu1 %v5813_v16 }
 0x151   : > { %3247 = vmatmul.mubr.bf16.gmra.mrb[84].mxu0 %v5810_v21 }
 0x152   : > { %3408 = vmatmul.mubr.bf16.gmra.mrb[84].mxu1 %v5812_v22  ;;  %3254 = vmatprep.mubr.bf16.mxu0 %v5827_v23  ;;  %v502_v23 = vld [vmem:[%s7885_s8 + $0x690] sm:$0xff] }
 0x153   : > { %3415 = vmatprep.mubr.bf16.mxu1 %v5829_v24  ;;  %v510_v24 = vld [vmem:[%s7885_s8 + $0x6d0] sm:$0xff] }
 0x154   : > { %v5939_v35 = vcombine.high %v502_v23, %v510_v24  ;;  %v5938_v52 = vcombine.low %v502_v23, %v510_v24 }
 0x159   : > { %3255 = vmatmul.mubr.bf16.gmra.mrb[88].mxu0 %v5826_v29 }
 0x15a   : > { %3416 = vmatmul.mubr.bf16.gmra.mrb[88].mxu1 %v5828_v30  ;;  %3262 = vmatprep.mubr.bf16.mxu0 %v5843_v31  ;;  %v5922_v30 = vcombine.low %v486_v1, %v494_v2 }
 0x15b   : > { %3423 = vmatprep.mubr.bf16.mxu1 %v5845_v32 }
 0x161   : > { %3263 = vmatmul.mubr.bf16.gmra.mrb[92].mxu0 %v5842_v37 }
 0x162   : > { %3424 = vmatmul.mubr.bf16.gmra.mrb[92].mxu1 %v5844_v38  ;;  %3270 = vmatprep.mubr.bf16.mxu0 %v5859_v39  ;;  %v5941_v39 = vcombine.high %v503_v26, %v511_v27 }
 0x163   : > { %3431 = vmatprep.mubr.bf16.mxu1 %v5861_v40 }
 0x169   : > { %3271 = vmatmul.mubr.bf16.gmra.mrb[96].mxu0 %v5858_v45  ;;  %v518_v45 = vld [vmem:[%s7885_s8 + $0x710] sm:$0xff] }
 0x16a   : > { %3432 = vmatmul.mubr.bf16.gmra.mrb[96].mxu1 %v5860_v46  ;;  %3278 = vmatprep.mubr.bf16.mxu0 %v5875_v47  ;;  %v526_v46 = vld [vmem:[%s7885_s8 + $0x750] sm:$0xff] }
 0x16b   : > { %3439 = vmatprep.mubr.bf16.mxu1 %v5877_v48  ;;  %v519_v48 = vld [vmem:[%s7885_s8 + $0x718] sm:$0xff]  ;;  %v5955_v57 = vcombine.high %v518_v45, %v526_v46 }
 0x171   : > { %3279 = vmatmul.mubr.bf16.gmra.mrb[100].mxu0 %v5874_v53 }
 0x172   : > { %3440 = vmatmul.mubr.bf16.gmra.mrb[100].mxu1 %v5876_v54  ;;  %3286 = vmatprep.mubr.bf16.mxu0 %v5891_v55 }
 0x173   : > { %3447 = vmatprep.mubr.bf16.mxu1 %v5893_v56  ;;  %v5940_v56 = vcombine.low %v503_v26, %v511_v27  ;;  %v296_v27 = vld [vmem:[%s7885_s8 + $0x20] sm:$0xff] }
 0x179   : > { %3287 = vmatmul.mubr.bf16.gmra.mrb[104].mxu0 %v5890_v61  ;;  %v5957_v61 = vcombine.high %v519_v48, %v527_v49 }
 0x17a   : > { %3448 = vmatmul.mubr.bf16.gmra.mrb[104].mxu1 %v5892_v62  ;;  %3294 = vmatprep.mubr.bf16.mxu0 %v5907_v63 }
 0x17b   : > { %3455 = vmatprep.mubr.bf16.mxu1 %v5909_v0 }
 0x17c   : > { %v6135_v3 = vpop.f32.mrb[0].mxu0 }
 0x17d   : > { %v6247_v6 = vpop.f32.mrb[0].mxu1  ;;  %v6136_v7 = vpop.f32.mrb[1].mxu0 }
 0x17e   : > { %v6137_v9 = vadd.f32 %v6136_v7, %v6135_v3  ;;  %v6248_v10 = vpop.f32.mrb[1].mxu1  ;;  %v6138_v11 = vpop.f32.mrb[2].mxu0  ;;  %v534_v3 = vld [vmem:[%s7885_s8 + $0x790] sm:$0xff]  ;;  %v543_v7 = vld [vmem:[%s7885_s8 + $0x7d8] sm:$0xff] }
 0x17f   : > { %v6249_v14 = vadd.f32 %v6248_v10, %v6247_v6  ;;  %v6250_v15 = vpop.f32.mrb[2].mxu1  ;;  %v6139_v16 = vpop.f32.mrb[3].mxu0  ;;  %v535_v6 = vld [vmem:[%s7885_s8 + $0x798] sm:$0xff]  ;;  %v5954_v10 = vcombine.low %v518_v45, %v526_v46 }
 0x180   : > { %v6140_v18 = vadd.f32 %v6139_v16, %v6138_v11  ;;  %v6251_v19 = vpop.f32.mrb[3].mxu1 }
 0x181   : > { %v8118_v20 = vadd.f32 %v6249_v14, %v6137_v9  ;;  %v6252_v21 = vadd.f32 %v6251_v19, %v6250_v15  ;;  %3295 = vmatmul.mubr.bf16.gmra.mrb[108].mxu0 %v5906_v8  ;;  %v5956_v14 = vcombine.low %v519_v48, %v527_v49  ;;  %v5971_v15 = vcombine.high %v534_v3, %v542_v4 }
 0x182   : > { %3456 = vmatmul.mubr.bf16.gmra.mrb[108].mxu1 %v5908_v12  ;;  %3302 = vmatprep.mubr.bf16.mxu0 %v5923_v13  ;;  %v5973_v19 = vcombine.high %v535_v6, %v543_v7 }
 0x183   : > { %v8120_v22 = vadd.f32 %v6252_v21, %v6140_v18  ;;  %3463 = vmatprep.mubr.bf16.mxu1 %v5925_v17 }
 0x184   : > { %v6141_v25 = vpop.f32.mrb[4].mxu0 }
 0x185   : > { %v6253_v28 = vpop.f32.mrb[4].mxu1  ;;  %v6142_v29 = vpop.f32.mrb[5].mxu0 }
 0x186   : > { %v6143_v31 = vadd.f32 %v6142_v29, %v6141_v25  ;;  %v6254_v32 = vpop.f32.mrb[5].mxu1  ;;  %v6144_v33 = vpop.f32.mrb[6].mxu0 }
 0x187   : > { %v6255_v36 = vadd.f32 %v6254_v32, %v6253_v28  ;;  %v6256_v37 = vpop.f32.mrb[6].mxu1  ;;  %v6145_v38 = vpop.f32.mrb[7].mxu0  ;;  %v304_v28 = vld [vmem:[%s7885_s8 + $0x60] sm:$0xff] }
 0x188   : > { %v6146_v40 = vadd.f32 %v6145_v38, %v6144_v33  ;;  %v6257_v41 = vpop.f32.mrb[7].mxu1  ;;  %v5972_v38 = vcombine.low %v535_v6, %v543_v7 }
 0x189   : > { %v8126_v42 = vadd.f32 %v6255_v36, %v6143_v31  ;;  %v6258_v43 = vadd.f32 %v6257_v41, %v6256_v37  ;;  %3303 = vmatmul.mubr.bf16.gmra.mrb[112].mxu0 %v5922_v30  ;;  %v297_v30 = vld [vmem:[%s7885_s8 + $0x28] sm:$0xff] }
 0x18a   : > { %3464 = vmatmul.mubr.bf16.gmra.mrb[112].mxu1 %v5924_v34  ;;  %3310 = vmatprep.mubr.bf16.mxu0 %v5939_v35  ;;  %v305_v31 = vld [vmem:[%s7885_s8 + $0x68] sm:$0xff]  ;;  %v5970_v34 = vcombine.low %v534_v3, %v542_v4 }
 0x18b   : > { %v8128_v44 = vadd.f32 %v6258_v43, %v6146_v40  ;;  %3471 = vmatprep.mubr.bf16.mxu1 %v5941_v39  ;;  %v5735_v39 = vcombine.high %v296_v27, %v304_v28  ;;  %v5737_v45 = vcombine.high %v297_v30, %v305_v31 }
 0x18c   : > { %v6147_v47 = vpop.f32.mrb[8].mxu0 }
 0x18d   : > { %v6259_v50 = vpop.f32.mrb[8].mxu1  ;;  %v6148_v51 = vpop.f32.mrb[9].mxu0 }
 0x18e   : > { %v6149_v53 = vadd.f32 %v6148_v51, %v6147_v47  ;;  %v6260_v54 = vpop.f32.mrb[9].mxu1  ;;  %v6150_v55 = vpop.f32.mrb[10].mxu0 }
 0x18f   : > { %v6261_v58 = vadd.f32 %v6260_v54, %v6259_v50  ;;  %v6262_v59 = vpop.f32.mrb[10].mxu1  ;;  %v6151_v60 = vpop.f32.mrb[11].mxu0 }
 0x190   : > { %v6152_v62 = vadd.f32 %v6151_v60, %v6150_v55  ;;  %v6263_v63 = vpop.f32.mrb[11].mxu1 }
 0x191   : > { %v8134_v0 = vadd.f32 %v6261_v58, %v6149_v53  ;;  %v6264_v1 = vadd.f32 %v6263_v63, %v6262_v59  ;;  %3311 = vmatmul.mubr.bf16.gmra.mrb[116].mxu0 %v5938_v52  ;;  %v8155_v52 = vld [vmem:[%s7885_s8 + $0xa0] sm:$0xff]  ;;  %v321_v58 = vld [vmem:[%s7885_s8 + $0xe8] sm:$0xff] }
 0x192   : > { %3472 = vmatmul.mubr.bf16.gmra.mrb[116].mxu1 %v5940_v56  ;;  %3318 = vmatprep.mubr.bf16.mxu0 %v5955_v57  ;;  %v8158_v53 = vld [vmem:[%s7885_s8 + $0xe0] sm:$0xff]  ;;  %v5734_v56 = vcombine.low %v296_v27, %v304_v28  ;;  %v313_v57 = vld [vmem:[%s7885_s8 + $0xa8] sm:$0xff]  ;;  %v7266_v27 = vld [vmem:[%s7892_s27 + $0x3d0] sm:$0xff]  }
 0x193   : > { %v8136_v2 = vadd.f32 %v6264_v1, %v6152_v62  ;;  %3479 = vmatprep.mubr.bf16.mxu1 %v5957_v61  ;;  %v5736_v62 = vcombine.low %v297_v30, %v305_v31  ;;  %v7257_v63 = vld [vmem:[%s7892_s27 + $0x300] sm:$0xff]   ;;  %v5751_v6 = vcombine.high %v8155_v52, %v8158_v53  ;;  %v5750_v30 = vcombine.low %v8155_v52, %v8158_v53 }
 0x194   : > { %v6153_v5 = vpop.f32.mrb[12].mxu0  ;;  %v8201_v52 = vld [vmem:[%s7885_s8 + $0x1a0] sm:$0xff] }
 0x195   : > { %v6265_v8 = vpop.f32.mrb[12].mxu1  ;;  %v6154_v9 = vpop.f32.mrb[13].mxu0 }
 0x196   : > { %v6155_v11 = vadd.f32 %v6154_v9, %v6153_v5  ;;  %v6266_v12 = vpop.f32.mrb[13].mxu1  ;;  %v6156_v13 = vpop.f32.mrb[14].mxu0  ;;  %v7259_v5 = vld [vmem:[%s7892_s27 + $0x380] sm:$0xff]   ;;  %v5753_v9 = vcombine.high %v313_v57, %v321_v58 }
 0x197   : > { %v6267_v16 = vadd.f32 %v6266_v12, %v6265_v8  ;;  %v6268_v17 = vpop.f32.mrb[14].mxu1  ;;  %v6157_v18 = vpop.f32.mrb[15].mxu0 }
 0x198   : > { %v6158_v21 = vadd.f32 %v6157_v18, %v6156_v13  ;;  %v6269_v23 = vpop.f32.mrb[15].mxu1  ;;  %v7262_v13 = vld [vmem:[%s7892_s27 + $0x3c8] sm:$0xff]  }
 0x199   : > { %v8142_v24 = vadd.f32 %v6267_v16, %v6155_v11  ;;  %v6270_v25 = vadd.f32 %v6269_v23, %v6268_v17  ;;  %3319 = vmatmul.mubr.bf16.gmra.mrb[120].mxu0 %v5954_v10  ;;  %v7260_v10 = vld [vmem:[%s7892_s27 + $0x348] sm:$0xff]   ;;  %v8177_v17 = vld [vmem:[%s7885_s8 + $0x160] sm:$0xff] }
 0x19a   : > { %3480 = vmatmul.mubr.bf16.gmra.mrb[120].mxu1 %v5956_v14  ;;  %3326 = vmatprep.mubr.bf16.mxu0 %v5971_v15  ;;  %v8171_v14 = vld [vmem:[%s7885_s8 + $0x120] sm:$0xff]  ;;  %v7261_v15 = vld [vmem:[%s7892_s27 + $0x308] sm:$0xff]  }
 0x19b   : > { %v8144_v26 = vadd.f32 %v6270_v25, %v6158_v21  ;;  %3487 = vmatprep.mubr.bf16.mxu1 %v5973_v19  ;;  %v7263_v18 = vld [vmem:[%s7892_s27 + $0x388] sm:$0xff]   ;;  %v7264_v19 = vld [vmem:[%s7892_s27 + $0x350] sm:$0xff]  }
 0x19c   : > { %v6159_v29 = vpop.f32.mrb[16].mxu0  ;;  %v8182_v23 = vld [vmem:[%s7885_s8 + $0x128] sm:$0xff] }
 0x19d   : > { %v6271_v32 = vpop.f32.mrb[16].mxu1  ;;  %v6160_v33 = vpop.f32.mrb[17].mxu0  ;;  %v8185_v25 = vld [vmem:[%s7885_s8 + $0x168] sm:$0xff] }
 0x19e   : > { %v6161_v35 = vadd.f32 %v6160_v33, %v6159_v29  ;;  %v6272_v36 = vpop.f32.mrb[17].mxu1  ;;  %v6162_v37 = vpop.f32.mrb[18].mxu0 }
 0x19f   : > { %v6273_v40 = vadd.f32 %v6272_v36, %v6271_v32  ;;  %v6274_v41 = vpop.f32.mrb[18].mxu1  ;;  %v6163_v43 = vpop.f32.mrb[19].mxu0 }
 0x1a0   : > { %v6164_v46 = vadd.f32 %v6163_v43, %v6162_v37  ;;  %v6275_v47 = vpop.f32.mrb[19].mxu1 }
 0x1a1   : > { %v8150_v48 = vadd.f32 %v6273_v40, %v6161_v35  ;;  %v6276_v49 = vadd.f32 %v6275_v47, %v6274_v41  ;;  %3327 = vmatmul.mubr.bf16.gmra.mrb[124].mxu0 %v5970_v34  ;;  %v5752_v34 = vcombine.low %v313_v57, %v321_v58  ;;  %v5767_v35 = vcombine.high %v8171_v14, %v8177_v17  ;;  %v7265_v40 = vld [vmem:[%s7892_s27 + $0x310] sm:$0xff]   ;;  %v8213_v58 = vld [vmem:[%s7885_s8 + $0x1e8] sm:$0xff] }
 0x1a2   : > { %3488 = vmatmul.mubr.bf16.gmra.mrb[124].mxu1 %v5972_v38  ;;  %3528 = vmatprep.mubr.bf16.mxu0 %v5735_v39  ;;  %v5769_v39 = vcombine.high %v8182_v23, %v8185_v25 }
 0x1a3   : > { %v8152_v50 = vadd.f32 %v6276_v49, %v6164_v46  ;;  %3689 = vmatprep.mubr.bf16.mxu1 %v5737_v45  ;;  %v7267_v45 = vld [vmem:[%s7892_s27 + $0x390] sm:$0xff]   ;;  %v7268_v46 = vld [vmem:[%s7892_s27 + $0x358] sm:$0xff]  }
 0x1a4   : > { %v6165_v51 = vpop.f32.mrb[20].mxu0 }
 0x1a5   : > { %v6277_v54 = vpop.f32.mrb[20].mxu1  ;;  %v6166_v55 = vpop.f32.mrb[21].mxu0 }
 0x1a6   : > { %v6167_v59 = vadd.f32 %v6166_v55, %v6165_v51  ;;  %v6278_v60 = vpop.f32.mrb[21].mxu1  ;;  %v6168_v61 = vpop.f32.mrb[22].mxu0  ;;  %v7270_v51 = vld [vmem:[%s7892_s27 + $0x3d8] sm:$0xff]   ;;  %v8209_v55 = vld [vmem:[%s7885_s8 + $0x1a8] sm:$0xff] }
 0x1a7   : > { %v6279_v1 = vadd.f32 %v6278_v60, %v6277_v54  ;;  %v6280_v3 = vpop.f32.mrb[22].mxu1  ;;  %v6169_v4 = vpop.f32.mrb[23].mxu0  ;;  %v8206_v54 = vld [vmem:[%s7885_s8 + $0x1e0] sm:$0xff] }
 0x1a8   : > { %v6170_v7 = vadd.f32 %v6169_v4, %v6168_v61  ;;  %v6281_v8 = vpop.f32.mrb[23].mxu1  ;;  %v7272_v60 = vld [vmem:[%s7892_s27 + $0x360] sm:$0xff]  }
 0x1a9   : > { %v8167_v11 = vadd.f32 %v6279_v1, %v6167_v59  ;;  %v6282_v12 = vadd.f32 %v6281_v8, %v6280_v3  ;;  %3529 = vmatmul.mubr.bf16.vlgmr.msra.gmra.mrb[128].mxu0 %v5734_v56  ;;  %v7269_v56 = vld [vmem:[%s7892_s27 + $0x318] sm:$0xff]   ;;  %v7274_v1 = vld [vmem:[%s7892_s27 + $0x3e0] sm:$0xff]  }
 0x1aa   : > { %3690 = vmatmul.mubr.bf16.vlgmr.msra.gmra.mrb[128].mxu1 %v5736_v62  ;;  %6792 = vmatpush3.bf16.msra.mxu0 %v7257_v63  ;;  %v7271_v59 = vld [vmem:[%s7892_s27 + $0x398] sm:$0xff]   ;;  %v5766_v63 = vcombine.low %v8171_v14, %v8177_v17  ;;  %v7275_v17 = vld [vmem:[%s7892_s27 + $0x3a0] sm:$0xff]  }
 0x1ab   : > { %v8174_v16 = vadd.f32 %v6282_v12, %v6170_v7  ;;  %6904 = vmatpush3.bf16.msra.mxu1 %v7259_v5  ;;  %3536 = vmatprep.mubr.bf16.mxu0 %v5751_v6  ;;  %v5768_v6 = vcombine.low %v8182_v23, %v8185_v25  ;;  %v5783_v7 = vcombine.high %v8201_v52, %v8206_v54  ;;  %v7278_v23 = vld [vmem:[%s7892_s27 + $0x3e8] sm:$0xff]   ;;  %v8233_v25 = vld [vmem:[%s7885_s8 + $0x220] sm:$0xff] }
 0x1ac   : > { %v6171_v21 = vpop.f32.mrb[24].mxu0  ;;  %3697 = vmatprep.mubr.bf16.mxu1 %v5753_v9  ;;  %6793 = vmatprep.subr.bf16.mxu0 %v7260_v10  ;;  %v5785_v12 = vcombine.high %v8209_v55, %v8213_v58 }
 0x1ad   : > { %v6283_v28 = vpop.f32.mrb[24].mxu1  ;;  %v6172_v29 = vpop.f32.mrb[25].mxu0  ;;  %6905 = vmatprep.subr.bf16.mxu1 %v7262_v13  ;;  %v7273_v13 = vld [vmem:[%s7892_s27 + $0x320] sm:$0xff]  }
 0x1ae   : > { %v6173_v31 = vadd.f32 %v6172_v29, %v6171_v21  ;;  %v6284_v32 = vpop.f32.mrb[25].mxu1  ;;  %v6174_v33 = vpop.f32.mrb[26].mxu0  ;;  %6794 = vmatpush3.bf16.msra.mxu0 %v7261_v15  ;;  %v8241_v29 = vld [vmem:[%s7885_s8 + $0x228] sm:$0xff] }
 0x1af   : > { %v6285_v36 = vadd.f32 %v6284_v32, %v6283_v28  ;;  %v6286_v37 = vpop.f32.mrb[26].mxu1  ;;  %v6175_v38 = vpop.f32.mrb[27].mxu0  ;;  %6906 = vmatpush3.bf16.msra.mxu1 %v7263_v18  ;;  %6795 = vmatprep.subr.bf16.mxu0 %v7264_v19  ;;  %v7276_v18 = vld [vmem:[%s7892_s27 + $0x368] sm:$0xff]   ;;  %v8238_v28 = vld [vmem:[%s7885_s8 + $0x260] sm:$0xff] }
 0x1b0   : > { %v6176_v41 = vadd.f32 %v6175_v38, %v6174_v33  ;;  %v6287_v43 = vpop.f32.mrb[27].mxu1  ;;  %6907 = vmatprep.subr.bf16.mxu1 %v7266_v27  ;;  %v8245_v32 = vld [vmem:[%s7885_s8 + $0x268] sm:$0xff]  ;;  %v7282_v38 = vld [vmem:[%s7892_s27 + $0x3f0] sm:$0xff]  }
 0x1b1   : > { %v8197_v47 = vadd.f32 %v6285_v36, %v6173_v31  ;;  %v6288_v49 = vadd.f32 %v6287_v43, %v6286_v37  ;;  %3537 = vmatmul.mubr.bf16.gmra.mrb[132].mxu0 %v5750_v30  ;;  %v7277_v30 = vld [vmem:[%s7892_s27 + $0x328] sm:$0xff]   ;;  %v5782_v37 = vcombine.low %v8201_v52, %v8206_v54  ;;  %v5784_v43 = vcombine.low %v8209_v55, %v8213_v58  ;;  %v7281_v54 = vld [vmem:[%s7892_s27 + $0x330] sm:$0xff]   ;;  %v7284_v58 = vld [vmem:[%s7892_s27 + $0x378] sm:$0xff]  }
 0x1b2   : > { %3698 = vmatmul.mubr.bf16.gmra.mrb[132].mxu1 %v5752_v34  ;;  %3544 = vmatprep.mubr.bf16.mxu0 %v5767_v35  ;;  %v7279_v33 = vld [vmem:[%s7892_s27 + $0x3a8] sm:$0xff]   ;;  %v7280_v34 = vld [vmem:[%s7892_s27 + $0x370] sm:$0xff]   ;;  %v5801_v52 = vcombine.high %v8241_v29, %v8245_v32 }
 0x1b3   : > { %v8203_v53 = vadd.f32 %v6288_v49, %v6176_v41  ;;  %3705 = vmatprep.mubr.bf16.mxu1 %v5769_v39  ;;  %6796 = vmatpush3.bf16.msra.mxu0 %v7265_v40  ;;  %v7283_v55 = vld [vmem:[%s7892_s27 + $0x3b0] sm:$0xff]  }
 0x1b4   : > { %v6177_v57 = vpop.f32.mrb[28].mxu0  ;;  %6908 = vmatpush3.bf16.msra.mxu1 %v7267_v45  ;;  %6797 = vmatprep.subr.bf16.mxu0 %v7268_v46  ;;  %v5799_v45 = vcombine.high %v8233_v25, %v8238_v28 }
 0x1b5   : > { %v6289_v61 = vpop.f32.mrb[28].mxu1  ;;  %v6178_v62 = vpop.f32.mrb[29].mxu0  ;;  %6909 = vmatprep.subr.bf16.mxu1 %v7270_v51 }
 0x1b6   : > { %v6179_v3 = vadd.f32 %v6178_v62, %v6177_v57  ;;  %v6290_v4 = vpop.f32.mrb[29].mxu1  ;;  %v6180_v5 = vpop.f32.mrb[30].mxu0 }
 0x1b7   : > { %v6291_v8 = vadd.f32 %v6290_v4, %v6289_v61  ;;  %v6292_v9 = vpop.f32.mrb[30].mxu1  ;;  %v6181_v10 = vpop.f32.mrb[31].mxu0  ;;  %6798 = vmatpush3.bf16.msra.mxu0 %v7269_v56  ;;  %v7286_v61 = vld [vmem:[%s7892_s27 + $0x3f8] sm:$0xff]  }
 0x1b8   : > { %v6182_v14 = vadd.f32 %v6181_v10, %v6180_v5  ;;  %v6293_v15 = vpop.f32.mrb[31].mxu1  ;;  %6910 = vmatpush3.bf16.msra.mxu1 %v7271_v59  ;;  %6799 = vmatprep.subr.bf16.mxu0 %v7272_v60  ;;  %v377_v5 = vld [vmem:[%s7885_s8 + $0x2a8] sm:$0xff]  ;;  %v5798_v10 = vcombine.low %v8233_v25, %v8238_v28 }
 0x1b9   : > { %v8229_v19 = vadd.f32 %v6291_v8, %v6179_v3  ;;  %v6294_v21 = vadd.f32 %v6293_v15, %v6292_v9  ;;  %3545 = vmatmul.mubr.bf16.gmra.mrb[136].mxu0 %v5766_v63  ;;  %6911 = vmatprep.subr.bf16.mxu1 %v7274_v1  ;;  %v376_v63 = vld [vmem:[%s7885_s8 + $0x2a0] sm:$0xff]  ;;  %v7285_v3 = vld [vmem:[%s7892_s27 + $0x338] sm:$0xff]   ;;  %v5800_v15 = vcombine.low %v8241_v29, %v8245_v32 }
 0x1ba   : > { %3706 = vmatmul.mubr.bf16.gmra.mrb[136].mxu1 %v5768_v6  ;;  %3552 = vmatprep.mubr.bf16.mxu0 %v5783_v7  ;;  %v384_v1 = vld [vmem:[%s7885_s8 + $0x2e0] sm:$0xff]  ;;  %v385_v6 = vld [vmem:[%s7885_s8 + $0x2e8] sm:$0xff]  ;;  %v7287_v7 = vld [vmem:[%s7892_s27 + $0x3b8] sm:$0xff]  }
 0x1bb   : > { %v8235_v27 = vadd.f32 %v6294_v21, %v6182_v14  ;;  %3713 = vmatprep.mubr.bf16.mxu1 %v5785_v12  ;;  %6800 = vmatpush3.bf16.msra.mxu0 %v7273_v13  ;;  %v392_v32 = vld [vmem:[%s7885_s8 + $0x320] sm:$0xff] }
 0x1bc   : > { %v6183_v31 = vpop.f32.mrb[32].mxu0  ;;  %6912 = vmatpush3.bf16.msra.mxu1 %v7275_v17  ;;  %6801 = vmatprep.subr.bf16.mxu0 %v7276_v18  ;;  %v5815_v17 = vcombine.high %v376_v63, %v384_v1 }
 0x1bd   : > { %v6295_v35 = vpop.f32.mrb[32].mxu1  ;;  %v6184_v36 = vpop.f32.mrb[33].mxu0  ;;  %6913 = vmatprep.subr.bf16.mxu1 %v7278_v23 }
 0x1be   : > { %v6185_v39 = vadd.f32 %v6184_v36, %v6183_v31  ;;  %v6296_v40 = vpop.f32.mrb[33].mxu1  ;;  %v6186_v41 = vpop.f32.mrb[34].mxu0  ;;  %v393_v36 = vld [vmem:[%s7885_s8 + $0x328] sm:$0xff] }
 0x1bf   : > { %v6297_v46 = vadd.f32 %v6296_v40, %v6295_v35  ;;  %v6298_v49 = vpop.f32.mrb[34].mxu1  ;;  %v6187_v51 = vpop.f32.mrb[35].mxu0  ;;  %6802 = vmatpush3.bf16.msra.mxu0 %v7277_v30  ;;  %v5817_v30 = vcombine.high %v377_v5, %v385_v6  ;;  %v5814_v40 = vcombine.low %v376_v63, %v384_v1  ;;  %v408_v63 = vld [vmem:[%s7885_s8 + $0x3a0] sm:$0xff] }
 0x1c0   : > { %v6188_v56 = vadd.f32 %v6187_v51, %v6186_v41  ;;  %v6299_v57 = vpop.f32.mrb[35].mxu1  ;;  %6914 = vmatpush3.bf16.msra.mxu1 %v7279_v33  ;;  %6803 = vmatprep.subr.bf16.mxu0 %v7280_v34  ;;  %v400_v34 = vld [vmem:[%s7885_s8 + $0x360] sm:$0xff] }
 0x1c1   : > { %v8261_v59 = vadd.f32 %v6297_v46, %v6185_v39  ;;  %v6300_v60 = vadd.f32 %v6299_v57, %v6298_v49  ;;  %3553 = vmatmul.mubr.bf16.gmra.mrb[140].mxu0 %v5782_v37  ;;  %6915 = vmatprep.subr.bf16.mxu1 %v7282_v38  ;;  %v401_v37 = vld [vmem:[%s7885_s8 + $0x368] sm:$0xff]  ;;  %v5816_v46 = vcombine.low %v377_v5, %v385_v6  ;;  %v416_v1 = vld [vmem:[%s7885_s8 + $0x3e0] sm:$0xff] }
 0x1c2   : > { %3714 = vmatmul.mubr.bf16.gmra.mrb[140].mxu1 %v5784_v43  ;;  %3560 = vmatprep.mubr.bf16.mxu0 %v5799_v45  ;;  %v5831_v49 = vcombine.high %v392_v32, %v400_v34  ;;  %v417_v5 = vld [vmem:[%s7885_s8 + $0x3e8] sm:$0xff] }
 0x1c3   : > { %v8264_v62 = vadd.f32 %v6300_v60, %v6188_v56  ;;  %3721 = vmatprep.mubr.bf16.mxu1 %v5801_v52  ;;  %6804 = vmatpush3.bf16.msra.mxu0 %v7281_v54  ;;  %v5833_v56 = vcombine.high %v393_v36, %v401_v37 }
 0x1c4   : > { %v6189_v4 = vpop.f32.mrb[36].mxu0  ;;  %6916 = vmatpush3.bf16.msra.mxu1 %v7283_v55  ;;  %6805 = vmatprep.subr.bf16.mxu0 %v7284_v58 }
 0x1c5   : > { %v6301_v8 = vpop.f32.mrb[36].mxu1  ;;  %v6190_v9 = vpop.f32.mrb[37].mxu0  ;;  %6917 = vmatprep.subr.bf16.mxu1 %v7286_v61 }
 0x1c6   : > { %v6191_v12 = vadd.f32 %v6190_v9, %v6189_v4  ;;  %v6302_v13 = vpop.f32.mrb[37].mxu1  ;;  %v6192_v14 = vpop.f32.mrb[38].mxu0  ;;  %v409_v4 = vld [vmem:[%s7885_s8 + $0x3a8] sm:$0xff] }
 0x1c7   : > { %v6303_v18 = vadd.f32 %v6302_v13, %v6301_v8  ;;  %v6304_v21 = vpop.f32.mrb[38].mxu1  ;;  %v6193_v23 = vpop.f32.mrb[39].mxu0  ;;  %6806 = vmatpush3.bf16.msra.mxu0 %v7285_v3  ;;  %v5830_v8 = vcombine.low %v392_v32, %v400_v34  ;;  %v5832_v13 = vcombine.low %v393_v36, %v401_v37  ;;  %v424_v32 = vld [vmem:[%s7885_s8 + $0x420] sm:$0xff]  ;;  %v425_v36 = vld [vmem:[%s7885_s8 + $0x428] sm:$0xff] }
 0x1c8   : > { %v6194_v31 = vadd.f32 %v6193_v23, %v6192_v14  ;;  %v6305_v33 = vpop.f32.mrb[39].mxu1  ;;  %6918 = vmatpush3.bf16.msra.mxu1 %v7287_v7  ;;  %v5847_v14 = vcombine.high %v408_v63, %v416_v1  ;;  %v432_v34 = vld [vmem:[%s7885_s8 + $0x460] sm:$0xff]  ;;  %v433_v37 = vld [vmem:[%s7885_s8 + $0x468] sm:$0xff] }
 0x1c9   : > { %v8276_v25 = vadd.f32 %v6303_v18, %v6191_v12  ;;  %v6306_v28 = vadd.f32 %v6305_v33, %v6304_v21  ;;  %3561 = vmatmul.mubr.bf16.gmra.mrb[144].mxu0 %v5798_v10  ;;  %v5849_v21 = vcombine.high %v409_v4, %v417_v5 }
 0x1ca   : > { %3722 = vmatmul.mubr.bf16.gmra.mrb[144].mxu1 %v5800_v15  ;;  %3568 = vmatprep.mubr.bf16.mxu0 %v5815_v17 }
 0x1cb   : > { %v8278_v29 = vadd.f32 %v6306_v28, %v6194_v31  ;;  %3729 = vmatprep.mubr.bf16.mxu1 %v5817_v30 }
 0x1cc   : > { %v6195_v35 = vpop.f32.mrb[40].mxu0 }
 0x1cd   : > { %v6307_v38 = vpop.f32.mrb[40].mxu1  ;;  %v6196_v39 = vpop.f32.mrb[41].mxu0 }
 0x1ce   : > { %v6197_v41 = vadd.f32 %v6196_v39, %v6195_v35  ;;  %v6308_v43 = vpop.f32.mrb[41].mxu1  ;;  %v6198_v45 = vpop.f32.mrb[42].mxu0 }
 0x1cf   : > { %v6309_v51 = vadd.f32 %v6308_v43, %v6307_v38  ;;  %v6310_v52 = vpop.f32.mrb[42].mxu1  ;;  %v6199_v54 = vpop.f32.mrb[43].mxu0 }
 0x1d0   : > { %v6200_v57 = vadd.f32 %v6199_v54, %v6198_v45  ;;  %v6311_v55 = vpop.f32.mrb[43].mxu1 }
 0x1d1   : > { %v8284_v58 = vadd.f32 %v6309_v51, %v6197_v41  ;;  %v6312_v60 = vadd.f32 %v6311_v55, %v6310_v52  ;;  %3569 = vmatmul.mubr.bf16.gmra.mrb[148].mxu0 %v5814_v40  ;;  %v5846_v40 = vcombine.low %v408_v63, %v416_v1  ;;  %v440_v1 = vld [vmem:[%s7885_s8 + $0x4a0] sm:$0xff] }
 0x1d2   : > { %3730 = vmatmul.mubr.bf16.gmra.mrb[148].mxu1 %v5816_v46  ;;  %3576 = vmatprep.mubr.bf16.mxu0 %v5831_v49  ;;  %v5848_v46 = vcombine.low %v409_v4, %v417_v5  ;;  %v5863_v49 = vcombine.high %v424_v32, %v432_v34  ;;  %v448_v4 = vld [vmem:[%s7885_s8 + $0x4e0] sm:$0xff] }
 0x1d3   : > { %v8286_v61 = vadd.f32 %v6312_v60, %v6200_v57  ;;  %3737 = vmatprep.mubr.bf16.mxu1 %v5833_v56  ;;  %v5865_v56 = vcombine.high %v425_v36, %v433_v37 }
 0x1d4   : > { %v6201_v3 = vpop.f32.mrb[44].mxu0 }
 0x1d5   : > { %v6313_v6 = vpop.f32.mrb[44].mxu1  ;;  %v6202_v7 = vpop.f32.mrb[45].mxu0 }
 0x1d6   : > { %v6203_v9 = vadd.f32 %v6202_v7, %v6201_v3  ;;  %v6314_v10 = vpop.f32.mrb[45].mxu1  ;;  %v6204_v12 = vpop.f32.mrb[46].mxu0  ;;  %v449_v7 = vld [vmem:[%s7885_s8 + $0x4e8] sm:$0xff] }
 0x1d7   : > { %v6315_v15 = vadd.f32 %v6314_v10, %v6313_v6  ;;  %v6316_v17 = vpop.f32.mrb[46].mxu1  ;;  %v6205_v18 = vpop.f32.mrb[47].mxu0  ;;  %v441_v6 = vld [vmem:[%s7885_s8 + $0x4a8] sm:$0xff]  ;;  %v5862_v10 = vcombine.low %v424_v32, %v432_v34  ;;  %v456_v34 = vld [vmem:[%s7885_s8 + $0x520] sm:$0xff] }
 0x1d8   : > { %v6206_v23 = vadd.f32 %v6205_v18, %v6204_v12  ;;  %v6317_v30 = vpop.f32.mrb[47].mxu1 }
 0x1d9   : > { %v8292_v31 = vadd.f32 %v6315_v15, %v6203_v9  ;;  %v6318_v33 = vadd.f32 %v6317_v30, %v6316_v17  ;;  %3577 = vmatmul.mubr.bf16.gmra.mrb[152].mxu0 %v5830_v8  ;;  %v5864_v15 = vcombine.low %v425_v36, %v433_v37  ;;  %v5879_v17 = vcombine.high %v440_v1, %v448_v4  ;;  %v464_v36 = vld [vmem:[%s7885_s8 + $0x560] sm:$0xff] }
 0x1da   : > { %3738 = vmatmul.mubr.bf16.gmra.mrb[152].mxu1 %v5832_v13  ;;  %3584 = vmatprep.mubr.bf16.mxu0 %v5847_v14  ;;  %v5881_v30 = vcombine.high %v441_v6, %v449_v7 }
 0x1db   : > { %v8294_v28 = vadd.f32 %v6318_v33, %v6206_v23  ;;  %3745 = vmatprep.mubr.bf16.mxu1 %v5849_v21 }
 0x1dc   : > { %v6207_v35 = vpop.f32.mrb[48].mxu0 }
 0x1dd   : > { %v6319_v38 = vpop.f32.mrb[48].mxu1  ;;  %v6208_v39 = vpop.f32.mrb[49].mxu0 }
 0x1de   : > { %v6209_v41 = vadd.f32 %v6208_v39, %v6207_v35  ;;  %v6320_v43 = vpop.f32.mrb[49].mxu1  ;;  %v6210_v45 = vpop.f32.mrb[50].mxu0 }
 0x1df   : > { %v6321_v51 = vadd.f32 %v6320_v43, %v6319_v38  ;;  %v6322_v52 = vpop.f32.mrb[50].mxu1  ;;  %v6211_v54 = vpop.f32.mrb[51].mxu0 }
 0x1e0   : > { %v6212_v57 = vadd.f32 %v6211_v54, %v6210_v45  ;;  %v6323_v55 = vpop.f32.mrb[51].mxu1  ;;  %v5880_v54 = vcombine.low %v441_v6, %v449_v7  ;;  %v480_v6 = vld [vmem:[%s7885_s8 + $0x5e0] sm:$0xff] }
 0x1e1   : > { %v8300_v60 = vadd.f32 %v6321_v51, %v6209_v41  ;;  %v6324_v3 = vadd.f32 %v6323_v55, %v6322_v52  ;;  %3585 = vmatmul.mubr.bf16.gmra.mrb[156].mxu0 %v5846_v40  ;;  %v457_v40 = vld [vmem:[%s7885_s8 + $0x528] sm:$0xff] }
 0x1e2   : > { %3746 = vmatmul.mubr.bf16.gmra.mrb[156].mxu1 %v5848_v46  ;;  %3592 = vmatprep.mubr.bf16.mxu0 %v5863_v49  ;;  %v465_v41 = vld [vmem:[%s7885_s8 + $0x568] sm:$0xff]  ;;  %v5878_v46 = vcombine.low %v440_v1, %v448_v4  ;;  %v472_v4 = vld [vmem:[%s7885_s8 + $0x5a0] sm:$0xff] }
 0x1e3   : > { %v8302_v63 = vadd.f32 %v6324_v3, %v6212_v57  ;;  %3753 = vmatprep.mubr.bf16.mxu1 %v5865_v56  ;;  %v5895_v56 = vcombine.high %v456_v34, %v464_v36 }
 0x1e4   : > { %v6213_v5 = vpop.f32.mrb[52].mxu0 }
 0x1e5   : > { %v6325_v8 = vpop.f32.mrb[52].mxu1  ;;  %v6214_v9 = vpop.f32.mrb[53].mxu0 }
 0x1e6   : > { %v6215_v12 = vadd.f32 %v6214_v9, %v6213_v5  ;;  %v6326_v13 = vpop.f32.mrb[53].mxu1  ;;  %v6216_v14 = vpop.f32.mrb[54].mxu0  ;;  %v5897_v5 = vcombine.high %v457_v40, %v465_v41 }
 0x1e7   : > { %v6327_v18 = vadd.f32 %v6326_v13, %v6325_v8  ;;  %v6328_v21 = vpop.f32.mrb[54].mxu1  ;;  %v6217_v23 = vpop.f32.mrb[55].mxu0  ;;  %v473_v13 = vld [vmem:[%s7885_s8 + $0x5a8] sm:$0xff] }
 0x1e8   : > { %v6218_v33 = vadd.f32 %v6217_v23, %v6216_v14  ;;  %v6329_v35 = vpop.f32.mrb[55].mxu1  ;;  %v481_v14 = vld [vmem:[%s7885_s8 + $0x5e8] sm:$0xff] }
 0x1e9   : > { %v8308_v38 = vadd.f32 %v6327_v18, %v6215_v12  ;;  %v6330_v39 = vadd.f32 %v6329_v35, %v6328_v21  ;;  %3593 = vmatmul.mubr.bf16.gmra.mrb[160].mxu0 %v5862_v10  ;;  %v5894_v18 = vcombine.low %v456_v34, %v464_v36  ;;  %v5911_v35 = vcombine.high %v472_v4, %v480_v6  ;;  %v488_v36 = vld [vmem:[%s7885_s8 + $0x620] sm:$0xff] }
 0x1ea   : > { %3754 = vmatmul.mubr.bf16.gmra.mrb[160].mxu1 %v5864_v15  ;;  %3600 = vmatprep.mubr.bf16.mxu0 %v5879_v17 }
 0x1eb   : > { %v8310_v32 = vadd.f32 %v6330_v39, %v6218_v33  ;;  %3761 = vmatprep.mubr.bf16.mxu1 %v5881_v30  ;;  %v5896_v33 = vcombine.low %v457_v40, %v465_v41  ;;  %v496_v40 = vld [vmem:[%s7885_s8 + $0x660] sm:$0xff] }
 0x1ec   : > { %v6219_v37 = vpop.f32.mrb[56].mxu0 }
 0x1ed   : > { %v6331_v43 = vpop.f32.mrb[56].mxu1  ;;  %v6220_v45 = vpop.f32.mrb[57].mxu0 }
 0x1ee   : > { %v6221_v49 = vadd.f32 %v6220_v45, %v6219_v37  ;;  %v6332_v51 = vpop.f32.mrb[57].mxu1  ;;  %v6222_v52 = vpop.f32.mrb[58].mxu0  ;;  %v5913_v45 = vcombine.high %v473_v13, %v481_v14 }
 0x1ef   : > { %v6333_v57 = vadd.f32 %v6332_v51, %v6331_v43  ;;  %v6334_v55 = vpop.f32.mrb[58].mxu1  ;;  %v6223_v3 = vpop.f32.mrb[59].mxu0 }
 0x1f0   : > { %v6224_v8 = vadd.f32 %v6223_v3, %v6222_v52  ;;  %v6335_v9 = vpop.f32.mrb[59].mxu1  ;;  %v5910_v3 = vcombine.low %v472_v4, %v480_v6 }
 0x1f1   : > { %v8316_v10 = vadd.f32 %v6333_v57, %v6221_v49  ;;  %v6336_v12 = vadd.f32 %v6335_v9, %v6334_v55  ;;  %3601 = vmatmul.mubr.bf16.gmra.mrb[164].mxu0 %v5878_v46 }
 0x1f2   : > { %3762 = vmatmul.mubr.bf16.gmra.mrb[164].mxu1 %v5880_v54  ;;  %3608 = vmatprep.mubr.bf16.mxu0 %v5895_v56  ;;  %v489_v54 = vld [vmem:[%s7885_s8 + $0x628] sm:$0xff] }
 0x1f3   : > { %v8318_v1 = vadd.f32 %v6336_v12, %v6224_v8  ;;  %3769 = vmatprep.mubr.bf16.mxu1 %v5897_v5  ;;  %v497_v56 = vld [vmem:[%s7885_s8 + $0x668] sm:$0xff]  ;;  %v5912_v12 = vcombine.low %v473_v13, %v481_v14  ;;  %v504_v13 = vld [vmem:[%s7885_s8 + $0x6a0] sm:$0xff] }
 0x1f4   : > { %v6225_v7 = vpop.f32.mrb[60].mxu0  ;;  %v512_v14 = vld [vmem:[%s7885_s8 + $0x6e0] sm:$0xff] }
 0x1f5   : > { %v6337_v15 = vpop.f32.mrb[60].mxu1  ;;  %v6226_v17 = vpop.f32.mrb[61].mxu0 }
 0x1f6   : > { %v6227_v21 = vadd.f32 %v6226_v17, %v6225_v7  ;;  %v6338_v23 = vpop.f32.mrb[61].mxu1  ;;  %v6228_v30 = vpop.f32.mrb[62].mxu0  ;;  %v5927_v7 = vcombine.high %v488_v36, %v496_v40 }
 0x1f7   : > { %v6339_v39 = vadd.f32 %v6338_v23, %v6337_v15  ;;  %v6340_v37 = vpop.f32.mrb[62].mxu1  ;;  %v6229_v43 = vpop.f32.mrb[63].mxu0 }
 0x1f8   : > { %v6230_v46 = vadd.f32 %v6229_v43, %v6228_v30  ;;  %v6341_v49 = vpop.f32.mrb[63].mxu1  ;;  %v505_v43 = vld [vmem:[%s7885_s8 + $0x6a8] sm:$0xff] }
 0x1f9   : > { %v8324_v51 = vadd.f32 %v6339_v39, %v6227_v21  ;;  %v6342_v52 = vadd.f32 %v6341_v49, %v6340_v37  ;;  %3609 = vmatmul.mubr.bf16.gmra.mrb[168].mxu0 %v5894_v18  ;;  %v5929_v21 = vcombine.high %v489_v54, %v497_v56  ;;  %v5926_v49 = vcombine.low %v488_v36, %v496_v40 }
 0x1fa   : > { %3770 = vmatmul.mubr.bf16.gmra.mrb[168].mxu1 %v5896_v33  ;;  %3616 = vmatprep.mubr.bf16.mxu0 %v5911_v35 }
 0x1fb   : > { %v8326_v34 = vadd.f32 %v6342_v52, %v6230_v46  ;;  %3777 = vmatprep.mubr.bf16.mxu1 %v5913_v45  ;;  %v513_v45 = vld [vmem:[%s7885_s8 + $0x6e8] sm:$0xff] }
 0x1fc   : > { %v6359_v41 = vpop.f32.mrb[64].mxu0 }
 0x1fd   : > { %v6471_v57 = vpop.f32.mrb[64].mxu1  ;;  %v6360_v55 = vpop.f32.mrb[65].mxu0 }
 0x1fe   : > { %v6361_v5 = vadd.f32 %v6360_v55, %v6359_v41  ;;  %v6472_v8 = vpop.f32.mrb[65].mxu1  ;;  %v6362_v9 = vpop.f32.mrb[66].mxu0  ;;  %v5928_v55 = vcombine.low %v489_v54, %v497_v56  ;;  %v520_v54 = vld [vmem:[%s7885_s8 + $0x720] sm:$0xff] }
 0x1ff   : > { %v6473_v15 = vadd.f32 %v6472_v8, %v6471_v57  ;;  %v6474_v17 = vpop.f32.mrb[66].mxu1  ;;  %v6363_v18 = vpop.f32.mrb[67].mxu0  ;;  %v528_v56 = vld [vmem:[%s7885_s8 + $0x760] sm:$0xff] }
 0x200   : > { %v3209_v23 = vadd.f32 %v6361_v5, %v8118_v20  ;;  %v6364_v30 = vadd.f32 %v6363_v18, %v6362_v9  ;;  %v6475_v33 = vpop.f32.mrb[67].mxu1  ;;  %v5945_v9 = vcombine.high %v505_v43, %v513_v45 }
 0x201   : > { %v6476_v35 = vadd.f32 %v6475_v33, %v6474_v17  ;;  %3617 = vmatmul.mubr.bf16.gmra.mrb[172].mxu0 %v5910_v3  ;;  %v5943_v3 = vcombine.high %v504_v13, %v512_v14 }
 0x202   : > { %v8333_v4 = vadd.f32 %v6473_v15, %v3209_v23  ;;  %v3212_v6 = vadd.f32 %v6364_v30, %v8120_v22  ;;  %3778 = vmatmul.mubr.bf16.gmra.mrb[172].mxu1 %v5912_v12  ;;  %3624 = vmatprep.mubr.bf16.mxu0 %v5927_v7  ;;  %v521_v23 = vld [vmem:[%s7885_s8 + $0x728] sm:$0xff] }
 0x203   : > { %3785 = vmatprep.mubr.bf16.mxu1 %v5929_v21  ;;  %v529_v30 = vld [vmem:[%s7885_s8 + $0x768] sm:$0xff] }
 0x204   : > { %v8338_v39 = vadd.f32 %v6476_v35, %v3212_v6  ;;  %v6365_v37 = vpop.f32.mrb[68].mxu0  ;;  %v5942_v35 = vcombine.low %v504_v13, %v512_v14 }
 0x205   : > { %v6477_v46 = vpop.f32.mrb[68].mxu1  ;;  %v6366_v20 = vpop.f32.mrb[69].mxu0 }
 0x206   : > { %v6367_v52 = vadd.f32 %v6366_v20, %v6365_v37  ;;  %v6478_v41 = vpop.f32.mrb[69].mxu1  ;;  %v6368_v57 = vpop.f32.mrb[70].mxu0  ;;  %v5944_v20 = vcombine.low %v505_v43, %v513_v45  ;;  %v536_v43 = vld [vmem:[%s7885_s8 + $0x7a0] sm:$0xff] }
 0x207   : > { %v6479_v22 = vadd.f32 %v6478_v41, %v6477_v46  ;;  %v6480_v5 = vpop.f32.mrb[70].mxu1  ;;  %v6369_v8 = vpop.f32.mrb[71].mxu0  ;;  %v544_v45 = vld [vmem:[%s7885_s8 + $0x7e0] sm:$0xff] }
 0x208   : > { %v3217_v12 = vadd.f32 %v6367_v52, %v8126_v42  ;;  %v6370_v7 = vadd.f32 %v6369_v8, %v6368_v57  ;;  %v6481_v15 = vpop.f32.mrb[71].mxu1  ;;  %v5961_v57 = vcombine.high %v521_v23, %v529_v30 }
 0x209   : > { %v6482_v17 = vadd.f32 %v6481_v15, %v6480_v5  ;;  %3625 = vmatmul.mubr.bf16.gmra.mrb[176].mxu0 %v5926_v49  ;;  %v5959_v49 = vcombine.high %v520_v54, %v528_v56 }
 0x20a   : > { %v8343_v36 = vadd.f32 %v6479_v22, %v3217_v12  ;;  %v3220_v40 = vadd.f32 %v6370_v7, %v8128_v44  ;;  %3786 = vmatmul.mubr.bf16.gmra.mrb[176].mxu1 %v5928_v55  ;;  %3632 = vmatprep.mubr.bf16.mxu0 %v5943_v3  ;;  %v537_v12 = vld [vmem:[%s7885_s8 + $0x7a8] sm:$0xff] }
 0x20b   : > { %3793 = vmatprep.mubr.bf16.mxu1 %v5945_v9  ;;  %v545_v7 = vld [vmem:[%s7885_s8 + $0x7e8] sm:$0xff] }
 0x20c   : > { %v8348_v18 = vadd.f32 %v6482_v17, %v3220_v40  ;;  %v6371_v21 = vpop.f32.mrb[72].mxu0  ;;  %v5958_v17 = vcombine.low %v520_v54, %v528_v56 }
 0x20d   : > { %v6483_v33 = vpop.f32.mrb[72].mxu1  ;;  %v6372_v42 = vpop.f32.mrb[73].mxu0 }
 0x20e   : > { %v6373_v6 = vadd.f32 %v6372_v42, %v6371_v21  ;;  %v6484_v37 = vpop.f32.mrb[73].mxu1  ;;  %v6374_v46 = vpop.f32.mrb[74].mxu0  ;;  %v5960_v42 = vcombine.low %v521_v23, %v529_v30  ;;  %v298_v23 = vld [vmem:[%s7885_s8 + $0x30] sm:$0xff] }
 0x20f   : > { %v6485_v44 = vadd.f32 %v6484_v37, %v6483_v33  ;;  %v6486_v52 = vpop.f32.mrb[74].mxu1  ;;  %v6375_v41 = vpop.f32.mrb[75].mxu0  ;;  %v306_v30 = vld [vmem:[%s7885_s8 + $0x70] sm:$0xff] }
 0x210   : > { %v3225_v55 = vadd.f32 %v6373_v6, %v8134_v0  ;;  %v6376_v3 = vadd.f32 %v6375_v41, %v6374_v46  ;;  %v6487_v22 = vpop.f32.mrb[75].mxu1  ;;  %v5977_v46 = vcombine.high %v537_v12, %v545_v7 }
 0x211   : > { %v6488_v5 = vadd.f32 %v6487_v22, %v6486_v52  ;;  %3633 = vmatmul.mubr.bf16.gmra.mrb[180].mxu0 %v5942_v35  ;;  %v5975_v35 = vcombine.high %v536_v43, %v544_v45 }
 0x212   : > { %v8353_v13 = vadd.f32 %v6485_v44, %v3225_v55  ;;  %v3228_v14 = vadd.f32 %v6376_v3, %v8136_v2  ;;  %3794 = vmatmul.mubr.bf16.gmra.mrb[180].mxu1 %v5944_v20  ;;  %3640 = vmatprep.mubr.bf16.mxu0 %v5959_v49  ;;  %v299_v55 = vld [vmem:[%s7885_s8 + $0x38] sm:$0xff] }
 0x213   : > { %3801 = vmatprep.mubr.bf16.mxu1 %v5961_v57  ;;  %v307_v3 = vld [vmem:[%s7885_s8 + $0x78] sm:$0xff] }
 0x214   : > { %v8358_v8 = vadd.f32 %v6488_v5, %v3228_v14  ;;  %v6377_v9 = vpop.f32.mrb[76].mxu0  ;;  %v5974_v5 = vcombine.low %v536_v43, %v544_v45 }
 0x215   : > { %v6489_v15 = vpop.f32.mrb[76].mxu1  ;;  %v6378_v0 = vpop.f32.mrb[77].mxu0 }
 0x216   : > { %v6379_v40 = vadd.f32 %v6378_v0, %v6377_v9  ;;  %v6490_v21 = vpop.f32.mrb[77].mxu1  ;;  %v6380_v33 = vpop.f32.mrb[78].mxu0  ;;  %v5976_v0 = vcombine.low %v537_v12, %v545_v7  ;;  %v314_v12 = vld [vmem:[%s7885_s8 + $0xb0] sm:$0xff] }
 0x217   : > { %v6491_v2 = vadd.f32 %v6490_v21, %v6489_v15  ;;  %v6492_v6 = vpop.f32.mrb[78].mxu1  ;;  %v6381_v37 = vpop.f32.mrb[79].mxu0  ;;  %v322_v7 = vld [vmem:[%s7885_s8 + $0xf0] sm:$0xff] }
 0x218   : > { %v3233_v20 = vadd.f32 %v6379_v40, %v8142_v24  ;;  %v6382_v49 = vadd.f32 %v6381_v37, %v6380_v33  ;;  %v6493_v44 = vpop.f32.mrb[79].mxu1  ;;  %v5741_v33 = vcombine.high %v299_v55, %v307_v3 }
 0x219   : > { %v6494_v52 = vadd.f32 %v6493_v44, %v6492_v6  ;;  %3641 = vmatmul.mubr.bf16.gmra.mrb[184].mxu0 %v5958_v17  ;;  %v5739_v17 = vcombine.high %v298_v23, %v306_v30 }
 0x21a   : > { %v8363_v54 = vadd.f32 %v6491_v2, %v3233_v20  ;;  %v3236_v56 = vadd.f32 %v6382_v49, %v8144_v26  ;;  %3802 = vmatmul.mubr.bf16.gmra.mrb[184].mxu1 %v5960_v42  ;;  %3648 = vmatprep.mubr.bf16.mxu0 %v5975_v35  ;;  %v315_v20 = vld [vmem:[%s7885_s8 + $0xb8] sm:$0xff] }
 0x21b   : > { %3809 = vmatprep.mubr.bf16.mxu1 %v5977_v46  ;;  %v323_v49 = vld [vmem:[%s7885_s8 + $0xf8] sm:$0xff] }
 0x21c   : > { %v8368_v41 = vadd.f32 %v6494_v52, %v3236_v56  ;;  %v6383_v57 = vpop.f32.mrb[80].mxu0  ;;  %v5738_v52 = vcombine.low %v298_v23, %v306_v30 }
 0x21d   : > { %v6495_v22 = vpop.f32.mrb[80].mxu1  ;;  %v6384_v24 = vpop.f32.mrb[81].mxu0 }
 0x21e   : > { %v6385_v14 = vadd.f32 %v6384_v24, %v6383_v57  ;;  %v6496_v9 = vpop.f32.mrb[81].mxu1  ;;  %v6386_v15 = vpop.f32.mrb[82].mxu0  ;;  %v5740_v24 = vcombine.low %v299_v55, %v307_v3  ;;  %v330_v55 = vld [vmem:[%s7885_s8 + $0x130] sm:$0xff] }
 0x21f   : > { %v6497_v26 = vadd.f32 %v6496_v9, %v6495_v22  ;;  %v6498_v40 = vpop.f32.mrb[82].mxu1  ;;  %v6387_v21 = vpop.f32.mrb[83].mxu0  ;;  %v338_v3 = vld [vmem:[%s7885_s8 + $0x170] sm:$0xff] }
 0x220   : > { %v3241_v42 = vadd.f32 %v6385_v14, %v8150_v48  ;;  %v6388_v35 = vadd.f32 %v6387_v21, %v6386_v15  ;;  %v6499_v2 = vpop.f32.mrb[83].mxu1  ;;  %v5757_v15 = vcombine.high %v315_v20, %v323_v49 }
 0x221   : > { %v6500_v6 = vadd.f32 %v6499_v2, %v6498_v40  ;;  %3649 = vmatmul.mubr.bf16.gmra.mrb[188].mxu0 %v5974_v5  ;;  %v5755_v5 = vcombine.high %v314_v12, %v322_v7 }
 0x222   : > { %v8373_v43 = vadd.f32 %v6497_v26, %v3241_v42  ;;  %v3244_v45 = vadd.f32 %v6388_v35, %v8152_v50  ;;  %3810 = vmatmul.mubr.bf16.gmra.mrb[188].mxu1 %v5976_v0  ;;  %3850 = vmatprep.mubr.bf16.mxu0 %v5739_v17  ;;  %v331_v42 = vld [vmem:[%s7885_s8 + $0x138] sm:$0xff] }
 0x223   : > { %4011 = vmatprep.mubr.bf16.mxu1 %v5741_v33  ;;  %v339_v35 = vld [vmem:[%s7885_s8 + $0x178] sm:$0xff] }
 0x224   : > { %v8378_v37 = vadd.f32 %v6500_v6, %v3244_v45  ;;  %v6389_v46 = vpop.f32.mrb[84].mxu0  ;;  %v5754_v6 = vcombine.low %v314_v12, %v322_v7 }
 0x225   : > { %v6501_v44 = vpop.f32.mrb[84].mxu1  ;;  %v6390_v48 = vpop.f32.mrb[85].mxu0 }
 0x226   : > { %v6391_v56 = vadd.f32 %v6390_v48, %v6389_v46  ;;  %v6502_v57 = vpop.f32.mrb[85].mxu1  ;;  %v6392_v22 = vpop.f32.mrb[86].mxu0  ;;  %v5756_v48 = vcombine.low %v315_v20, %v323_v49  ;;  %v346_v20 = vld [vmem:[%s7885_s8 + $0x1b0] sm:$0xff] }
 0x227   : > { %v6503_v50 = vadd.f32 %v6502_v57, %v6501_v44  ;;  %v6504_v14 = vpop.f32.mrb[86].mxu1  ;;  %v6393_v9 = vpop.f32.mrb[87].mxu0  ;;  %v354_v49 = vld [vmem:[%s7885_s8 + $0x1f0] sm:$0xff] }
 0x228   : > { %v3249_v0 = vadd.f32 %v6391_v56, %v8167_v11  ;;  %v6394_v17 = vadd.f32 %v6393_v9, %v6392_v22  ;;  %v6505_v26 = vpop.f32.mrb[87].mxu1  ;;  %v5773_v22 = vcombine.high %v331_v42, %v339_v35 }
 0x229   : > { %v6506_v40 = vadd.f32 %v6505_v26, %v6504_v14  ;;  %3851 = vmatmul.mubr.bf16.vlgmr.msra.gmra.mrb[192].mxu0 %v5738_v52  ;;  %v5771_v52 = vcombine.high %v330_v55, %v338_v3 }
 0x22a   : > { %v8383_v23 = vadd.f32 %v6503_v50, %v3249_v0  ;;  %v3252_v30 = vadd.f32 %v6394_v17, %v8174_v16  ;;  %4012 = vmatmul.mubr.bf16.vlgmr.msra.gmra.mrb[192].mxu1 %v5740_v24  ;;  %3858 = vmatprep.mubr.bf16.mxu0 %v5755_v5  ;;  %v347_v0 = vld [vmem:[%s7885_s8 + $0x1b8] sm:$0xff] }
 0x22b   : > { %4019 = vmatprep.mubr.bf16.mxu1 %v5757_v15  ;;  %v355_v17 = vld [vmem:[%s7885_s8 + $0x1f8] sm:$0xff] }
 0x22c   : > { %v8388_v21 = vadd.f32 %v6506_v40, %v3252_v30  ;;  %v6395_v33 = vpop.f32.mrb[88].mxu0  ;;  %v5770_v40 = vcombine.low %v330_v55, %v338_v3 }
 0x22d   : > { %v6507_v2 = vpop.f32.mrb[88].mxu1  ;;  %v6396_v11 = vpop.f32.mrb[89].mxu0 }
 0x22e   : > { %v6397_v45 = vadd.f32 %v6396_v11, %v6395_v33  ;;  %v6508_v46 = vpop.f32.mrb[89].mxu1  ;;  %v6398_v44 = vpop.f32.mrb[90].mxu0  ;;  %v5772_v11 = vcombine.low %v331_v42, %v339_v35  ;;  %v362_v42 = vld [vmem:[%s7885_s8 + $0x230] sm:$0xff] }
 0x22f   : > { %v6509_v16 = vadd.f32 %v6508_v46, %v6507_v2  ;;  %v6510_v56 = vpop.f32.mrb[90].mxu1  ;;  %v6399_v57 = vpop.f32.mrb[91].mxu0  ;;  %v370_v35 = vld [vmem:[%s7885_s8 + $0x270] sm:$0xff] }
 0x230   : > { %v3257_v24 = vadd.f32 %v6397_v45, %v8197_v47  ;;  %v6400_v5 = vadd.f32 %v6399_v57, %v6398_v44  ;;  %v6511_v50 = vpop.f32.mrb[91].mxu1  ;;  %v5789_v44 = vcombine.high %v347_v0, %v355_v17 }
 0x231   : > { %v6512_v14 = vadd.f32 %v6511_v50, %v6510_v56  ;;  %3859 = vmatmul.mubr.bf16.gmra.mrb[196].mxu0 %v5754_v6  ;;  %v5787_v6 = vcombine.high %v346_v20, %v354_v49 }
 0x232   : > { %v8393_v12 = vadd.f32 %v6509_v16, %v3257_v24  ;;  %v3260_v7 = vadd.f32 %v6400_v5, %v8203_v53  ;;  %4020 = vmatmul.mubr.bf16.gmra.mrb[196].mxu1 %v5756_v48  ;;  %3866 = vmatprep.mubr.bf16.mxu0 %v5771_v52  ;;  %v363_v24 = vld [vmem:[%s7885_s8 + $0x238] sm:$0xff] }
 0x233   : > { %4027 = vmatprep.mubr.bf16.mxu1 %v5773_v22  ;;  %v371_v5 = vld [vmem:[%s7885_s8 + $0x278] sm:$0xff] }
 0x234   : > { %v8398_v9 = vadd.f32 %v6512_v14, %v3260_v7  ;;  %v6401_v15 = vpop.f32.mrb[92].mxu0  ;;  %v5786_v14 = vcombine.low %v346_v20, %v354_v49 }
 0x235   : > { %v6513_v26 = vpop.f32.mrb[92].mxu1  ;;  %v6402_v47 = vpop.f32.mrb[93].mxu0 }
 0x236   : > { %v6403_v30 = vadd.f32 %v6402_v47, %v6401_v15  ;;  %v6514_v33 = vpop.f32.mrb[93].mxu1  ;;  %v6404_v2 = vpop.f32.mrb[94].mxu0  ;;  %v5788_v47 = vcombine.low %v347_v0, %v355_v17  ;;  %v378_v0 = vld [vmem:[%s7885_s8 + $0x2b0] sm:$0xff] }
 0x237   : > { %v6515_v53 = vadd.f32 %v6514_v33, %v6513_v26  ;;  %v6516_v45 = vpop.f32.mrb[94].mxu1  ;;  %v6405_v46 = vpop.f32.mrb[95].mxu0  ;;  %v386_v17 = vld [vmem:[%s7885_s8 + $0x2f0] sm:$0xff] }
 0x238   : > { %v3265_v48 = vadd.f32 %v6403_v30, %v8229_v19  ;;  %v6406_v52 = vadd.f32 %v6405_v46, %v6404_v2  ;;  %v6517_v16 = vpop.f32.mrb[95].mxu1  ;;  %v5805_v2 = vcombine.high %v363_v24, %v371_v5 }
 0x239   : > { %v6518_v56 = vadd.f32 %v6517_v16, %v6516_v45  ;;  %3867 = vmatmul.mubr.bf16.gmra.mrb[200].mxu0 %v5770_v40  ;;  %v5803_v40 = vcombine.high %v362_v42, %v370_v35 }
 0x23a   : > { %v8403_v55 = vadd.f32 %v6515_v53, %v3265_v48  ;;  %v3268_v3 = vadd.f32 %v6406_v52, %v8235_v27  ;;  %4028 = vmatmul.mubr.bf16.gmra.mrb[200].mxu1 %v5772_v11  ;;  %3874 = vmatprep.mubr.bf16.mxu0 %v5787_v6  ;;  %v379_v48 = vld [vmem:[%s7885_s8 + $0x2b8] sm:$0xff] }
 0x23b   : > { %4035 = vmatprep.mubr.bf16.mxu1 %v5789_v44  ;;  %v387_v52 = vld [vmem:[%s7885_s8 + $0x2f8] sm:$0xff] }
 0x23c   : > { %v8408_v57 = vadd.f32 %v6518_v56, %v3268_v3  ;;  %v6407_v22 = vpop.f32.mrb[96].mxu0  ;;  %v5802_v56 = vcombine.low %v362_v42, %v370_v35 }
 0x23d   : > { %v6519_v50 = vpop.f32.mrb[96].mxu1  ;;  %v6408_v19 = vpop.f32.mrb[97].mxu0 }
 0x23e   : > { %v6409_v7 = vadd.f32 %v6408_v19, %v6407_v22  ;;  %v6520_v15 = vpop.f32.mrb[97].mxu1  ;;  %v6410_v26 = vpop.f32.mrb[98].mxu0  ;;  %v5804_v19 = vcombine.low %v363_v24, %v371_v5  ;;  %v394_v24 = vld [vmem:[%s7885_s8 + $0x330] sm:$0xff] }
 0x23f   : > { %v6521_v27 = vadd.f32 %v6520_v15, %v6519_v50  ;;  %v6522_v30 = vpop.f32.mrb[98].mxu1  ;;  %v6411_v33 = vpop.f32.mrb[99].mxu0  ;;  %v402_v5 = vld [vmem:[%s7885_s8 + $0x370] sm:$0xff] }
 0x240   : > { %v3273_v11 = vadd.f32 %v6409_v7, %v8261_v59  ;;  %v6412_v6 = vadd.f32 %v6411_v33, %v6410_v26  ;;  %v6523_v53 = vpop.f32.mrb[99].mxu1  ;;  %v5821_v26 = vcombine.high %v379_v48, %v387_v52 }
 0x241   : > { %v6524_v45 = vadd.f32 %v6523_v53, %v6522_v30  ;;  %3875 = vmatmul.mubr.bf16.gmra.mrb[204].mxu0 %v5786_v14  ;;  %v5819_v14 = vcombine.high %v378_v0, %v386_v17 }
 0x242   : > { %v8413_v20 = vadd.f32 %v6521_v27, %v3273_v11  ;;  %v3276_v49 = vadd.f32 %v6412_v6, %v8264_v62  ;;  %4036 = vmatmul.mubr.bf16.gmra.mrb[204].mxu1 %v5788_v47  ;;  %3882 = vmatprep.mubr.bf16.mxu0 %v5803_v40  ;;  %v395_v11 = vld [vmem:[%s7885_s8 + $0x338] sm:$0xff] }
 0x243   : > { %4043 = vmatprep.mubr.bf16.mxu1 %v5805_v2  ;;  %v403_v6 = vld [vmem:[%s7885_s8 + $0x378] sm:$0xff] }
 0x244   : > { %v8418_v46 = vadd.f32 %v6524_v45, %v3276_v49  ;;  %v6413_v44 = vpop.f32.mrb[100].mxu0  ;;  %v5818_v45 = vcombine.low %v378_v0, %v386_v17 }
 0x245   : > { %v6525_v16 = vpop.f32.mrb[100].mxu1  ;;  %v6414_v59 = vpop.f32.mrb[101].mxu0 }
 0x246   : > { %v6415_v3 = vadd.f32 %v6414_v59, %v6413_v44  ;;  %v6526_v22 = vpop.f32.mrb[101].mxu1  ;;  %v6416_v50 = vpop.f32.mrb[102].mxu0  ;;  %v5820_v59 = vcombine.low %v379_v48, %v387_v52  ;;  %v410_v48 = vld [vmem:[%s7885_s8 + $0x3b0] sm:$0xff] }
 0x247   : > { %v6527_v62 = vadd.f32 %v6526_v22, %v6525_v16  ;;  %v6528_v7 = vpop.f32.mrb[102].mxu1  ;;  %v6417_v15 = vpop.f32.mrb[103].mxu0  ;;  %v418_v52 = vld [vmem:[%s7885_s8 + $0x3f0] sm:$0xff] }
 0x248   : > { %v3281_v47 = vadd.f32 %v6415_v3, %v8276_v25  ;;  %v6418_v40 = vadd.f32 %v6417_v15, %v6416_v50  ;;  %v6529_v27 = vpop.f32.mrb[103].mxu1  ;;  %v5837_v50 = vcombine.high %v395_v11, %v403_v6 }
 0x249   : > { %v6530_v30 = vadd.f32 %v6529_v27, %v6528_v7  ;;  %3883 = vmatmul.mubr.bf16.gmra.mrb[208].mxu0 %v5802_v56  ;;  %v5835_v56 = vcombine.high %v394_v24, %v402_v5 }
 0x24a   : > { %v8423_v42 = vadd.f32 %v6527_v62, %v3281_v47  ;;  %v3284_v35 = vadd.f32 %v6418_v40, %v8278_v29  ;;  %4044 = vmatmul.mubr.bf16.gmra.mrb[208].mxu1 %v5804_v19  ;;  %3890 = vmatprep.mubr.bf16.mxu0 %v5819_v14  ;;  %v411_v47 = vld [vmem:[%s7885_s8 + $0x3b8] sm:$0xff] }
 0x24b   : > { %4051 = vmatprep.mubr.bf16.mxu1 %v5821_v26  ;;  %v419_v40 = vld [vmem:[%s7885_s8 + $0x3f8] sm:$0xff] }
 0x24c   : > { %v8428_v33 = vadd.f32 %v6530_v30, %v3284_v35  ;;  %v6419_v2 = vpop.f32.mrb[104].mxu0  ;;  %v5834_v30 = vcombine.low %v394_v24, %v402_v5 }
 0x24d   : > { %v6531_v53 = vpop.f32.mrb[104].mxu1  ;;  %v6420_v25 = vpop.f32.mrb[105].mxu0 }
 0x24e   : > { %v6421_v49 = vadd.f32 %v6420_v25, %v6419_v2  ;;  %v6532_v44 = vpop.f32.mrb[105].mxu1  ;;  %v6422_v16 = vpop.f32.mrb[106].mxu0  ;;  %v5836_v25 = vcombine.low %v395_v11, %v403_v6  ;;  %v426_v11 = vld [vmem:[%s7885_s8 + $0x430] sm:$0xff] }
 0x24f   : > { %v6533_v29 = vadd.f32 %v6532_v44, %v6531_v53  ;;  %v6534_v3 = vpop.f32.mrb[106].mxu1  ;;  %v6423_v22 = vpop.f32.mrb[107].mxu0  ;;  %v434_v6 = vld [vmem:[%s7885_s8 + $0x470] sm:$0xff] }
 0x250   : > { %v3289_v19 = vadd.f32 %v6421_v49, %v8284_v58  ;;  %v6424_v14 = vadd.f32 %v6423_v22, %v6422_v16  ;;  %v6535_v62 = vpop.f32.mrb[107].mxu1  ;;  %v5853_v16 = vcombine.high %v411_v47, %v419_v40 }
 0x251   : > { %v6536_v7 = vadd.f32 %v6535_v62, %v6534_v3  ;;  %3891 = vmatmul.mubr.bf16.gmra.mrb[212].mxu0 %v5818_v45  ;;  %v5851_v45 = vcombine.high %v410_v48, %v418_v52 }
 0x252   : > { %v8433_v0 = vadd.f32 %v6533_v29, %v3289_v19  ;;  %v3292_v17 = vadd.f32 %v6424_v14, %v8286_v61  ;;  %4052 = vmatmul.mubr.bf16.gmra.mrb[212].mxu1 %v5820_v59  ;;  %3898 = vmatprep.mubr.bf16.mxu0 %v5835_v56  ;;  %v427_v19 = vld [vmem:[%s7885_s8 + $0x438] sm:$0xff] }
 0x253   : > { %4059 = vmatprep.mubr.bf16.mxu1 %v5837_v50  ;;  %v435_v14 = vld [vmem:[%s7885_s8 + $0x478] sm:$0xff] }
 0x254   : > { %v8438_v15 = vadd.f32 %v6536_v7, %v3292_v17  ;;  %v6425_v26 = vpop.f32.mrb[108].mxu0  ;;  %v5850_v7 = vcombine.low %v410_v48, %v418_v52 }
 0x255   : > { %v6537_v27 = vpop.f32.mrb[108].mxu1  ;;  %v6426_v58 = vpop.f32.mrb[109].mxu0 }
 0x256   : > { %v6427_v35 = vadd.f32 %v6426_v58, %v6425_v26  ;;  %v6538_v2 = vpop.f32.mrb[109].mxu1  ;;  %v6428_v53 = vpop.f32.mrb[110].mxu0  ;;  %v5852_v58 = vcombine.low %v411_v47, %v419_v40  ;;  %v442_v47 = vld [vmem:[%s7885_s8 + $0x4b0] sm:$0xff] }
 0x257   : > { %v6539_v61 = vadd.f32 %v6538_v2, %v6537_v27  ;;  %v6540_v49 = vpop.f32.mrb[110].mxu1  ;;  %v6429_v44 = vpop.f32.mrb[111].mxu0  ;;  %v450_v40 = vld [vmem:[%s7885_s8 + $0x4f0] sm:$0xff] }
 0x258   : > { %v3297_v59 = vadd.f32 %v6427_v35, %v8292_v31  ;;  %v6430_v56 = vadd.f32 %v6429_v44, %v6428_v53  ;;  %v6541_v29 = vpop.f32.mrb[111].mxu1  ;;  %v5869_v53 = vcombine.high %v427_v19, %v435_v14 }
 0x259   : > { %v6542_v3 = vadd.f32 %v6541_v29, %v6540_v49  ;;  %3899 = vmatmul.mubr.bf16.gmra.mrb[216].mxu0 %v5834_v30  ;;  %v5867_v30 = vcombine.high %v426_v11, %v434_v6 }
 0x25a   : > { %v8443_v24 = vadd.f32 %v6539_v61, %v3297_v59  ;;  %v3300_v5 = vadd.f32 %v6430_v56, %v8294_v28  ;;  %4060 = vmatmul.mubr.bf16.gmra.mrb[216].mxu1 %v5836_v25  ;;  %3906 = vmatprep.mubr.bf16.mxu0 %v5851_v45  ;;  %v443_v59 = vld [vmem:[%s7885_s8 + $0x4b8] sm:$0xff] }
 0x25b   : > { %4067 = vmatprep.mubr.bf16.mxu1 %v5853_v16  ;;  %v451_v56 = vld [vmem:[%s7885_s8 + $0x4f8] sm:$0xff] }
 0x25c   : > { %v8448_v22 = vadd.f32 %v6542_v3, %v3300_v5  ;;  %v6431_v50 = vpop.f32.mrb[112].mxu0  ;;  %v5866_v3 = vcombine.low %v426_v11, %v434_v6 }
 0x25d   : > { %v6543_v62 = vpop.f32.mrb[112].mxu1  ;;  %v6432_v31 = vpop.f32.mrb[113].mxu0 }
 0x25e   : > { %v6433_v17 = vadd.f32 %v6432_v31, %v6431_v50  ;;  %v6544_v26 = vpop.f32.mrb[113].mxu1  ;;  %v6434_v27 = vpop.f32.mrb[114].mxu0  ;;  %v5868_v31 = vcombine.low %v427_v19, %v435_v14  ;;  %v458_v19 = vld [vmem:[%s7885_s8 + $0x530] sm:$0xff] }
 0x25f   : > { %v6545_v28 = vadd.f32 %v6544_v26, %v6543_v62  ;;  %v6546_v35 = vpop.f32.mrb[114].mxu1  ;;  %v6435_v2 = vpop.f32.mrb[115].mxu0  ;;  %v466_v14 = vld [vmem:[%s7885_s8 + $0x570] sm:$0xff] }
 0x260   : > { %v3305_v25 = vadd.f32 %v6433_v17, %v8300_v60  ;;  %v6436_v45 = vadd.f32 %v6435_v2, %v6434_v27  ;;  %v6547_v61 = vpop.f32.mrb[115].mxu1  ;;  %v5885_v27 = vcombine.high %v443_v59, %v451_v56 }
 0x261   : > { %v6548_v49 = vadd.f32 %v6547_v61, %v6546_v35  ;;  %3907 = vmatmul.mubr.bf16.gmra.mrb[220].mxu0 %v5850_v7  ;;  %v5883_v7 = vcombine.high %v442_v47, %v450_v40 }
 0x262   : > { %v8453_v48 = vadd.f32 %v6545_v28, %v3305_v25  ;;  %v3308_v52 = vadd.f32 %v6436_v45, %v8302_v63  ;;  %4068 = vmatmul.mubr.bf16.gmra.mrb[220].mxu1 %v5852_v58  ;;  %3914 = vmatprep.mubr.bf16.mxu0 %v5867_v30  ;;  %v459_v25 = vld [vmem:[%s7885_s8 + $0x538] sm:$0xff] }
 0x263   : > { %4075 = vmatprep.mubr.bf16.mxu1 %v5869_v53  ;;  %v467_v45 = vld [vmem:[%s7885_s8 + $0x578] sm:$0xff] }
 0x264   : > { %v8458_v44 = vadd.f32 %v6548_v49, %v3308_v52  ;;  %v6437_v16 = vpop.f32.mrb[116].mxu0  ;;  %v5882_v49 = vcombine.low %v442_v47, %v450_v40 }
 0x265   : > { %v6549_v29 = vpop.f32.mrb[116].mxu1  ;;  %v6438_v60 = vpop.f32.mrb[117].mxu0 }
 0x266   : > { %v6439_v5 = vadd.f32 %v6438_v60, %v6437_v16  ;;  %v6550_v50 = vpop.f32.mrb[117].mxu1  ;;  %v6440_v62 = vpop.f32.mrb[118].mxu0  ;;  %v5884_v60 = vcombine.low %v443_v59, %v451_v56  ;;  %v474_v59 = vld [vmem:[%s7885_s8 + $0x5b0] sm:$0xff] }
 0x267   : > { %v6551_v63 = vadd.f32 %v6550_v50, %v6549_v29  ;;  %v6552_v17 = vpop.f32.mrb[118].mxu1  ;;  %v6441_v26 = vpop.f32.mrb[119].mxu0  ;;  %v482_v56 = vld [vmem:[%s7885_s8 + $0x5f0] sm:$0xff] }
 0x268   : > { %v3313_v58 = vadd.f32 %v6439_v5, %v8308_v38  ;;  %v6442_v30 = vadd.f32 %v6441_v26, %v6440_v62  ;;  %v6553_v28 = vpop.f32.mrb[119].mxu1  ;;  %v5901_v62 = vcombine.high %v459_v25, %v467_v45 }
 0x269   : > { %v6554_v35 = vadd.f32 %v6553_v28, %v6552_v17  ;;  %3915 = vmatmul.mubr.bf16.gmra.mrb[224].mxu0 %v5866_v3  ;;  %v5899_v3 = vcombine.high %v458_v19, %v466_v14 }
 0x26a   : > { %v8463_v11 = vadd.f32 %v6551_v63, %v3313_v58  ;;  %v3316_v6 = vadd.f32 %v6442_v30, %v8310_v32  ;;  %4076 = vmatmul.mubr.bf16.gmra.mrb[224].mxu1 %v5868_v31  ;;  %3922 = vmatprep.mubr.bf16.mxu0 %v5883_v7  ;;  %v475_v58 = vld [vmem:[%s7885_s8 + $0x5b8] sm:$0xff] }
 0x26b   : > { %4083 = vmatprep.mubr.bf16.mxu1 %v5885_v27  ;;  %v483_v30 = vld [vmem:[%s7885_s8 + $0x5f8] sm:$0xff] }
 0x26c   : > { %v8468_v2 = vadd.f32 %v6554_v35, %v3316_v6  ;;  %v6443_v53 = vpop.f32.mrb[120].mxu0  ;;  %v5898_v35 = vcombine.low %v458_v19, %v466_v14 }
 0x26d   : > { %v6555_v61 = vpop.f32.mrb[120].mxu1  ;;  %v6444_v38 = vpop.f32.mrb[121].mxu0 }
 0x26e   : > { %v6445_v52 = vadd.f32 %v6444_v38, %v6443_v53  ;;  %v6556_v16 = vpop.f32.mrb[121].mxu1  ;;  %v6446_v29 = vpop.f32.mrb[122].mxu0  ;;  %v5900_v38 = vcombine.low %v459_v25, %v467_v45  ;;  %v490_v25 = vld [vmem:[%s7885_s8 + $0x630] sm:$0xff] }
 0x26f   : > { %v6557_v32 = vadd.f32 %v6556_v16, %v6555_v61  ;;  %v6558_v5 = vpop.f32.mrb[122].mxu1  ;;  %v6447_v50 = vpop.f32.mrb[123].mxu0  ;;  %v498_v45 = vld [vmem:[%s7885_s8 + $0x670] sm:$0xff] }
 0x270   : > { %v3321_v31 = vadd.f32 %v6445_v52, %v8316_v10  ;;  %v6448_v7 = vadd.f32 %v6447_v50, %v6446_v29  ;;  %v6559_v63 = vpop.f32.mrb[123].mxu1  ;;  %v5917_v29 = vcombine.high %v475_v58, %v483_v30 }
 0x271   : > { %v6560_v17 = vadd.f32 %v6559_v63, %v6558_v5  ;;  %3923 = vmatmul.mubr.bf16.gmra.mrb[228].mxu0 %v5882_v49  ;;  %v5915_v49 = vcombine.high %v474_v59, %v482_v56 }
 0x272   : > { %v8473_v47 = vadd.f32 %v6557_v32, %v3321_v31  ;;  %v3324_v40 = vadd.f32 %v6448_v7, %v8318_v1  ;;  %4084 = vmatmul.mubr.bf16.gmra.mrb[228].mxu1 %v5884_v60  ;;  %3930 = vmatprep.mubr.bf16.mxu0 %v5899_v3  ;;  %v491_v31 = vld [vmem:[%s7885_s8 + $0x638] sm:$0xff] }
 0x273   : > { %4091 = vmatprep.mubr.bf16.mxu1 %v5901_v62  ;;  %v499_v7 = vld [vmem:[%s7885_s8 + $0x678] sm:$0xff] }
 0x274   : > { %v8478_v26 = vadd.f32 %v6560_v17, %v3324_v40  ;;  %v6449_v27 = vpop.f32.mrb[124].mxu0  ;;  %v5914_v17 = vcombine.low %v474_v59, %v482_v56 }
 0x275   : > { %v6561_v28 = vpop.f32.mrb[124].mxu1  ;;  %v6450_v10 = vpop.f32.mrb[125].mxu0 }
 0x276   : > { %v6451_v6 = vadd.f32 %v6450_v10, %v6449_v27  ;;  %v6562_v53 = vpop.f32.mrb[125].mxu1  ;;  %v6452_v61 = vpop.f32.mrb[126].mxu0  ;;  %v5916_v10 = vcombine.low %v475_v58, %v483_v30  ;;  %v506_v58 = vld [vmem:[%s7885_s8 + $0x6b0] sm:$0xff] }
 0x277   : > { %v6563_v1 = vadd.f32 %v6562_v53, %v6561_v28  ;;  %v6564_v52 = vpop.f32.mrb[126].mxu1  ;;  %v6453_v16 = vpop.f32.mrb[127].mxu0  ;;  %v514_v30 = vld [vmem:[%s7885_s8 + $0x6f0] sm:$0xff] }
 0x278   : > { %v3329_v60 = vadd.f32 %v6451_v6, %v8324_v51  ;;  %v6454_v3 = vadd.f32 %v6453_v16, %v6452_v61  ;;  %v6565_v32 = vpop.f32.mrb[127].mxu1  ;;  %v5933_v61 = vcombine.high %v491_v31, %v499_v7 }
 0x279   : > { %v6566_v5 = vadd.f32 %v6565_v32, %v6564_v52  ;;  %3931 = vmatmul.mubr.bf16.gmra.mrb[232].mxu0 %v5898_v35  ;;  %v5931_v35 = vcombine.high %v490_v25, %v498_v45 }
 0x27a   : > { %v8483_v19 = vadd.f32 %v6563_v1, %v3329_v60  ;;  %v3332_v14 = vadd.f32 %v6454_v3, %v8326_v34  ;;  %4092 = vmatmul.mubr.bf16.gmra.mrb[232].mxu1 %v5900_v38  ;;  %3938 = vmatprep.mubr.bf16.mxu0 %v5915_v49  ;;  %v507_v60 = vld [vmem:[%s7885_s8 + $0x6b8] sm:$0xff] }
 0x27b   : > { %4099 = vmatprep.mubr.bf16.mxu1 %v5917_v29  ;;  %v515_v3 = vld [vmem:[%s7885_s8 + $0x6f8] sm:$0xff] }
 0x27c   : > { %v8488_v50 = vadd.f32 %v6566_v5, %v3332_v14  ;;  %v6583_v62 = vpop.f32.mrb[128].mxu0  ;;  %v5930_v5 = vcombine.low %v490_v25, %v498_v45 }
 0x27d   : > { %v6695_v63 = vpop.f32.mrb[128].mxu1  ;;  %v6584_v51 = vpop.f32.mrb[129].mxu0 }
 0x27e   : > { %v6585_v40 = vadd.f32 %v6584_v51, %v6583_v62  ;;  %v6696_v27 = vpop.f32.mrb[129].mxu1  ;;  %v6586_v28 = vpop.f32.mrb[130].mxu0  ;;  %v5932_v51 = vcombine.low %v491_v31, %v499_v7  ;;  %v522_v31 = vld [vmem:[%s7885_s8 + $0x730] sm:$0xff] }
 0x27f   : > { %v6697_v34 = vadd.f32 %v6696_v27, %v6695_v63  ;;  %v6698_v6 = vpop.f32.mrb[130].mxu1  ;;  %v6587_v53 = vpop.f32.mrb[131].mxu0  ;;  %v530_v7 = vld [vmem:[%s7885_s8 + $0x770] sm:$0xff] }
 0x280   : > { %v3531_v38 = vadd.f32 %v6585_v40, %v8333_v4  ;;  %v6588_v49 = vadd.f32 %v6587_v53, %v6586_v28  ;;  %v6699_v1 = vpop.f32.mrb[131].mxu1  ;;  %v5949_v28 = vcombine.high %v507_v60, %v515_v3 }
 0x281   : > { %v6700_v52 = vadd.f32 %v6699_v1, %v6698_v6  ;;  %3939 = vmatmul.mubr.bf16.gmra.mrb[236].mxu0 %v5914_v17  ;;  %v5947_v17 = vcombine.high %v506_v58, %v514_v30 }
 0x282   : > { %v8493_v59 = vadd.f32 %v6697_v34, %v3531_v38  ;;  %v3534_v56 = vadd.f32 %v6588_v49, %v8338_v39  ;;  %4100 = vmatmul.mubr.bf16.gmra.mrb[236].mxu1 %v5916_v10  ;;  %3946 = vmatprep.mubr.bf16.mxu0 %v5931_v35  ;;  %v523_v38 = vld [vmem:[%s7885_s8 + $0x738] sm:$0xff] }
 0x283   : > { %4107 = vmatprep.mubr.bf16.mxu1 %v5933_v61  ;;  %v531_v49 = vld [vmem:[%s7885_s8 + $0x778] sm:$0xff] }
 0x284   : > { %v8498_v16 = vadd.f32 %v6700_v52, %v3534_v56  ;;  %v6589_v29 = vpop.f32.mrb[132].mxu0  ;;  %v5946_v52 = vcombine.low %v506_v58, %v514_v30 }
 0x285   : > { %v6701_v32 = vpop.f32.mrb[132].mxu1  ;;  %v6590_v4 = vpop.f32.mrb[133].mxu0 }
 0x286   : > { %v6591_v14 = vadd.f32 %v6590_v4, %v6589_v29  ;;  %v6702_v62 = vpop.f32.mrb[133].mxu1  ;;  %v6592_v63 = vpop.f32.mrb[134].mxu0  ;;  %v5948_v4 = vcombine.low %v507_v60, %v515_v3  ;;  %v538_v60 = vld [vmem:[%s7885_s8 + $0x7b0] sm:$0xff] }
 0x287   : > { %v6703_v39 = vadd.f32 %v6702_v62, %v6701_v32  ;;  %v6704_v40 = vpop.f32.mrb[134].mxu1  ;;  %v6593_v27 = vpop.f32.mrb[135].mxu0  ;;  %v546_v3 = vld [vmem:[%s7885_s8 + $0x7f0] sm:$0xff] }
 0x288   : > { %v3539_v10 = vadd.f32 %v6591_v14, %v8343_v36  ;;  %v6594_v35 = vadd.f32 %v6593_v27, %v6592_v63  ;;  %v6705_v34 = vpop.f32.mrb[135].mxu1  ;;  %v5965_v63 = vcombine.high %v523_v38, %v531_v49 }
 0x289   : > { %v6706_v6 = vadd.f32 %v6705_v34, %v6704_v40  ;;  %3947 = vmatmul.mubr.bf16.gmra.mrb[240].mxu0 %v5930_v5  ;;  %v5963_v5 = vcombine.high %v522_v31, %v530_v7 }
 0x28a   : > { %v8503_v25 = vadd.f32 %v6703_v39, %v3539_v10  ;;  %v3542_v45 = vadd.f32 %v6594_v35, %v8348_v18  ;;  %4108 = vmatmul.mubr.bf16.gmra.mrb[240].mxu1 %v5932_v51  ;;  %3954 = vmatprep.mubr.bf16.mxu0 %v5947_v17  ;;  %v539_v10 = vld [vmem:[%s7885_s8 + $0x7b8] sm:$0xff] }
 0x28b   : > { %4115 = vmatprep.mubr.bf16.mxu1 %v5949_v28  ;;  %v547_v35 = vld [vmem:[%s7885_s8 + $0x7f8] sm:$0xff] }
 0x28c   : > { %v8508_v53 = vadd.f32 %v6706_v6, %v3542_v45  ;;  %v6595_v61 = vpop.f32.mrb[136].mxu0  ;;  %v5962_v6 = vcombine.low %v522_v31, %v530_v7 }
 0x28d   : > { %v6707_v1 = vpop.f32.mrb[136].mxu1  ;;  %v6596_v36 = vpop.f32.mrb[137].mxu0 }
 0x28e   : > { %v6597_v56 = vadd.f32 %v6596_v36, %v6595_v61  ;;  %v6708_v29 = vpop.f32.mrb[137].mxu1  ;;  %v6598_v32 = vpop.f32.mrb[138].mxu0  ;;  %v5964_v36 = vcombine.low %v523_v38, %v531_v49 }
 0x28f   : > { %v6709_v18 = vadd.f32 %v6708_v29, %v6707_v1  ;;  %v6710_v14 = vpop.f32.mrb[138].mxu1  ;;  %v6599_v62 = vpop.f32.mrb[139].mxu0 }
 0x290   : > { %v3547_v51 = vadd.f32 %v6597_v56, %v8353_v13  ;;  %v6600_v17 = vadd.f32 %v6599_v62, %v6598_v32  ;;  %v6711_v39 = vpop.f32.mrb[139].mxu1  ;;  %v5981_v32 = vcombine.high %v539_v10, %v547_v35 }
 0x291   : > { %v6712_v40 = vadd.f32 %v6711_v39, %v6710_v14  ;;  %3955 = vmatmul.mubr.bf16.gmra.mrb[244].mxu0 %v5946_v52  ;;  %v5979_v52 = vcombine.high %v538_v60, %v546_v3 }
 0x292   : > { %v8513_v58 = vadd.f32 %v6709_v18, %v3547_v51  ;;  %v3550_v30 = vadd.f32 %v6600_v17, %v8358_v8  ;;  %4116 = vmatmul.mubr.bf16.gmra.mrb[244].mxu1 %v5948_v4  ;;  %3962 = vmatprep.mubr.bf16.mxu0 %v5963_v5  ;;  %v5978_v51 = vcombine.low %v538_v60, %v546_v3 }
 0x293   : > { %4123 = vmatprep.mubr.bf16.mxu1 %v5965_v63 }
 0x294   : > { %v8518_v27 = vadd.f32 %v6712_v40, %v3550_v30  ;;  %v6601_v28 = vpop.f32.mrb[140].mxu0  ;;  %v5980_v40 = vcombine.low %v539_v10, %v547_v35 }
 0x295   : > { %v6713_v34 = vpop.f32.mrb[140].mxu1  ;;  %v6602_v13 = vpop.f32.mrb[141].mxu0 }
 0x296   : > { %v6603_v45 = vadd.f32 %v6602_v13, %v6601_v28  ;;  %v6714_v61 = vpop.f32.mrb[141].mxu1  ;;  %v6604_v1 = vpop.f32.mrb[142].mxu0 }
 0x297   : > { %v6715_v56 = vadd.f32 %v6714_v61, %v6713_v34  ;;  %v6716_v8 = vpop.f32.mrb[142].mxu1  ;;  %v6605_v29 = vpop.f32.mrb[143].mxu0 }
 0x298   : > { %v3555_v4 = vadd.f32 %v6603_v45, %v8363_v54  ;;  %v6606_v5 = vadd.f32 %v6605_v29, %v6604_v1  ;;  %v6717_v18 = vpop.f32.mrb[143].mxu1 }
 0x299   : > { %v6718_v14 = vadd.f32 %v6717_v18, %v6716_v8  ;;  %3963 = vmatmul.mubr.bf16.gmra.mrb[248].mxu0 %v5962_v6 }
 0x29a   : > { %v8523_v62 = vadd.f32 %v6715_v56, %v3555_v4  ;;  %v3558_v63 = vadd.f32 %v6606_v5, %v8368_v41  ;;  %4124 = vmatmul.mubr.bf16.gmra.mrb[248].mxu1 %v5964_v36  ;;  %3970 = vmatprep.mubr.bf16.mxu0 %v5979_v52 }
 0x29b   : > { %4131 = vmatprep.mubr.bf16.mxu1 %v5981_v32 }
 0x29c   : > { %v8526_v31 = vadd.f32 %v6718_v14, %v3558_v63  ;;  %v6607_v7 = vpop.f32.mrb[144].mxu0 }
 0x29d   : > { %v6719_v38 = vpop.f32.mrb[144].mxu1  ;;  %v6608_v49 = vpop.f32.mrb[145].mxu0 }
 0x29e   : > { %v6609_v17 = vadd.f32 %v6608_v49, %v6607_v7  ;;  %v6720_v39 = vpop.f32.mrb[145].mxu1  ;;  %v6610_v54 = vpop.f32.mrb[146].mxu0 }
 0x29f   : > { %v6721_v30 = vadd.f32 %v6720_v39, %v6719_v38  ;;  %v6722_v28 = vpop.f32.mrb[146].mxu1  ;;  %v6611_v34 = vpop.f32.mrb[147].mxu0 }
 0x2a0   : > { %v3563_v13 = vadd.f32 %v6609_v17, %v8373_v43  ;;  %v6612_v6 = vadd.f32 %v6611_v34, %v6610_v54  ;;  %v6723_v41 = vpop.f32.mrb[147].mxu1 }
 0x2a1   : > { %v6724_v45 = vadd.f32 %v6723_v41, %v6722_v28  ;;  %3971 = vmatmul.mubr.bf16.gmra.mrb[252].mxu0 %v5978_v51 }
 0x2a2   : > { %v8529_v61 = vadd.f32 %v6721_v30, %v3563_v13  ;;  %v3566_v1 = vadd.f32 %v6612_v6, %v8378_v37  ;;  %4132 = vmatmul.mubr.bf16.gmra.mrb[252].mxu1 %v5980_v40 }
 0x2a4   : > { %v8532_v36 = vadd.f32 %v6724_v45, %v3566_v1  ;;  %v6613_v60 = vpop.f32.mrb[148].mxu0 }
 0x2a5   : > { %v6725_v3 = vpop.f32.mrb[148].mxu1  ;;  %v6614_v52 = vpop.f32.mrb[149].mxu0 }
 0x2a6   : > { %v6615_v10 = vadd.f32 %v6614_v52, %v6613_v60  ;;  %v6726_v35 = vpop.f32.mrb[149].mxu1  ;;  %v6616_v56 = vpop.f32.mrb[150].mxu0 }
 0x2a7   : > { %v6727_v8 = vadd.f32 %v6726_v35, %v6725_v3  ;;  %v6728_v29 = vpop.f32.mrb[150].mxu1  ;;  %v6617_v43 = vpop.f32.mrb[151].mxu0 }
 0x2a8   : > { %v3571_v32 = vadd.f32 %v6615_v10, %v8383_v23  ;;  %v6618_v4 = vadd.f32 %v6617_v43, %v6616_v56  ;;  %v6729_v5 = vpop.f32.mrb[151].mxu1 }
 0x2a9   : > { %v6730_v18 = vadd.f32 %v6729_v5, %v6728_v29 }
 0x2aa   : > { %v8535_v14 = vadd.f32 %v6727_v8, %v3571_v32  ;;  %v3574_v37 = vadd.f32 %v6618_v4, %v8388_v21 }
 0x2ac   : > { %v8538_v63 = vadd.f32 %v6730_v18, %v3574_v37  ;;  %v6619_v7 = vpop.f32.mrb[152].mxu0 }
 0x2ad   : > { %v6731_v38 = vpop.f32.mrb[152].mxu1  ;;  %v6620_v49 = vpop.f32.mrb[153].mxu0 }
 0x2ae   : > { %v6621_v51 = vadd.f32 %v6620_v49, %v6619_v7  ;;  %v6732_v17 = vpop.f32.mrb[153].mxu1  ;;  %v6622_v39 = vpop.f32.mrb[154].mxu0 }
 0x2af   : > { %v6733_v54 = vadd.f32 %v6732_v17, %v6731_v38  ;;  %v6734_v40 = vpop.f32.mrb[154].mxu1  ;;  %v6623_v30 = vpop.f32.mrb[155].mxu0 }
 0x2b0   : > { %v3579_v23 = vadd.f32 %v6621_v51, %v8393_v12  ;;  %v6624_v28 = vadd.f32 %v6623_v30, %v6622_v39  ;;  %v6735_v34 = vpop.f32.mrb[155].mxu1 }
 0x2b1   : > { %v6736_v13 = vadd.f32 %v6735_v34, %v6734_v40 }
 0x2b2   : > { %v8541_v6 = vadd.f32 %v6733_v54, %v3579_v23  ;;  %v3582_v21 = vadd.f32 %v6624_v28, %v8398_v9 }
 0x2b4   : > { %v8544_v41 = vadd.f32 %v6736_v13, %v3582_v21  ;;  %v6625_v45 = vpop.f32.mrb[156].mxu0 }
 0x2b5   : > { %v6737_v1 = vpop.f32.mrb[156].mxu1  ;;  %v6626_v60 = vpop.f32.mrb[157].mxu0 }
 0x2b6   : > { %v6627_v3 = vadd.f32 %v6626_v60, %v6625_v45  ;;  %v6738_v52 = vpop.f32.mrb[157].mxu1  ;;  %v6628_v10 = vpop.f32.mrb[158].mxu0 }
 0x2b7   : > { %v6739_v35 = vadd.f32 %v6738_v52, %v6737_v1  ;;  %v6740_v56 = vpop.f32.mrb[158].mxu1  ;;  %v6629_v8 = vpop.f32.mrb[159].mxu0 }
 0x2b8   : > { %v3587_v12 = vadd.f32 %v6627_v3, %v8403_v55  ;;  %v6630_v29 = vadd.f32 %v6629_v8, %v6628_v10  ;;  %v6741_v43 = vpop.f32.mrb[159].mxu1 }
 0x2b9   : > { %v6742_v32 = vadd.f32 %v6741_v43, %v6740_v56 }
 0x2ba   : > { %v8547_v4 = vadd.f32 %v6739_v35, %v3587_v12  ;;  %v3590_v9 = vadd.f32 %v6630_v29, %v8408_v57 }
 0x2bc   : > { %v8550_v5 = vadd.f32 %v6742_v32, %v3590_v9  ;;  %v6631_v18 = vpop.f32.mrb[160].mxu0 }
 0x2bd   : > { %v6743_v37 = vpop.f32.mrb[160].mxu1  ;;  %v6632_v7 = vpop.f32.mrb[161].mxu0 }
 0x2be   : > { %v6633_v38 = vadd.f32 %v6632_v7, %v6631_v18  ;;  %v6744_v49 = vpop.f32.mrb[161].mxu1  ;;  %v6634_v51 = vpop.f32.mrb[162].mxu0 }
 0x2bf   : > { %v6745_v17 = vadd.f32 %v6744_v49, %v6743_v37  ;;  %v6746_v39 = vpop.f32.mrb[162].mxu1  ;;  %v6635_v54 = vpop.f32.mrb[163].mxu0 }
 0x2c0   : > { %v3595_v55 = vadd.f32 %v6633_v38, %v8413_v20  ;;  %v6636_v40 = vadd.f32 %v6635_v54, %v6634_v51  ;;  %v6747_v30 = vpop.f32.mrb[163].mxu1 }
 0x2c1   : > { %v6748_v23 = vadd.f32 %v6747_v30, %v6746_v39 }
 0x2c2   : > { %v8553_v28 = vadd.f32 %v6745_v17, %v3595_v55  ;;  %v3598_v57 = vadd.f32 %v6636_v40, %v8418_v46 }
 0x2c4   : > { %v8556_v34 = vadd.f32 %v6748_v23, %v3598_v57  ;;  %v6637_v13 = vpop.f32.mrb[164].mxu0 }
 0x2c5   : > { %v6749_v21 = vpop.f32.mrb[164].mxu1  ;;  %v6638_v45 = vpop.f32.mrb[165].mxu0 }
 0x2c6   : > { %v6639_v1 = vadd.f32 %v6638_v45, %v6637_v13  ;;  %v6750_v60 = vpop.f32.mrb[165].mxu1  ;;  %v6640_v3 = vpop.f32.mrb[166].mxu0 }
 0x2c7   : > { %v6751_v52 = vadd.f32 %v6750_v60, %v6749_v21  ;;  %v6752_v10 = vpop.f32.mrb[166].mxu1  ;;  %v6641_v35 = vpop.f32.mrb[167].mxu0 }
 0x2c8   : > { %v3603_v20 = vadd.f32 %v6639_v1, %v8423_v42  ;;  %v6642_v56 = vadd.f32 %v6641_v35, %v6640_v3  ;;  %v6753_v8 = vpop.f32.mrb[167].mxu1 }
 0x2c9   : > { %v6754_v12 = vadd.f32 %v6753_v8, %v6752_v10 }
 0x2ca   : > { %v8559_v29 = vadd.f32 %v6751_v52, %v3603_v20  ;;  %v3606_v46 = vadd.f32 %v6642_v56, %v8428_v33 }
 0x2cc   : > { %v8562_v43 = vadd.f32 %v6754_v12, %v3606_v46  ;;  %v6643_v32 = vpop.f32.mrb[168].mxu0 }
 0x2cd   : > { %v6755_v9 = vpop.f32.mrb[168].mxu1  ;;  %v6644_v18 = vpop.f32.mrb[169].mxu0 }
 0x2ce   : > { %v6645_v37 = vadd.f32 %v6644_v18, %v6643_v32  ;;  %v6756_v7 = vpop.f32.mrb[169].mxu1  ;;  %v6646_v38 = vpop.f32.mrb[170].mxu0 }
 0x2cf   : > { %v6757_v49 = vadd.f32 %v6756_v7, %v6755_v9  ;;  %v6758_v51 = vpop.f32.mrb[170].mxu1  ;;  %v6647_v17 = vpop.f32.mrb[171].mxu0 }
 0x2d0   : > { %v3611_v42 = vadd.f32 %v6645_v37, %v8433_v0  ;;  %v6648_v39 = vadd.f32 %v6647_v17, %v6646_v38  ;;  %v6759_v54 = vpop.f32.mrb[171].mxu1 }
 0x2d1   : > { %v6760_v55 = vadd.f32 %v6759_v54, %v6758_v51 }
 0x2d2   : > { %v8565_v40 = vadd.f32 %v6757_v49, %v3611_v42  ;;  %v3614_v33 = vadd.f32 %v6648_v39, %v8438_v15 }
 0x2d4   : > { %v8568_v30 = vadd.f32 %v6760_v55, %v3614_v33  ;;  %v6649_v23 = vpop.f32.mrb[172].mxu0 }
 0x2d5   : > { %v6761_v57 = vpop.f32.mrb[172].mxu1  ;;  %v6650_v13 = vpop.f32.mrb[173].mxu0 }
 0x2d6   : > { %v6651_v21 = vadd.f32 %v6650_v13, %v6649_v23  ;;  %v6762_v45 = vpop.f32.mrb[173].mxu1  ;;  %v6652_v1 = vpop.f32.mrb[174].mxu0 }
 0x2d7   : > { %v6763_v60 = vadd.f32 %v6762_v45, %v6761_v57  ;;  %v6764_v3 = vpop.f32.mrb[174].mxu1  ;;  %v6653_v52 = vpop.f32.mrb[175].mxu0 }
 0x2d8   : > { %v3619_v0 = vadd.f32 %v6651_v21, %v8443_v24  ;;  %v6654_v10 = vadd.f32 %v6653_v52, %v6652_v1  ;;  %v6765_v35 = vpop.f32.mrb[175].mxu1 }
 0x2d9   : > { %v6766_v20 = vadd.f32 %v6765_v35, %v6764_v3 }
 0x2da   : > { %v8571_v56 = vadd.f32 %v6763_v60, %v3619_v0  ;;  %v3622_v15 = vadd.f32 %v6654_v10, %v8448_v22 }
 0x2dc   : > { %v8574_v8 = vadd.f32 %v6766_v20, %v3622_v15  ;;  %v6655_v12 = vpop.f32.mrb[176].mxu0 }
 0x2dd   : > { %v6767_v46 = vpop.f32.mrb[176].mxu1  ;;  %v6656_v32 = vpop.f32.mrb[177].mxu0 }
 0x2de   : > { %v6657_v9 = vadd.f32 %v6656_v32, %v6655_v12  ;;  %v6768_v18 = vpop.f32.mrb[177].mxu1  ;;  %v6658_v37 = vpop.f32.mrb[178].mxu0 }
 0x2df   : > { %v6769_v7 = vadd.f32 %v6768_v18, %v6767_v46  ;;  %v6770_v38 = vpop.f32.mrb[178].mxu1  ;;  %v6659_v49 = vpop.f32.mrb[179].mxu0 }
 0x2e0   : > { %v3627_v24 = vadd.f32 %v6657_v9, %v8453_v48  ;;  %v6660_v51 = vadd.f32 %v6659_v49, %v6658_v37  ;;  %v6771_v17 = vpop.f32.mrb[179].mxu1 }
 0x2e1   : > { %v6772_v42 = vadd.f32 %v6771_v17, %v6770_v38 }
 0x2e2   : > { %v8577_v39 = vadd.f32 %v6769_v7, %v3627_v24  ;;  %v3630_v22 = vadd.f32 %v6660_v51, %v8458_v44 }
 0x2e4   : > { %v8580_v54 = vadd.f32 %v6772_v42, %v3630_v22  ;;  %v6661_v55 = vpop.f32.mrb[180].mxu0 }
 0x2e5   : > { %v6773_v33 = vpop.f32.mrb[180].mxu1  ;;  %v6662_v23 = vpop.f32.mrb[181].mxu0 }
 0x2e6   : > { %v6663_v57 = vadd.f32 %v6662_v23, %v6661_v55  ;;  %v6774_v13 = vpop.f32.mrb[181].mxu1  ;;  %v6664_v21 = vpop.f32.mrb[182].mxu0 }
 0x2e7   : > { %v6775_v45 = vadd.f32 %v6774_v13, %v6773_v33  ;;  %v6776_v1 = vpop.f32.mrb[182].mxu1  ;;  %v6665_v60 = vpop.f32.mrb[183].mxu0 }
 0x2e8   : > { %v3635_v48 = vadd.f32 %v6663_v57, %v8463_v11  ;;  %v6666_v3 = vadd.f32 %v6665_v60, %v6664_v21  ;;  %v6777_v52 = vpop.f32.mrb[183].mxu1 }
 0x2e9   : > { %v6778_v0 = vadd.f32 %v6777_v52, %v6776_v1 }
 0x2ea   : > { %v8583_v10 = vadd.f32 %v6775_v45, %v3635_v48  ;;  %v3638_v44 = vadd.f32 %v6666_v3, %v8468_v2 }
 0x2ec   : > { %v8586_v35 = vadd.f32 %v6778_v0, %v3638_v44  ;;  %v6667_v20 = vpop.f32.mrb[184].mxu0 }
 0x2ed   : > { %v6779_v15 = vpop.f32.mrb[184].mxu1  ;;  %v6668_v12 = vpop.f32.mrb[185].mxu0 }
 0x2ee   : > { %v6669_v46 = vadd.f32 %v6668_v12, %v6667_v20  ;;  %v6780_v32 = vpop.f32.mrb[185].mxu1  ;;  %v6670_v9 = vpop.f32.mrb[186].mxu0 }
 0x2ef   : > { %v6781_v18 = vadd.f32 %v6780_v32, %v6779_v15  ;;  %v6782_v37 = vpop.f32.mrb[186].mxu1  ;;  %v6671_v7 = vpop.f32.mrb[187].mxu0 }
 0x2f0   : > { %v3643_v11 = vadd.f32 %v6669_v46, %v8473_v47  ;;  %v6672_v38 = vadd.f32 %v6671_v7, %v6670_v9  ;;  %v6783_v49 = vpop.f32.mrb[187].mxu1 }
 0x2f1   : > { %v6784_v24 = vadd.f32 %v6783_v49, %v6782_v37 }
 0x2f2   : > { %v8589_v51 = vadd.f32 %v6781_v18, %v3643_v11  ;;  %v3646_v2 = vadd.f32 %v6672_v38, %v8478_v26  ;;  %v260_v11 = vld [vmem:[#allocation2] sm:$0xff] }
 0x2f4   : > { %v8592_v17 = vadd.f32 %v6784_v24, %v3646_v2  ;;  %v6673_v42 = vpop.f32.mrb[188].mxu0  ;;  %v261_v24 = vld [vmem:[#allocation2 + $0x8] sm:$0xff] }
 0x2f5   : > { %v6785_v22 = vpop.f32.mrb[188].mxu1  ;;  %v6674_v55 = vpop.f32.mrb[189].mxu0 }
 0x2f6   : > { %v6675_v33 = vadd.f32 %v6674_v55, %v6673_v42  ;;  %v6786_v23 = vpop.f32.mrb[189].mxu1  ;;  %v6676_v57 = vpop.f32.mrb[190].mxu0 }
 0x2f7   : > { %v6787_v13 = vadd.f32 %v6786_v23, %v6785_v22  ;;  %v6788_v21 = vpop.f32.mrb[190].mxu1  ;;  %v6677_v45 = vpop.f32.mrb[191].mxu0 }
 0x2f8   : > { %v3651_v47 = vadd.f32 %v6675_v33, %v8483_v19  ;;  %v6678_v1 = vadd.f32 %v6677_v45, %v6676_v57  ;;  %v6789_v60 = vpop.f32.mrb[191].mxu1 }
 0x2f9   : > { %v6790_v48 = vadd.f32 %v6789_v60, %v6788_v21 }
 0x2fa   : > { %v8595_v3 = vadd.f32 %v6787_v13, %v3651_v47  ;;  %v3654_v26 = vadd.f32 %v6678_v1, %v8488_v50 }
 0x2fc   : > { %v8598_v52 = vadd.f32 %v6790_v48, %v3654_v26  ;;  %v6807_v0 = vpop.f32.mrb[192].mxu0 }
 0x2fd   : > { %v6919_v44 = vpop.f32.mrb[192].mxu1  ;;  %v6808_v20 = vpop.f32.mrb[193].mxu0 }
 0x2fe   : > { %v6809_v15 = vadd.f32 %v6808_v20, %v6807_v0  ;;  %v6920_v12 = vpop.f32.mrb[193].mxu1  ;;  %v6810_v46 = vpop.f32.mrb[194].mxu0  ;;  %v263_v20 = vld [vmem:[#allocation2 + $0x18] sm:$0xff] }
 0x2ff   : > { %v6921_v32 = vadd.f32 %v6920_v12, %v6919_v44  ;;  %v6922_v9 = vpop.f32.mrb[194].mxu1  ;;  %v6811_v18 = vpop.f32.mrb[195].mxu0 }
 0x300   : > { %v3853_v19 = vadd.f32 %v6809_v15, %v8493_v59  ;;  %v6812_v37 = vadd.f32 %v6811_v18, %v6810_v46  ;;  %v6923_v7 = vpop.f32.mrb[195].mxu1 }
 0x301   : > { %v6924_v38 = vadd.f32 %v6923_v7, %v6922_v9 }
 0x302   : > { %v4014_v49 = vadd.f32 %v6921_v32, %v3853_v19  ;;  %v3856_v50 = vadd.f32 %v6812_v37, %v8498_v16  ;;  %v262_v16 = vld [vmem:[#allocation2 + $0x10] sm:$0xff] }
 0x304   : > { %v4140_v2 = vadd.f32 %v4014_v49, %v260_v11  ;;  %v4017_v42 = vadd.f32 %v6924_v38, %v3856_v50  ;;  %v6813_v22 = vpop.f32.mrb[196].mxu0 }
 0x305   : > { %v6925_v55 = vpop.f32.mrb[196].mxu1  ;;  %v6814_v33 = vpop.f32.mrb[197].mxu0 }
 0x306   : > { %4172 = vst [vmem:[#allocation2] sm:$0xff] %v4140_v2  ;;  %v4141_v23 = vadd.f32 %v4017_v42, %v261_v24  ;;  %v6815_v57 = vadd.f32 %v6814_v33, %v6813_v22  ;;  %v6926_v13 = vpop.f32.mrb[197].mxu1  ;;  %v6816_v21 = vpop.f32.mrb[198].mxu0 }
 0x307   : > { %v6927_v45 = vadd.f32 %v6926_v13, %v6925_v55  ;;  %v6928_v59 = vpop.f32.mrb[198].mxu1  ;;  %v6817_v47 = vpop.f32.mrb[199].mxu0  ;;  %v265_v55 = vld [vmem:[#allocation2 + $0x28] sm:$0xff] }
 0x308   : > { %4173 = vst [vmem:[#allocation2 + $0x8] sm:$0xff] %v4141_v23  ;;  %v3861_v1 = vadd.f32 %v6815_v57, %v8503_v25  ;;  %v6818_v60 = vadd.f32 %v6817_v47, %v6816_v21  ;;  %v6929_v48 = vpop.f32.mrb[199].mxu1 }
 0x309   : > { %v6930_v26 = vadd.f32 %v6929_v48, %v6928_v59 }
 0x30a   : > { %v4022_v0 = vadd.f32 %v6927_v45, %v3861_v1  ;;  %v3864_v44 = vadd.f32 %v6818_v60, %v8508_v53  ;;  %v264_v53 = vld [vmem:[#allocation2 + $0x20] sm:$0xff] }
 0x30c   : > { %v4142_v15 = vadd.f32 %v4022_v0, %v262_v16  ;;  %v4025_v12 = vadd.f32 %v6930_v26, %v3864_v44  ;;  %v6819_v46 = vpop.f32.mrb[200].mxu0 }
 0x30d   : > { %v6931_v32 = vpop.f32.mrb[200].mxu1  ;;  %v6820_v9 = vpop.f32.mrb[201].mxu0 }
 0x30e   : > { %4174 = vst [vmem:[#allocation2 + $0x10] sm:$0xff] %v4142_v15  ;;  %v4143_v18 = vadd.f32 %v4025_v12, %v263_v20  ;;  %v6821_v19 = vadd.f32 %v6820_v9, %v6819_v46  ;;  %v6932_v37 = vpop.f32.mrb[201].mxu1  ;;  %v6822_v7 = vpop.f32.mrb[202].mxu0  ;;  %v267_v12 = vld [vmem:[#allocation2 + $0x38] sm:$0xff] }
 0x30f   : > { %v6933_v11 = vadd.f32 %v6932_v37, %v6931_v32  ;;  %v6934_v25 = vpop.f32.mrb[202].mxu1  ;;  %v6823_v38 = vpop.f32.mrb[203].mxu0 }
 0x310   : > { %4175 = vst [vmem:[#allocation2 + $0x18] sm:$0xff] %v4143_v18  ;;  %v3869_v49 = vadd.f32 %v6821_v19, %v8513_v58  ;;  %v6824_v50 = vadd.f32 %v6823_v38, %v6822_v7  ;;  %v6935_v24 = vpop.f32.mrb[203].mxu1 }
 0x311   : > { %v6936_v2 = vadd.f32 %v6935_v24, %v6934_v25 }
 0x312   : > { %v4030_v42 = vadd.f32 %v6933_v11, %v3869_v49  ;;  %v3872_v22 = vadd.f32 %v6824_v50, %v8518_v27  ;;  %v266_v27 = vld [vmem:[#allocation2 + $0x30] sm:$0xff] }
 0x314   : > { %v4144_v33 = vadd.f32 %v4030_v42, %v264_v53  ;;  %v4033_v23 = vadd.f32 %v6936_v2, %v3872_v22  ;;  %v6825_v57 = vpop.f32.mrb[204].mxu0 }
 0x315   : > { %v6937_v13 = vpop.f32.mrb[204].mxu1  ;;  %v6826_v21 = vpop.f32.mrb[205].mxu0 }
 0x316   : > { %4176 = vst [vmem:[#allocation2 + $0x20] sm:$0xff] %v4144_v33  ;;  %v4145_v45 = vadd.f32 %v4033_v23, %v265_v55  ;;  %v6827_v59 = vadd.f32 %v6826_v21, %v6825_v57  ;;  %v6938_v47 = vpop.f32.mrb[205].mxu1  ;;  %v6828_v1 = vpop.f32.mrb[206].mxu0  ;;  %v269_v55 = vld [vmem:[#allocation2 + $0x48] sm:$0xff] }
 0x317   : > { %v6939_v60 = vadd.f32 %v6938_v47, %v6937_v13  ;;  %v6940_v58 = vpop.f32.mrb[206].mxu1  ;;  %v6829_v48 = vpop.f32.mrb[207].mxu0 }
 0x318   : > { %4177 = vst [vmem:[#allocation2 + $0x28] sm:$0xff] %v4145_v45  ;;  %v3877_v16 = vadd.f32 %v6827_v59, %v8523_v62  ;;  %v6830_v26 = vadd.f32 %v6829_v48, %v6828_v1  ;;  %v6941_v0 = vpop.f32.mrb[207].mxu1 }
 0x319   : > { %v6942_v44 = vadd.f32 %v6941_v0, %v6940_v58 }
 0x31a   : > { %v4038_v20 = vadd.f32 %v6939_v60, %v3877_v16  ;;  %v3880_v15 = vadd.f32 %v6830_v26, %v8526_v31  ;;  %v268_v31 = vld [vmem:[#allocation2 + $0x40] sm:$0xff] }
 0x31c   : > { %v4146_v46 = vadd.f32 %v4038_v20, %v266_v27  ;;  %v4041_v32 = vadd.f32 %v6942_v44, %v3880_v15  ;;  %v6831_v9 = vpop.f32.mrb[208].mxu0  ;;  %v271_v20 = vld [vmem:[#allocation2 + $0x58] sm:$0xff] }
 0x31d   : > { %v6943_v18 = vpop.f32.mrb[208].mxu1  ;;  %v6832_v19 = vpop.f32.mrb[209].mxu0 }
 0x31e   : > { %4178 = vst [vmem:[#allocation2 + $0x30] sm:$0xff] %v4146_v46  ;;  %v4147_v37 = vadd.f32 %v4041_v32, %v267_v12  ;;  %v6833_v7 = vadd.f32 %v6832_v19, %v6831_v9  ;;  %v6944_v11 = vpop.f32.mrb[209].mxu1  ;;  %v6834_v25 = vpop.f32.mrb[210].mxu0 }
 0x31f   : > { %v6945_v38 = vadd.f32 %v6944_v11, %v6943_v18  ;;  %v6946_v62 = vpop.f32.mrb[210].mxu1  ;;  %v6835_v49 = vpop.f32.mrb[211].mxu0 }
 0x320   : > { %4179 = vst [vmem:[#allocation2 + $0x38] sm:$0xff] %v4147_v37  ;;  %v3885_v50 = vadd.f32 %v6833_v7, %v8529_v61  ;;  %v6836_v24 = vadd.f32 %v6835_v49, %v6834_v25  ;;  %v6947_v53 = vpop.f32.mrb[211].mxu1 }
 0x321   : > { %v6948_v2 = vadd.f32 %v6947_v53, %v6946_v62 }
 0x322   : > { %v4046_v42 = vadd.f32 %v6945_v38, %v3885_v50  ;;  %v3888_v22 = vadd.f32 %v6836_v24, %v8532_v36  ;;  %v270_v36 = vld [vmem:[#allocation2 + $0x50] sm:$0xff] }
 0x324   : > { %v4148_v33 = vadd.f32 %v4046_v42, %v268_v31  ;;  %v4049_v23 = vadd.f32 %v6948_v2, %v3888_v22  ;;  %v6837_v57 = vpop.f32.mrb[212].mxu0  ;;  %v273_v31 = vld [vmem:[#allocation2 + $0x68] sm:$0xff] }
 0x325   : > { %v6949_v13 = vpop.f32.mrb[212].mxu1  ;;  %v6838_v21 = vpop.f32.mrb[213].mxu0 }
 0x326   : > { %4180 = vst [vmem:[#allocation2 + $0x40] sm:$0xff] %v4148_v33  ;;  %v4149_v45 = vadd.f32 %v4049_v23, %v269_v55  ;;  %v6839_v59 = vadd.f32 %v6838_v21, %v6837_v57  ;;  %v6950_v47 = vpop.f32.mrb[213].mxu1  ;;  %v6840_v1 = vpop.f32.mrb[214].mxu0 }
 0x327   : > { %v6951_v60 = vadd.f32 %v6950_v47, %v6949_v13  ;;  %v6952_v61 = vpop.f32.mrb[214].mxu1  ;;  %v6841_v58 = vpop.f32.mrb[215].mxu0 }
 0x328   : > { %4181 = vst [vmem:[#allocation2 + $0x48] sm:$0xff] %v4149_v45  ;;  %v3893_v48 = vadd.f32 %v6839_v59, %v8535_v14  ;;  %v6842_v16 = vadd.f32 %v6841_v58, %v6840_v1  ;;  %v6953_v26 = vpop.f32.mrb[215].mxu1 }
 0x329   : > { %v6954_v0 = vadd.f32 %v6953_v26, %v6952_v61 }
 0x32a   : > { %v4054_v27 = vadd.f32 %v6951_v60, %v3893_v48  ;;  %v3896_v44 = vadd.f32 %v6842_v16, %v8538_v63  ;;  %v272_v63 = vld [vmem:[#allocation2 + $0x60] sm:$0xff]  ;;  %v275_v16 = vld [vmem:[#allocation2 + $0x78] sm:$0xff] }
 0x32c   : > { %v4150_v15 = vadd.f32 %v4054_v27, %v270_v36  ;;  %v4057_v12 = vadd.f32 %v6954_v0, %v3896_v44  ;;  %v6843_v46 = vpop.f32.mrb[216].mxu0 }
 0x32d   : > { %v6955_v32 = vpop.f32.mrb[216].mxu1  ;;  %v6844_v9 = vpop.f32.mrb[217].mxu0 }
 0x32e   : > { %4182 = vst [vmem:[#allocation2 + $0x50] sm:$0xff] %v4150_v15  ;;  %v4151_v18 = vadd.f32 %v4057_v12, %v271_v20  ;;  %v6845_v19 = vadd.f32 %v6844_v9, %v6843_v46  ;;  %v6956_v37 = vpop.f32.mrb[217].mxu1  ;;  %v6846_v7 = vpop.f32.mrb[218].mxu0 }
 0x32f   : > { %v6957_v11 = vadd.f32 %v6956_v37, %v6955_v32  ;;  %v6958_v14 = vpop.f32.mrb[218].mxu1  ;;  %v6847_v25 = vpop.f32.mrb[219].mxu0 }
 0x330   : > { %4183 = vst [vmem:[#allocation2 + $0x58] sm:$0xff] %v4151_v18  ;;  %v3901_v38 = vadd.f32 %v6845_v19, %v8541_v6  ;;  %v6848_v62 = vadd.f32 %v6847_v25, %v6846_v7  ;;  %v6959_v49 = vpop.f32.mrb[219].mxu1  ;;  %v277_v25 = vld [vmem:[#allocation2 + $0x88] sm:$0xff] }
 0x331   : > { %v6960_v50 = vadd.f32 %v6959_v49, %v6958_v14 }
 0x332   : > { %v4062_v24 = vadd.f32 %v6957_v11, %v3901_v38  ;;  %v3904_v53 = vadd.f32 %v6848_v62, %v8544_v41  ;;  %v274_v41 = vld [vmem:[#allocation2 + $0x70] sm:$0xff] }
 0x334   : > { %v4152_v2 = vadd.f32 %v4062_v24, %v272_v63  ;;  %v4065_v42 = vadd.f32 %v6960_v50, %v3904_v53  ;;  %v6849_v22 = vpop.f32.mrb[220].mxu0 }
 0x335   : > { %v6961_v55 = vpop.f32.mrb[220].mxu1  ;;  %v6850_v33 = vpop.f32.mrb[221].mxu0 }
 0x336   : > { %4184 = vst [vmem:[#allocation2 + $0x60] sm:$0xff] %v4152_v2  ;;  %v4153_v23 = vadd.f32 %v4065_v42, %v273_v31  ;;  %v6851_v57 = vadd.f32 %v6850_v33, %v6849_v22  ;;  %v6962_v13 = vpop.f32.mrb[221].mxu1  ;;  %v6852_v21 = vpop.f32.mrb[222].mxu0 }
 0x337   : > { %v6963_v45 = vadd.f32 %v6962_v13, %v6961_v55  ;;  %v6964_v6 = vpop.f32.mrb[222].mxu1  ;;  %v6853_v59 = vpop.f32.mrb[223].mxu0 }
 0x338   : > { %4185 = vst [vmem:[#allocation2 + $0x68] sm:$0xff] %v4153_v23  ;;  %v3909_v47 = vadd.f32 %v6851_v57, %v8547_v4  ;;  %v6854_v1 = vadd.f32 %v6853_v59, %v6852_v21  ;;  %v6965_v60 = vpop.f32.mrb[223].mxu1 }
 0x339   : > { %v6966_v61 = vadd.f32 %v6965_v60, %v6964_v6 }
 0x33a   : > { %v4070_v58 = vadd.f32 %v6963_v45, %v3909_v47  ;;  %v3912_v48 = vadd.f32 %v6854_v1, %v8550_v5  ;;  %v276_v5 = vld [vmem:[#allocation2 + $0x80] sm:$0xff]  ;;  %v279_v45 = vld [vmem:[#allocation2 + $0x98] sm:$0xff] }
 0x33c   : > { %v4154_v26 = vadd.f32 %v4070_v58, %v274_v41  ;;  %v4073_v36 = vadd.f32 %v6966_v61, %v3912_v48  ;;  %v6855_v0 = vpop.f32.mrb[224].mxu0 }
 0x33d   : > { %v6967_v27 = vpop.f32.mrb[224].mxu1  ;;  %v6856_v44 = vpop.f32.mrb[225].mxu0 }
 0x33e   : > { %4186 = vst [vmem:[#allocation2 + $0x70] sm:$0xff] %v4154_v26  ;;  %v4155_v20 = vadd.f32 %v4073_v36, %v275_v16  ;;  %v6857_v15 = vadd.f32 %v6856_v44, %v6855_v0  ;;  %v6968_v12 = vpop.f32.mrb[225].mxu1  ;;  %v6858_v46 = vpop.f32.mrb[226].mxu0 }
 0x33f   : > { %v6969_v32 = vadd.f32 %v6968_v12, %v6967_v27  ;;  %v6970_v4 = vpop.f32.mrb[226].mxu1  ;;  %v6859_v9 = vpop.f32.mrb[227].mxu0  ;;  %v281_v12 = vld [vmem:[#allocation2 + $0xa8] sm:$0xff] }
 0x340   : > { %4187 = vst [vmem:[#allocation2 + $0x78] sm:$0xff] %v4155_v20  ;;  %v3917_v18 = vadd.f32 %v6857_v15, %v8553_v28  ;;  %v6860_v19 = vadd.f32 %v6859_v9, %v6858_v46  ;;  %v6971_v37 = vpop.f32.mrb[227].mxu1 }
 0x341   : > { %v6972_v7 = vadd.f32 %v6971_v37, %v6970_v4 }
 0x342   : > { %v4078_v11 = vadd.f32 %v6969_v32, %v3917_v18  ;;  %v3920_v14 = vadd.f32 %v6860_v19, %v8556_v34  ;;  %v278_v34 = vld [vmem:[#allocation2 + $0x90] sm:$0xff] }
 0x344   : > { %v4156_v38 = vadd.f32 %v4078_v11, %v276_v5  ;;  %v4081_v62 = vadd.f32 %v6972_v7, %v3920_v14  ;;  %v6861_v49 = vpop.f32.mrb[228].mxu0 }
 0x345   : > { %v6973_v63 = vpop.f32.mrb[228].mxu1  ;;  %v6862_v50 = vpop.f32.mrb[229].mxu0 }
 0x346   : > { %4188 = vst [vmem:[#allocation2 + $0x80] sm:$0xff] %v4156_v38  ;;  %v4157_v24 = vadd.f32 %v4081_v62, %v277_v25  ;;  %v6863_v53 = vadd.f32 %v6862_v50, %v6861_v49  ;;  %v6974_v31 = vpop.f32.mrb[229].mxu1  ;;  %v6864_v2 = vpop.f32.mrb[230].mxu0 }
 0x347   : > { %v6975_v42 = vadd.f32 %v6974_v31, %v6973_v63  ;;  %v6976_v28 = vpop.f32.mrb[230].mxu1  ;;  %v6865_v22 = vpop.f32.mrb[231].mxu0 }
 0x348   : > { %4189 = vst [vmem:[#allocation2 + $0x88] sm:$0xff] %v4157_v24  ;;  %v3925_v55 = vadd.f32 %v6863_v53, %v8559_v29  ;;  %v6866_v33 = vadd.f32 %v6865_v22, %v6864_v2  ;;  %v6977_v23 = vpop.f32.mrb[231].mxu1  ;;  %v283_v24 = vld [vmem:[#allocation2 + $0xb8] sm:$0xff] }
 0x349   : > { %v6978_v57 = vadd.f32 %v6977_v23, %v6976_v28 }
 0x34a   : > { %v4086_v13 = vadd.f32 %v6975_v42, %v3925_v55  ;;  %v3928_v21 = vadd.f32 %v6866_v33, %v8562_v43  ;;  %v280_v43 = vld [vmem:[#allocation2 + $0xa0] sm:$0xff] }
 0x34c   : > { %v4158_v6 = vadd.f32 %v4086_v13, %v278_v34  ;;  %v4089_v59 = vadd.f32 %v6978_v57, %v3928_v21  ;;  %v6867_v47 = vpop.f32.mrb[232].mxu0 }
 0x34d   : > { %v6979_v1 = vpop.f32.mrb[232].mxu1  ;;  %v6868_v60 = vpop.f32.mrb[233].mxu0 }
 0x34e   : > { %4190 = vst [vmem:[#allocation2 + $0x90] sm:$0xff] %v4158_v6  ;;  %v4159_v41 = vadd.f32 %v4089_v59, %v279_v45  ;;  %v6869_v61 = vadd.f32 %v6868_v60, %v6867_v47  ;;  %v6980_v58 = vpop.f32.mrb[233].mxu1  ;;  %v6870_v48 = vpop.f32.mrb[234].mxu0 }
 0x34f   : > { %v6981_v16 = vadd.f32 %v6980_v58, %v6979_v1  ;;  %v6982_v29 = vpop.f32.mrb[234].mxu1  ;;  %v6871_v26 = vpop.f32.mrb[235].mxu0  ;;  %v285_v1 = vld [vmem:[#allocation2 + $0xc8] sm:$0xff] }
 0x350   : > { %4191 = vst [vmem:[#allocation2 + $0x98] sm:$0xff] %v4159_v41  ;;  %v3933_v36 = vadd.f32 %v6869_v61, %v8565_v40  ;;  %v6872_v0 = vadd.f32 %v6871_v26, %v6870_v48  ;;  %v6983_v27 = vpop.f32.mrb[235].mxu1 }
 0x351   : > { %v6984_v44 = vadd.f32 %v6983_v27, %v6982_v29 }
 0x352   : > { %v4094_v20 = vadd.f32 %v6981_v16, %v3933_v36  ;;  %v3936_v15 = vadd.f32 %v6872_v0, %v8568_v30  ;;  %v282_v30 = vld [vmem:[#allocation2 + $0xb0] sm:$0xff] }
 0x354   : > { %v4160_v46 = vadd.f32 %v4094_v20, %v280_v43  ;;  %v4097_v32 = vadd.f32 %v6984_v44, %v3936_v15  ;;  %v6873_v4 = vpop.f32.mrb[236].mxu0 }
 0x355   : > { %v6985_v9 = vpop.f32.mrb[236].mxu1  ;;  %v6874_v18 = vpop.f32.mrb[237].mxu0 }
 0x356   : > { %4192 = vst [vmem:[#allocation2 + $0xa0] sm:$0xff] %v4160_v46  ;;  %v4161_v19 = vadd.f32 %v4097_v32, %v281_v12  ;;  %v6875_v37 = vadd.f32 %v6874_v18, %v6873_v4  ;;  %v6986_v5 = vpop.f32.mrb[237].mxu1  ;;  %v6876_v7 = vpop.f32.mrb[238].mxu0  ;;  %v287_v32 = vld [vmem:[#allocation2 + $0xd8] sm:$0xff] }
 0x357   : > { %v6987_v11 = vadd.f32 %v6986_v5, %v6985_v9  ;;  %v6988_v40 = vpop.f32.mrb[238].mxu1  ;;  %v6877_v14 = vpop.f32.mrb[239].mxu0 }
 0x358   : > { %4193 = vst [vmem:[#allocation2 + $0xa8] sm:$0xff] %v4161_v19  ;;  %v3941_v25 = vadd.f32 %v6875_v37, %v8571_v56  ;;  %v6878_v38 = vadd.f32 %v6877_v14, %v6876_v7  ;;  %v6989_v62 = vpop.f32.mrb[239].mxu1 }
 0x359   : > { %v6990_v49 = vadd.f32 %v6989_v62, %v6988_v40 }
 0x35a   : > { %v4102_v63 = vadd.f32 %v6987_v11, %v3941_v25  ;;  %v3944_v50 = vadd.f32 %v6878_v38, %v8574_v8  ;;  %v284_v8 = vld [vmem:[#allocation2 + $0xc0] sm:$0xff] }
 0x35c   : > { %v4162_v53 = vadd.f32 %v4102_v63, %v282_v30  ;;  %v4105_v31 = vadd.f32 %v6990_v49, %v3944_v50  ;;  %v6879_v2 = vpop.f32.mrb[240].mxu0 }
 0x35d   : > { %v6991_v42 = vpop.f32.mrb[240].mxu1  ;;  %v6880_v28 = vpop.f32.mrb[241].mxu0 }
 0x35e   : > { %4194 = vst [vmem:[#allocation2 + $0xb0] sm:$0xff] %v4162_v53  ;;  %v4163_v22 = vadd.f32 %v4105_v31, %v283_v24  ;;  %v6881_v55 = vadd.f32 %v6880_v28, %v6879_v2  ;;  %v6992_v33 = vpop.f32.mrb[241].mxu1  ;;  %v6882_v23 = vpop.f32.mrb[242].mxu0  ;;  %v289_v24 = vld [vmem:[#allocation2 + $0xe8] sm:$0xff] }
 0x35f   : > { %v6993_v34 = vadd.f32 %v6992_v33, %v6991_v42  ;;  %v6994_v56 = vpop.f32.mrb[242].mxu1  ;;  %v6883_v57 = vpop.f32.mrb[243].mxu0 }
 0x360   : > { %4195 = vst [vmem:[#allocation2 + $0xb8] sm:$0xff] %v4163_v22  ;;  %v3949_v13 = vadd.f32 %v6881_v55, %v8577_v39  ;;  %v6884_v21 = vadd.f32 %v6883_v57, %v6882_v23  ;;  %v6995_v45 = vpop.f32.mrb[243].mxu1 }
 0x361   : > { %v6996_v6 = vadd.f32 %v6995_v45, %v6994_v56 }
 0x362   : > { %v4110_v59 = vadd.f32 %v6993_v34, %v3949_v13  ;;  %v3952_v47 = vadd.f32 %v6884_v21, %v8580_v54  ;;  %v286_v54 = vld [vmem:[#allocation2 + $0xd0] sm:$0xff] }
 0x364   : > { %v4164_v60 = vadd.f32 %v4110_v59, %v284_v8  ;;  %v4113_v41 = vadd.f32 %v6996_v6, %v3952_v47  ;;  %v6885_v61 = vpop.f32.mrb[244].mxu0  ;;  %v291_v59 = vld [vmem:[#allocation2 + $0xf8] sm:$0xff] }
 0x365   : > { %v6997_v58 = vpop.f32.mrb[244].mxu1  ;;  %v6886_v48 = vpop.f32.mrb[245].mxu0 }
 0x366   : > { %4196 = vst [vmem:[#allocation2 + $0xc0] sm:$0xff] %v4164_v60  ;;  %v4165_v16 = vadd.f32 %v4113_v41, %v285_v1  ;;  %v6887_v29 = vadd.f32 %v6886_v48, %v6885_v61  ;;  %v6998_v26 = vpop.f32.mrb[245].mxu1  ;;  %v6888_v36 = vpop.f32.mrb[246].mxu0 }
 0x367   : > { %v6999_v0 = vadd.f32 %v6998_v26, %v6997_v58  ;;  %v7000_v39 = vpop.f32.mrb[246].mxu1  ;;  %v6889_v27 = vpop.f32.mrb[247].mxu0 }
 0x368   : > { %4197 = vst [vmem:[#allocation2 + $0xc8] sm:$0xff] %v4165_v16  ;;  %v3957_v43 = vadd.f32 %v6887_v29, %v8583_v10  ;;  %v6890_v44 = vadd.f32 %v6889_v27, %v6888_v36  ;;  %v7001_v20 = vpop.f32.mrb[247].mxu1 }
 0x369   : > { %v7002_v15 = vadd.f32 %v7001_v20, %v7000_v39 }
 0x36a   : > { %v4118_v12 = vadd.f32 %v6999_v0, %v3957_v43  ;;  %v3960_v46 = vadd.f32 %v6890_v44, %v8586_v35  ;;  %v288_v35 = vld [vmem:[#allocation2 + $0xe0] sm:$0xff] }
 0x36c   : > { %v4166_v4 = vadd.f32 %v4118_v12, %v286_v54  ;;  %v4121_v9 = vadd.f32 %v7002_v15, %v3960_v46  ;;  %v6891_v18 = vpop.f32.mrb[248].mxu0 }
 0x36d   : > { %v7003_v19 = vpop.f32.mrb[248].mxu1  ;;  %v6892_v37 = vpop.f32.mrb[249].mxu0 }
 0x36e   : > { %4198 = vst [vmem:[#allocation2 + $0xd0] sm:$0xff] %v4166_v4  ;;  %v4167_v5 = vadd.f32 %v4121_v9, %v287_v32  ;;  %v6893_v7 = vadd.f32 %v6892_v37, %v6891_v18  ;;  %v7004_v11 = vpop.f32.mrb[249].mxu1  ;;  %v6894_v40 = vpop.f32.mrb[250].mxu0 }
 0x36f   : > { %v7005_v14 = vadd.f32 %v7004_v11, %v7003_v19  ;;  %v7006_v10 = vpop.f32.mrb[250].mxu1  ;;  %v6895_v25 = vpop.f32.mrb[251].mxu0 }
 0x370   : > { %4199 = vst [vmem:[#allocation2 + $0xd8] sm:$0xff] %v4167_v5  ;;  %v3965_v38 = vadd.f32 %v6893_v7, %v8589_v51  ;;  %v6896_v62 = vadd.f32 %v6895_v25, %v6894_v40  ;;  %v7007_v30 = vpop.f32.mrb[251].mxu1 }
 0x371   : > { %v7008_v49 = vadd.f32 %v7007_v30, %v7006_v10 }
 0x372   : > { %v4126_v63 = vadd.f32 %v7005_v14, %v3965_v38  ;;  %v3968_v50 = vadd.f32 %v6896_v62, %v8592_v17  ;;  %v290_v17 = vld [vmem:[#allocation2 + $0xf0] sm:$0xff] }
 0x374   : > { %v4168_v53 = vadd.f32 %v4126_v63, %v288_v35  ;;  %v4129_v31 = vadd.f32 %v7008_v49, %v3968_v50  ;;  %v6897_v2 = vpop.f32.mrb[252].mxu0 }
 0x375   : > { %v7009_v42 = vpop.f32.mrb[252].mxu1  ;;  %v6898_v28 = vpop.f32.mrb[253].mxu0 }
 0x376   : > { %4200 = vst [vmem:[#allocation2 + $0xe0] sm:$0xff] %v4168_v53  ;;  %v4169_v22 = vadd.f32 %v4129_v31, %v289_v24  ;;  %v6899_v55 = vadd.f32 %v6898_v28, %v6897_v2  ;;  %v7010_v33 = vpop.f32.mrb[253].mxu1  ;;  %v6900_v23 = vpop.f32.mrb[254].mxu0 }
 0x377   : > { %v7011_v34 = vadd.f32 %v7010_v33, %v7009_v42  ;;  %v7012_v51 = vpop.f32.mrb[254].mxu1  ;;  %v6901_v56 = vpop.f32.mrb[255].mxu0 }
 0x378   : > { %4201 = vst [vmem:[#allocation2 + $0xe8] sm:$0xff] %v4169_v22  ;;  %v3973_v57 = vadd.f32 %v6899_v55, %v8595_v3  ;;  %v6902_v13 = vadd.f32 %v6901_v56, %v6900_v23  ;;  %v7013_v21 = vpop.f32.mrb[255].mxu1 }
 0x379   : > { %v7014_v45 = vadd.f32 %v7013_v21, %v7012_v51 }
 0x37a   : > { %v4134_v8 = vadd.f32 %v7011_v34, %v3973_v57  ;;  %v3976_v6 = vadd.f32 %v6902_v13, %v8598_v52  ;;  %4207 = sbr.rel (%p6110_p7) target bundleno = 1680 (0x690), region = 44 }
 0x37c   : > { %v4170_v47 = vadd.f32 %v4134_v8, %v290_v17  ;;  %v4137_v1 = vadd.f32 %v7014_v45, %v3976_v6 }
 0x37e   : > { %4202 = vst [vmem:[#allocation2 + $0xf0] sm:$0xff] %v4170_v47  ;;  %v4171_v60 = vadd.f32 %v4137_v1, %v291_v59 }
 0x380   : > { %4203 = vst [vmem:[#allocation2 + $0xf8] sm:$0xff] %v4171_v60 }
 0x381   : > { %v8633_v41 = vld [vmem:[#allocation2 + $0x10] sm:$0xff]  ;;  %v8635_v61 = vld [vmem:[#allocation2] sm:$0xff]  ;;  %v8637_v3 = vld [vmem:[#allocation2 + $0x18] sm:$0xff]  ;;  %v7611_v58 = vmov 8   ;;  %s7614_s3 = smov 119   ;;  %s7616_s4 = smov 110  }
 0x382   : > { %7289 = vset.pattern.permute.xlu1 %v7611_v58  ;;  %7288 = vset.pattern.permute.xlu0 %v7611_v58  ;;  %v4242_v52 = vmax.f32 %v8633_v41, 1e-20  ;;  %v4240_v48 = vmax.f32 %v8635_v61, 1e-20  ;;  %v4243_v16 = vmax.f32 %v8637_v3, 1e-20 }
 0x383   : > { %v8642_v29 = vld [vmem:[#allocation2 + $0x8] sm:$0xff]  ;;  %v8647_v0 = vld [vmem:[#allocation2 + $0x20] sm:$0xff]  ;;  %v8651_v43 = vld [vmem:[#allocation2 + $0x38] sm:$0xff]  ;;  %s7617_s25 = smov 101   ;;  %vm5520_vm0 = vcmask 64512  }
 0x384   : > { %v8644_v26 = vld [vmem:[#allocation2 + $0x28] sm:$0xff]  ;;  %7296 = vrcp.f32 %v4242_v52  ;;  %v4241_v36 = vmax.f32 %v8642_v29, 1e-20  ;;  %v4244_v27 = vmax.f32 %v8647_v0, 1e-20  ;;  %v8653_v44 = vld [vmem:[#allocation2 + $0x30] sm:$0xff] }
 0x385   : > { %7298 = vrcp.f32 %v4240_v48  ;;  %v4245_v39 = vmax.f32 %v8644_v26, 1e-20  ;;  %v4247_v20 = vmax.f32 %v8651_v43, 1e-20  ;;  %v4246_v54 = vmax.f32 %v8653_v44, 1e-20 }
 0x386   : > { %7300 = vrcp.f32 %v4243_v16  ;;  %v8657_v15 = vld [vmem:[#allocation2 + $0x48] sm:$0xff]  ;;  %v8659_v12 = vld [vmem:[#allocation2 + $0x40] sm:$0xff]  ;;  %v8668_v18 = vld [vmem:[#allocation2 + $0x58] sm:$0xff] }
 0x387   : > { %7302 = vrcp.f32 %v4241_v36  ;;  %v4249_v32 = vmax.f32 %v8657_v15, 1e-20  ;;  %v4248_v9 = vmax.f32 %v8659_v12, 1e-20  ;;  %v8673_v37 = vld [vmem:[#allocation2 + $0x50] sm:$0xff]  ;;  %v8680_v40 = vld [vmem:[#allocation2 + $0x68] sm:$0xff] }
 0x388   : > { %7304 = vrcp.f32 %v4245_v39  ;;  %v4251_v7 = vmax.f32 %v8668_v18, 1e-20  ;;  %v4250_v11 = vmax.f32 %v8673_v37, 1e-20  ;;  %v8685_v10 = vld [vmem:[#allocation2 + $0x60] sm:$0xff]  ;;  %v8692_v30 = vld [vmem:[#allocation2 + $0x78] sm:$0xff] }
 0x389   : > { %7306 = vrcp.f32 %v4244_v27  ;;  %v4253_v38 = vmax.f32 %v8680_v40, 1e-20  ;;  %v4252_v62 = vmax.f32 %v8685_v10, 1e-20  ;;  %v8697_v49 = vld [vmem:[#allocation2 + $0x70] sm:$0xff]  ;;  %v8704_v53 = vld [vmem:[#allocation2 + $0x88] sm:$0xff] }
 0x38a   : > { %7308 = vrcp.f32 %v4247_v20  ;;  %v4255_v50 = vmax.f32 %v8692_v30, 1e-20  ;;  %v4254_v24 = vmax.f32 %v8697_v49, 1e-20  ;;  %v8709_v2 = vld [vmem:[#allocation2 + $0x80] sm:$0xff]  ;;  %v8716_v55 = vld [vmem:[#allocation2 + $0x98] sm:$0xff] }
 0x38b   : > { %7310 = vrcp.f32 %v4246_v54  ;;  %v4257_v28 = vmax.f32 %v8704_v53, 1e-20  ;;  %v4256_v22 = vmax.f32 %v8709_v2, 1e-20  ;;  %v8721_v23 = vld [vmem:[#allocation2 + $0x90] sm:$0xff]  ;;  %v8728_v57 = vld [vmem:[#allocation2 + $0xa8] sm:$0xff] }
 0x38c   : > { %7312 = vrcp.f32 %v4249_v32  ;;  %v4259_v51 = vmax.f32 %v8716_v55, 1e-20  ;;  %v4258_v56 = vmax.f32 %v8721_v23, 1e-20  ;;  %v8733_v21 = vld [vmem:[#allocation2 + $0xa0] sm:$0xff]  ;;  %v8740_v6 = vld [vmem:[#allocation2 + $0xb8] sm:$0xff] }
 0x38d   : > { %7314 = vrcp.f32 %v4248_v9  ;;  %v4261_v45 = vmax.f32 %v8728_v57, 1e-20  ;;  %v4260_v8 = vmax.f32 %v8733_v21, 1e-20  ;;  %v8745_v47 = vld [vmem:[#allocation2 + $0xb0] sm:$0xff]  ;;  %v8752_v52 = vld [vmem:[#allocation2 + $0xc8] sm:$0xff] }
 0x38e   : > { %v8661_v46 = vpop.eup %7296  ;;  %7316 = vrcp.f32 %v4251_v7  ;;  %v4263_v60 = vmax.f32 %v8740_v6, 1e-20  ;;  %v4262_v58 = vmax.f32 %v8745_v47, 1e-20  ;;  %v8757_v16 = vld [vmem:[#allocation2 + $0xc0] sm:$0xff]  ;;  %v8764_v20 = vld [vmem:[#allocation2 + $0xd8] sm:$0xff] }
 0x38f   : > { %v8664_v4 = vpop.eup %7298  ;;  %4316 = vperm.xlu1 %7289, %v8661_v46   ;;  %7318 = vrcp.f32 %v4250_v11  ;;  %v4265_v39 = vmax.f32 %v8752_v52, 1e-20  ;;  %v4264_v27 = vmax.f32 %v8757_v16, 1e-20  ;;  %v8769_v32 = vld [vmem:[#allocation2 + $0xd0] sm:$0xff] }
 0x390   : > { %v8670_v19 = vpop.eup %7300  ;;  %4306 = vperm.xlu0 %7288, %v8664_v4   ;;  %7320 = vrcp.f32 %v4253_v38  ;;  %v4267_v7 = vmax.f32 %v8764_v20, 1e-20  ;;  %v4266_v11 = vmax.f32 %v8769_v32, 1e-20  ;;  %v8776_v38 = vld [vmem:[#allocation2 + $0xe8] sm:$0xff] }
 0x391   : > { %v8675_v5 = vpop.eup %7302  ;;  %7322 = vrcp.f32 %v4252_v62 }
 0x392   : > { %v8682_v14 = vpop.eup %7304  ;;  %7324 = vrcp.f32 %v4255_v50  ;;  %v8781_v50 = vld [vmem:[#allocation2 + $0xe0] sm:$0xff] }
 0x393   : > { %4321 = vperm.xlu1 %7289, %v8670_v19   ;;  %v8687_v25 = vpop.eup %7306  ;;  %7326 = vrcp.f32 %v4254_v24 }
 0x394   : > { %4311 = vperm.xlu0 %7288, %v8675_v5   ;;  %v8694_v35 = vpop.eup %7308  ;;  %7328 = vrcp.f32 %v4257_v28  ;;  %v4269_v28 = vmax.f32 %v8776_v38, 1e-20 }
 0x395   : > { %v8699_v63 = vpop.eup %7310  ;;  %7330 = vrcp.f32 %v4256_v22  ;;  %v4268_v22 = vmax.f32 %v8781_v50, 1e-20 }
 0x396   : > { %v8706_v31 = vpop.eup %7312  ;;  %7332 = vrcp.f32 %v4259_v51  ;;  %v8788_v51 = vld [vmem:[#allocation2 + $0xf8] sm:$0xff] }
 0x397   : > { %4331 = vperm.xlu1 %7289, %v8682_v14   ;;  %v8711_v42 = vpop.eup %7314  ;;  %7334 = vrcp.f32 %v4258_v56  ;;  %9714 = vst [vmem:[#allocation18_spill] sm:$0xff] %v8788_v51 }
 0x398   : > { %4326 = vperm.xlu0 %7288, %v8687_v25   ;;  %v8718_v33 = vpop.eup %7316  ;;  %7336 = vrcp.f32 %v4261_v45  ;;  %v8793_v45 = vld [vmem:[#allocation2 + $0xf0] sm:$0xff] }
 0x399   : > { %v8723_v34 = vpop.eup %7318  ;;  %7338 = vrcp.f32 %v4260_v8 }
 0x39a   : > { %v8730_v13 = vpop.eup %7320  ;;  %7340 = vrcp.f32 %v4263_v60  ;;  %v4271_v60 = vmax.f32 %v8788_v51, 1e-20  ;;  %v7612_v51 = vmov 17  }
 0x39b   : > { %4341 = vperm.xlu1 %7289, %v8694_v35   ;;  %v8735_v17 = vpop.eup %7322  ;;  %7342 = vrcp.f32 %v4262_v58  ;;  %v4270_v58 = vmax.f32 %v8793_v45, 1e-20 }
 0x39c   : > { %4336 = vperm.xlu0 %7288, %v8699_v63   ;;  %v8742_v59 = vpop.eup %7324  ;;  %7344 = vrcp.f32 %v4265_v39 }
 0x39d   : > { %v8747_v1 = vpop.eup %7326  ;;  %7346 = vrcp.f32 %v4264_v27 }
 0x39e   : > { %v8754_v48 = vpop.eup %7328  ;;  %7348 = vrcp.f32 %v4267_v7 }
 0x39f   : > { %4351 = vperm.xlu1 %7289, %v8706_v31   ;;  %v8759_v36 = vpop.eup %7330  ;;  %7350 = vrcp.f32 %v4266_v11 }
 0x3a0   : > { %4346 = vperm.xlu0 %7288, %v8711_v42   ;;  %v8766_v54 = vpop.eup %7332  ;;  %7352 = vrcp.f32 %v4269_v28 }
 0x3a1   : > { %v8771_v9 = vpop.eup %7334  ;;  %7354 = vrcp.f32 %v4268_v22 }
 0x3a2   : > { %v8778_v62 = vpop.eup %7336  ;;  %7356 = vrcp.f32 %v4271_v60 }
 0x3a3   : > { %4361 = vperm.xlu1 %7289, %v8718_v33   ;;  %9712 = vst [vmem:[#allocation16_spill] sm:$0xff] %v8778_v62  ;;  %v8783_v24 = vpop.eup %7338  ;;  %7358 = vrcp.f32 %v4270_v58 }
 0x3a4   : > { %4356 = vperm.xlu0 %7288, %v8723_v34   ;;  %9713 = vst [vmem:[#allocation17_spill] sm:$0xff] %v8783_v24  ;;  %v8790_v56 = vpop.eup %7340 }
 0x3a5   : > { %9715 = vst [vmem:[#allocation19_spill] sm:$0xff] %v8790_v56  ;;  %v8795_v8 = vpop.eup %7342 }
 0x3a6   : > { %9716 = vst [vmem:[#allocation20_spill] sm:$0xff] %v8795_v8  ;;  %v8800_v39 = vpop.eup %7344 }
 0x3a7   : > { %4371 = vperm.xlu1 %7289, %v8730_v13   ;;  %9717 = vst [vmem:[#allocation21_spill] sm:$0xff] %v8800_v39  ;;  %v8803_v27 = vpop.eup %7346 }
 0x3a8   : > { %4366 = vperm.xlu0 %7288, %v8735_v17   ;;  %9718 = vst [vmem:[#allocation22_spill] sm:$0xff] %v8803_v27  ;;  %v8806_v7 = vpop.eup %7348 }
 0x3a9   : > { %9719 = vst [vmem:[#allocation23_spill] sm:$0xff] %v8806_v7  ;;  %v8809_v11 = vpop.eup %7350 }
 0x3aa   : > { %9720 = vst [vmem:[#allocation24_spill] sm:$0xff] %v8809_v11  ;;  %v8812_v28 = vpop.eup %7352 }
 0x3ab   : > { %4381 = vperm.xlu1 %7289, %v8742_v59   ;;  %9721 = vst [vmem:[#allocation25_spill] sm:$0xff] %v8812_v28  ;;  %v8815_v22 = vpop.eup %7354 }
 0x3ac   : > { %4376 = vperm.xlu0 %7288, %v8747_v1   ;;  %9722 = vst [vmem:[#allocation26_spill] sm:$0xff] %v8815_v22  ;;  %v8818_v60 = vpop.eup %7356 }
 0x3ad   : > { %9723 = vst [vmem:[#allocation27_spill] sm:$0xff] %v8818_v60  ;;  %v8821_v58 = vpop.eup %7358 }
 0x3ae   : > { %9724 = vst [vmem:[#allocation28_spill] sm:$0xff] %v8821_v58 }
 0x3af   : > { %4391 = vperm.xlu1 %7289, %v8754_v48  }
 0x3b0   : > { %4386 = vperm.xlu0 %7288, %v8759_v36  }
 0x3b3   : > { %4401 = vperm.xlu1 %7289, %v8766_v54  }
 0x3b4   : > { %4396 = vperm.xlu0 %7288, %v8771_v9  }
 0x3b7   : > { %4411 = vperm.xlu1 %7289, %v8778_v62  }
 0x3b8   : > { %4406 = vperm.xlu0 %7288, %v8783_v24  }
 0x3bb   : > { %4421 = vperm.xlu1 %7289, %v8790_v56  }
 0x3bc   : > { %4416 = vperm.xlu0 %7288, %v8795_v8  }
 0x3bf   : > { %4431 = vperm.xlu1 %7289, %v8800_v39  }
 0x3c0   : > { %4426 = vperm.xlu0 %7288, %v8803_v27  }
 0x3c3   : > { %4441 = vperm.xlu1 %7289, %v8806_v7  }
 0x3c4   : > { %4436 = vperm.xlu0 %7288, %v8809_v11  }
 0x3c7   : > { %4451 = vperm.xlu1 %7289, %v8812_v28  }
 0x3c8   : > { %4446 = vperm.xlu0 %7288, %v8815_v22  }
 0x3cb   : > { %4461 = vperm.xlu1 %7289, %v8818_v60  }
 0x3cc   : > { %4456 = vperm.xlu0 %7288, %v8821_v58  }
 0x3cf   : > { %7291 = vset.pattern.permute.xlu1 %v7612_v51 }
 0x3d0   : > { %7290 = vset.pattern.permute.xlu0 %v7612_v51  ;;  %4533 = vperm.xlu1 %7291, %v8675_v5  }
 0x3d1   : > { %4529 = vperm.xlu0 %7290, %v8664_v4  }
 0x3d4   : > { %4537 = vperm.xlu1 %7291, %v8661_v46  }
 0x3d5   : > { %4541 = vperm.xlu0 %7290, %v8670_v19  }
 0x3d8   : > { %4545 = vperm.xlu1 %7291, %v8687_v25  }
 0x3d9   : > { %4549 = vperm.xlu0 %7290, %v8682_v14  }
 0x3dc   : > { %4553 = vperm.xlu1 %7291, %v8699_v63  }
 0x3dd   : > { %4557 = vperm.xlu0 %7290, %v8694_v35  }
 0x3e0   : > { %4561 = vperm.xlu1 %7291, %v8711_v42  }
 0x3e1   : > { %4565 = vperm.xlu0 %7290, %v8706_v31  }
 0x3e4   : > { %4569 = vperm.xlu1 %7291, %v8723_v34  }
 0x3e5   : > { %4573 = vperm.xlu0 %7290, %v8718_v33  }
 0x3e8   : > { %4577 = vperm.xlu1 %7291, %v8735_v17  }
 0x3e9   : > { %4581 = vperm.xlu0 %7290, %v8730_v13  }
 0x3ec   : > { %4585 = vperm.xlu1 %7291, %v8747_v1  }
 0x3ed   : > { %4589 = vperm.xlu0 %7290, %v8742_v59  }
 0x3f0   : > { %4593 = vperm.xlu1 %7291, %v8759_v36  }
 0x3f1   : > { %4597 = vperm.xlu0 %7290, %v8754_v48  }
 0x3f4   : > { %4601 = vperm.xlu1 %7291, %v8771_v9  }
 0x3f5   : > { %4605 = vperm.xlu0 %7290, %v8766_v54  }
 0x3f8   : > { %4609 = vperm.xlu1 %7291, %v8783_v24  }
 0x3f9   : > { %4613 = vperm.xlu0 %7290, %v8778_v62  }
 0x3fc   : > { %4617 = vperm.xlu1 %7291, %v8795_v8  }
 0x3fd   : > { %4621 = vperm.xlu0 %7290, %v8790_v56   ;;  %v7613_v56 = vmov 26  }
 0x400   : > { %4625 = vperm.xlu1 %7291, %v8803_v27  }
 0x401   : > { %4629 = vperm.xlu0 %7290, %v8800_v39  }
 0x404   : > { %4633 = vperm.xlu1 %7291, %v8809_v11  }
 0x405   : > { %4637 = vperm.xlu0 %7290, %v8806_v7  }
 0x408   : > { %4641 = vperm.xlu1 %7291, %v8815_v22  }
 0x409   : > { %4645 = vperm.xlu0 %7290, %v8812_v28  }
 0x40c   : > { %4649 = vperm.xlu1 %7291, %v8821_v58  }
 0x40d   : > { %4653 = vperm.xlu0 %7290, %v8818_v60  }
 0x40e   : > { %v8857_v51 = vpop.permute.xlu1 %4316 }
 0x40f   : > { %9725 = vst [vmem:[#allocation29_spill] sm:$0xff] %v8857_v51  ;;  %v8859_v62 = vpop.permute.xlu0 %4306 }
 0x410   : > { %9726 = vst [vmem:[#allocation30_spill] sm:$0xff] %v8859_v62  ;;  %7292 = vset.pattern.permute.xlu1 %v7613_v56 }
 0x411   : > { %7293 = vset.pattern.permute.xlu0 %v7613_v56 }
 0x412   : > { %v8861_v39 = vpop.permute.xlu1 %4321 }
 0x413   : > { %9727 = vst [vmem:[#allocation31_spill] sm:$0xff] %v8861_v39  ;;  %v8863_v11 = vpop.permute.xlu0 %4311 }
 0x414   : > { %9728 = vst [vmem:[#allocation32_spill] sm:$0xff] %v8863_v11 }
 0x416   : > { %v8865_v7 = vpop.permute.xlu1 %4331 }
 0x417   : > { %9729 = vst [vmem:[#allocation33_spill] sm:$0xff] %v8865_v7  ;;  %v8867_v22 = vpop.permute.xlu0 %4326 }
 0x418   : > { %9730 = vst [vmem:[#allocation34_spill] sm:$0xff] %v8867_v22 }
 0x41a   : > { %v8869_v28 = vpop.permute.xlu1 %4341 }
 0x41b   : > { %9731 = vst [vmem:[#allocation35_spill] sm:$0xff] %v8869_v28  ;;  %v8871_v58 = vpop.permute.xlu0 %4336 }
 0x41c   : > { %9732 = vst [vmem:[#allocation36_spill] sm:$0xff] %v8871_v58 }
 0x41e   : > { %v8873_v60 = vpop.permute.xlu1 %4351 }
 0x41f   : > { %9733 = vst [vmem:[#allocation37_spill] sm:$0xff] %v8873_v60  ;;  %v8875_v51 = vpop.permute.xlu0 %4346 }
 0x420   : > { %9734 = vst [vmem:[#allocation38_spill] sm:$0xff] %v8875_v51 }
 0x422   : > { %v8877_v62 = vpop.permute.xlu1 %4361 }
 0x423   : > { %9735 = vst [vmem:[#allocation39_spill] sm:$0xff] %v8877_v62  ;;  %v8879_v27 = vpop.permute.xlu0 %4356 }
 0x424   : > { %9736 = vst [vmem:[#allocation40_spill] sm:$0xff] %v8879_v27 }
 0x426   : > { %v8881_v56 = vpop.permute.xlu1 %4371 }
 0x427   : > { %9737 = vst [vmem:[#allocation41_spill] sm:$0xff] %v8881_v56  ;;  %v8883_v39 = vpop.permute.xlu0 %4366 }
 0x428   : > { %9738 = vst [vmem:[#allocation42_spill] sm:$0xff] %v8883_v39 }
 0x42a   : > { %v8885_v11 = vpop.permute.xlu1 %4381 }
 0x42b   : > { %9739 = vst [vmem:[#allocation43_spill] sm:$0xff] %v8885_v11  ;;  %v8887_v7 = vpop.permute.xlu0 %4376 }
 0x42c   : > { %9740 = vst [vmem:[#allocation44_spill] sm:$0xff] %v8887_v7 }
 0x42e   : > { %v8889_v22 = vpop.permute.xlu1 %4391 }
 0x42f   : > { %9741 = vst [vmem:[#allocation45_spill] sm:$0xff] %v8889_v22  ;;  %v8891_v28 = vpop.permute.xlu0 %4386 }
 0x430   : > { %9742 = vst [vmem:[#allocation46_spill] sm:$0xff] %v8891_v28 }
 0x432   : > { %v8893_v58 = vpop.permute.xlu1 %4401 }
 0x433   : > { %9743 = vst [vmem:[#allocation47_spill] sm:$0xff] %v8893_v58  ;;  %v8895_v60 = vpop.permute.xlu0 %4396 }
 0x434   : > { %9744 = vst [vmem:[#allocation48_spill] sm:$0xff] %v8895_v60 }
 0x436   : > { %v8897_v51 = vpop.permute.xlu1 %4411 }
 0x437   : > { %9745 = vst [vmem:[#allocation49_spill] sm:$0xff] %v8897_v51  ;;  %v8899_v62 = vpop.permute.xlu0 %4406 }
 0x438   : > { %9746 = vst [vmem:[#allocation50_spill] sm:$0xff] %v8899_v62 }
 0x43a   : > { %v8901_v27 = vpop.permute.xlu1 %4421 }
 0x43b   : > { %9747 = vst [vmem:[#allocation51_spill] sm:$0xff] %v8901_v27  ;;  %v8903_v56 = vpop.permute.xlu0 %4416 }
 0x43c   : > { %9748 = vst [vmem:[#allocation52_spill] sm:$0xff] %v8903_v56 }
 0x43e   : > { %v8905_v39 = vpop.permute.xlu1 %4431 }
 0x43f   : > { %9749 = vst [vmem:[#allocation53_spill] sm:$0xff] %v8905_v39  ;;  %v8907_v11 = vpop.permute.xlu0 %4426 }
 0x440   : > { %9750 = vst [vmem:[#allocation54_spill] sm:$0xff] %v8907_v11  ;;  %v9757_v11 = vld [vmem:[#allocation18_spill] sm:$0xff] }
 0x442   : > { %v8909_v7 = vpop.permute.xlu1 %4441 }
 0x443   : > { %9751 = vst [vmem:[#allocation55_spill] sm:$0xff] %v8909_v7  ;;  %v8911_v22 = vpop.permute.xlu0 %4436 }
 0x444   : > { %9752 = vst [vmem:[#allocation56_spill] sm:$0xff] %v8911_v22 }
 0x446   : > { %v8913_v28 = vpop.permute.xlu1 %4451 }
 0x447   : > { %9753 = vst [vmem:[#allocation57_spill] sm:$0xff] %v8913_v28  ;;  %v8915_v58 = vpop.permute.xlu0 %4446 }
 0x448   : > { %9754 = vst [vmem:[#allocation58_spill] sm:$0xff] %v8915_v58 }
 0x44a   : > { %v8917_v60 = vpop.permute.xlu1 %4461 }
 0x44b   : > { %9755 = vst [vmem:[#allocation59_spill] sm:$0xff] %v8917_v60  ;;  %v8919_v51 = vpop.permute.xlu0 %4456 }
 0x44c   : > { %9756 = vst [vmem:[#allocation60_spill] sm:$0xff] %v8919_v51 }
 0x44f   : > { %v4534_v62 = vpop.permute.xlu1 %4533 }
 0x450   : > { %v4657_v27 = vmul.f32 %v4534_v62, %v8642_v29  ;;  %v4530_v56 = vpop.permute.xlu0 %4529 }
 0x451   : > { %v4656_v39 = vmul.f32 %v4530_v56, %v8635_v61 }
 0x452   : > { %4722 = vrot.lane.b32.xlu0 %v4657_v27, %s7614_s3 }
 0x453   : > { %4720 = vrot.lane.b32.xlu1 %v4656_v39, %s7614_s3  ;;  %v4538_v22 = vpop.permute.xlu1 %4537 }
 0x454   : > { %v4658_v28 = vmul.f32 %v4538_v22, %v8633_v41  ;;  %v4542_v7 = vpop.permute.xlu0 %4541 }
 0x455   : > { %v4659_v58 = vmul.f32 %v4542_v7, %v8637_v3 }
 0x457   : > { %4724 = vrot.lane.b32.xlu1 %v4658_v28, %s7614_s3  ;;  %4726 = vrot.lane.b32.xlu0 %v4659_v58, %s7614_s3  ;;  %v4546_v51 = vpop.permute.xlu1 %4545 }
 0x458   : > { %v4660_v62 = vmul.f32 %v4546_v51, %v8647_v0  ;;  %v4550_v60 = vpop.permute.xlu0 %4549 }
 0x459   : > { %v4661_v56 = vmul.f32 %v4550_v60, %v8644_v26 }
 0x45b   : > { %4728 = vrot.lane.b32.xlu1 %v4660_v62, %s7614_s3  ;;  %4730 = vrot.lane.b32.xlu0 %v4661_v56, %s7614_s3  ;;  %v4554_v39 = vpop.permute.xlu1 %4553 }
 0x45c   : > { %v4662_v27 = vmul.f32 %v4554_v39, %v8653_v44  ;;  %v4558_v22 = vpop.permute.xlu0 %4557 }
 0x45d   : > { %v4663_v7 = vmul.f32 %v4558_v22, %v8651_v43 }
 0x45f   : > { %4732 = vrot.lane.b32.xlu1 %v4662_v27, %s7614_s3  ;;  %4734 = vrot.lane.b32.xlu0 %v4663_v7, %s7614_s3  ;;  %v4562_v28 = vpop.permute.xlu1 %4561 }
 0x460   : > { %v4664_v58 = vmul.f32 %v4562_v28, %v8659_v12  ;;  %v4566_v51 = vpop.permute.xlu0 %4565 }
 0x461   : > { %v4665_v60 = vmul.f32 %v4566_v51, %v8657_v15 }
 0x463   : > { %4736 = vrot.lane.b32.xlu1 %v4664_v58, %s7614_s3  ;;  %4738 = vrot.lane.b32.xlu0 %v4665_v60, %s7614_s3  ;;  %v4570_v62 = vpop.permute.xlu1 %4569 }
 0x464   : > { %v4666_v56 = vmul.f32 %v4570_v62, %v8673_v37  ;;  %v4574_v39 = vpop.permute.xlu0 %4573 }
 0x465   : > { %v4667_v22 = vmul.f32 %v4574_v39, %v8668_v18 }
 0x467   : > { %4740 = vrot.lane.b32.xlu1 %v4666_v56, %s7614_s3  ;;  %4742 = vrot.lane.b32.xlu0 %v4667_v22, %s7614_s3  ;;  %v4578_v27 = vpop.permute.xlu1 %4577 }
 0x468   : > { %v4668_v7 = vmul.f32 %v4578_v27, %v8685_v10  ;;  %v4582_v28 = vpop.permute.xlu0 %4581 }
 0x469   : > { %v4669_v51 = vmul.f32 %v4582_v28, %v8680_v40 }
 0x46b   : > { %4744 = vrot.lane.b32.xlu1 %v4668_v7, %s7614_s3  ;;  %4746 = vrot.lane.b32.xlu0 %v4669_v51, %s7614_s3  ;;  %v4586_v58 = vpop.permute.xlu1 %4585 }
 0x46c   : > { %v4670_v60 = vmul.f32 %v4586_v58, %v8697_v49  ;;  %v4590_v62 = vpop.permute.xlu0 %4589 }
 0x46d   : > { %v4671_v39 = vmul.f32 %v4590_v62, %v8692_v30 }
 0x46f   : > { %4748 = vrot.lane.b32.xlu1 %v4670_v60, %s7614_s3  ;;  %4750 = vrot.lane.b32.xlu0 %v4671_v39, %s7614_s3  ;;  %v4594_v56 = vpop.permute.xlu1 %4593 }
 0x470   : > { %v4672_v22 = vmul.f32 %v4594_v56, %v8709_v2  ;;  %v4598_v27 = vpop.permute.xlu0 %4597 }
 0x471   : > { %v4673_v28 = vmul.f32 %v4598_v27, %v8704_v53 }
 0x473   : > { %4752 = vrot.lane.b32.xlu1 %v4672_v22, %s7614_s3  ;;  %4754 = vrot.lane.b32.xlu0 %v4673_v28, %s7614_s3  ;;  %v4602_v7 = vpop.permute.xlu1 %4601 }
 0x474   : > { %v4674_v51 = vmul.f32 %v4602_v7, %v8721_v23  ;;  %v4606_v58 = vpop.permute.xlu0 %4605 }
 0x475   : > { %v4675_v62 = vmul.f32 %v4606_v58, %v8716_v55 }
 0x477   : > { %4756 = vrot.lane.b32.xlu1 %v4674_v51, %s7614_s3  ;;  %4758 = vrot.lane.b32.xlu0 %v4675_v62, %s7614_s3  ;;  %v4610_v60 = vpop.permute.xlu1 %4609 }
 0x478   : > { %v4676_v39 = vmul.f32 %v4610_v60, %v8733_v21  ;;  %v4614_v56 = vpop.permute.xlu0 %4613 }
 0x479   : > { %v4677_v27 = vmul.f32 %v4614_v56, %v8728_v57 }
 0x47b   : > { %4760 = vrot.lane.b32.xlu1 %v4676_v39, %s7614_s3  ;;  %4762 = vrot.lane.b32.xlu0 %v4677_v27, %s7614_s3  ;;  %v4618_v22 = vpop.permute.xlu1 %4617 }
 0x47c   : > { %v4678_v28 = vmul.f32 %v4618_v22, %v8745_v47  ;;  %v4622_v7 = vpop.permute.xlu0 %4621 }
 0x47d   : > { %v4679_v58 = vmul.f32 %v4622_v7, %v8740_v6 }
 0x47f   : > { %4764 = vrot.lane.b32.xlu1 %v4678_v28, %s7614_s3  ;;  %4766 = vrot.lane.b32.xlu0 %v4679_v58, %s7614_s3  ;;  %v4626_v51 = vpop.permute.xlu1 %4625 }
 0x480   : > { %v4680_v62 = vmul.f32 %v4626_v51, %v8757_v16  ;;  %v4630_v60 = vpop.permute.xlu0 %4629 }
 0x481   : > { %v4681_v56 = vmul.f32 %v4630_v60, %v8752_v52 }
 0x483   : > { %4768 = vrot.lane.b32.xlu1 %v4680_v62, %s7614_s3  ;;  %4770 = vrot.lane.b32.xlu0 %v4681_v56, %s7614_s3  ;;  %v4634_v39 = vpop.permute.xlu1 %4633 }
 0x484   : > { %v4682_v27 = vmul.f32 %v4634_v39, %v8769_v32  ;;  %v4638_v22 = vpop.permute.xlu0 %4637 }
 0x485   : > { %v4683_v7 = vmul.f32 %v4638_v22, %v8764_v20 }
 0x487   : > { %4772 = vrot.lane.b32.xlu1 %v4682_v27, %s7614_s3  ;;  %4774 = vrot.lane.b32.xlu0 %v4683_v7, %s7614_s3  ;;  %v4642_v28 = vpop.permute.xlu1 %4641  ;;  %v9758_v27 = vld [vmem:[#allocation16_spill] sm:$0xff]  ;;  %v9759_v7 = vld [vmem:[#allocation22_spill] sm:$0xff] }
 0x488   : > { %v4684_v58 = vmul.f32 %v4642_v28, %v8781_v50  ;;  %v4646_v51 = vpop.permute.xlu0 %4645  ;;  %v9760_v28 = vld [vmem:[#allocation19_spill] sm:$0xff] }
 0x489   : > { %v4685_v60 = vmul.f32 %v4646_v51, %v8776_v38 }
 0x48b   : > { %4776 = vrot.lane.b32.xlu1 %v4684_v58, %s7614_s3  ;;  %4778 = vrot.lane.b32.xlu0 %v4685_v60, %s7614_s3  ;;  %v4650_v62 = vpop.permute.xlu1 %4649  ;;  %v9761_v58 = vld [vmem:[#allocation24_spill] sm:$0xff] }
 0x48c   : > { %v4686_v56 = vmul.f32 %v4650_v62, %v8793_v45  ;;  %v4654_v39 = vpop.permute.xlu0 %4653  ;;  %v9764_v62 = vld [vmem:[#allocation21_spill] sm:$0xff] }
 0x48d   : > { %v4687_v22 = vmul.f32 %v4654_v39, %v9757_v11 }
 0x48f   : > { %4780 = vrot.lane.b32.xlu1 %v4686_v56, %s7614_s3  ;;  %4782 = vrot.lane.b32.xlu0 %v4687_v22, %s7614_s3  ;;  %v9765_v56 = vld [vmem:[#allocation26_spill] sm:$0xff] }
 0x493   : > { %4849 = vperm.xlu1 %7292, %v8664_v4   ;;  %4853 = vperm.xlu0 %7293, %v8675_v5  }
 0x497   : > { %4857 = vperm.xlu1 %7292, %v8661_v46   ;;  %4865 = vperm.xlu0 %7293, %v8687_v25  }
 0x49b   : > { %4861 = vperm.xlu1 %7292, %v8670_v19   ;;  %4873 = vperm.xlu0 %7293, %v8699_v63  }
 0x49f   : > { %4869 = vperm.xlu1 %7292, %v8682_v14   ;;  %4881 = vperm.xlu0 %7293, %v8711_v42  }
 0x4a3   : > { %4877 = vperm.xlu1 %7292, %v8694_v35   ;;  %4889 = vperm.xlu0 %7293, %v8723_v34  }
 0x4a7   : > { %4885 = vperm.xlu1 %7292, %v8706_v31   ;;  %4897 = vperm.xlu0 %7293, %v8735_v17  }
 0x4ab   : > { %4893 = vperm.xlu1 %7292, %v8718_v33   ;;  %4905 = vperm.xlu0 %7293, %v8747_v1  }
 0x4af   : > { %4901 = vperm.xlu1 %7292, %v8730_v13   ;;  %4913 = vperm.xlu0 %7293, %v8759_v36  }
 0x4b3   : > { %4909 = vperm.xlu1 %7292, %v8742_v59   ;;  %4921 = vperm.xlu0 %7293, %v8771_v9  }
 0x4b7   : > { %4917 = vperm.xlu1 %7292, %v8754_v48   ;;  %4929 = vperm.xlu0 %7293, %v8783_v24   ;;  %v9769_v24 = vld [vmem:[#allocation28_spill] sm:$0xff] }
 0x4bb   : > { %4925 = vperm.xlu1 %7292, %v8766_v54   ;;  %4937 = vperm.xlu0 %7293, %v8795_v8   ;;  %v9768_v8 = vld [vmem:[#allocation23_spill] sm:$0xff] }
 0x4bf   : > { %4933 = vperm.xlu1 %7292, %v9758_v27   ;;  %4945 = vperm.xlu0 %7293, %v9759_v7  }
 0x4c3   : > { %4941 = vperm.xlu1 %7292, %v9760_v28   ;;  %4953 = vperm.xlu0 %7293, %v9761_v58   ;;  %v9772_v58 = vld [vmem:[#allocation25_spill] sm:$0xff] }
 0x4c4   : > { %v9011_v51 = vpop.permute.xlu0 %4722 }
 0x4c5   : > { %9762 = vst [vmem:[#allocation18_spill] sm:$0xff] %v9011_v51  ;;  %v9013_v60 = vpop.permute.xlu1 %4720 }
 0x4c6   : > { %9763 = vst [vmem:[#allocation16_spill] sm:$0xff] %v9013_v60 }
 0x4c7   : > { %4949 = vperm.xlu1 %7292, %v9764_v62   ;;  %4961 = vperm.xlu0 %7293, %v9765_v56   ;;  %v9775_v62 = vld [vmem:[#allocation27_spill] sm:$0xff]  ;;  %v7615_v56 = vmov 35  }
 0x4c9   : > { %v9017_v39 = vpop.permute.xlu1 %4724  ;;  %v9019_v22 = vpop.permute.xlu0 %4726 }
 0x4ca   : > { %9766 = vst [vmem:[#allocation61_spill] sm:$0xff] %v9017_v39  ;;  %9767 = vst [vmem:[#allocation62_spill] sm:$0xff] %v9019_v22 }
 0x4cb   : > { %4957 = vperm.xlu1 %7292, %v9768_v8   ;;  %4969 = vperm.xlu0 %7293, %v9769_v24  }
 0x4cd   : > { %v9023_v7 = vpop.permute.xlu1 %4728  ;;  %v9025_v28 = vpop.permute.xlu0 %4730 }
 0x4ce   : > { %9770 = vst [vmem:[#allocation63_spill] sm:$0xff] %v9023_v7  ;;  %9771 = vst [vmem:[#allocation64_spill] sm:$0xff] %v9025_v28 }
 0x4cf   : > { %4965 = vperm.xlu1 %7292, %v9772_v58   ;;  %7294 = vset.pattern.permute.xlu0 %v7615_v56 }
 0x4d1   : > { %v9028_v51 = vpop.permute.xlu1 %4732  ;;  %v9030_v60 = vpop.permute.xlu0 %4734 }
 0x4d2   : > { %9773 = vst [vmem:[#allocation65_spill] sm:$0xff] %v9028_v51  ;;  %9774 = vst [vmem:[#allocation66_spill] sm:$0xff] %v9030_v60 }
 0x4d3   : > { %4973 = vperm.xlu1 %7292, %v9775_v62  }
 0x4d5   : > { %v9033_v39 = vpop.permute.xlu1 %4736  ;;  %v9035_v22 = vpop.permute.xlu0 %4738 }
 0x4d6   : > { %9776 = vst [vmem:[#allocation67_spill] sm:$0xff] %v9033_v39  ;;  %9777 = vst [vmem:[#allocation68_spill] sm:$0xff] %v9035_v22 }
 0x4d7   : > { %7295 = vset.pattern.permute.xlu1 %v7615_v56 }
 0x4d9   : > { %v9037_v24 = vpop.permute.xlu1 %4740  ;;  %v9039_v7 = vpop.permute.xlu0 %4742 }
 0x4da   : > { %9778 = vst [vmem:[#allocation69_spill] sm:$0xff] %v9037_v24  ;;  %9779 = vst [vmem:[#allocation70_spill] sm:$0xff] %v9039_v7 }
 0x4dd   : > { %v9041_v28 = vpop.permute.xlu1 %4744  ;;  %v9043_v58 = vpop.permute.xlu0 %4746 }
 0x4de   : > { %9780 = vst [vmem:[#allocation71_spill] sm:$0xff] %v9041_v28  ;;  %9781 = vst [vmem:[#allocation72_spill] sm:$0xff] %v9043_v58 }
 0x4e1   : > { %v9045_v51 = vpop.permute.xlu1 %4748  ;;  %v9047_v60 = vpop.permute.xlu0 %4750 }
 0x4e2   : > { %9782 = vst [vmem:[#allocation73_spill] sm:$0xff] %v9045_v51  ;;  %9783 = vst [vmem:[#allocation74_spill] sm:$0xff] %v9047_v60 }
 0x4e5   : > { %v9049_v62 = vpop.permute.xlu1 %4752  ;;  %v9051_v8 = vpop.permute.xlu0 %4754 }
 0x4e6   : > { %9784 = vst [vmem:[#allocation75_spill] sm:$0xff] %v9049_v62  ;;  %9785 = vst [vmem:[#allocation76_spill] sm:$0xff] %v9051_v8 }
 0x4e9   : > { %v9053_v39 = vpop.permute.xlu1 %4756  ;;  %v9055_v22 = vpop.permute.xlu0 %4758 }
 0x4ea   : > { %9786 = vst [vmem:[#allocation77_spill] sm:$0xff] %v9053_v39  ;;  %9787 = vst [vmem:[#allocation78_spill] sm:$0xff] %v9055_v22 }
 0x4ed   : > { %v9057_v56 = vpop.permute.xlu1 %4760  ;;  %v9059_v24 = vpop.permute.xlu0 %4762 }
 0x4ee   : > { %9788 = vst [vmem:[#allocation79_spill] sm:$0xff] %v9057_v56  ;;  %9789 = vst [vmem:[#allocation80_spill] sm:$0xff] %v9059_v24 }
 0x4f1   : > { %v9061_v7 = vpop.permute.xlu1 %4764  ;;  %v9063_v28 = vpop.permute.xlu0 %4766 }
 0x4f2   : > { %9790 = vst [vmem:[#allocation81_spill] sm:$0xff] %v9061_v7  ;;  %9791 = vst [vmem:[#allocation82_spill] sm:$0xff] %v9063_v28 }
 0x4f5   : > { %v9065_v58 = vpop.permute.xlu1 %4768  ;;  %v9067_v51 = vpop.permute.xlu0 %4770 }
 0x4f6   : > { %9792 = vst [vmem:[#allocation83_spill] sm:$0xff] %v9065_v58  ;;  %9793 = vst [vmem:[#allocation84_spill] sm:$0xff] %v9067_v51 }
 0x4f9   : > { %v9069_v60 = vpop.permute.xlu1 %4772  ;;  %v9071_v62 = vpop.permute.xlu0 %4774 }
 0x4fa   : > { %9794 = vst [vmem:[#allocation85_spill] sm:$0xff] %v9069_v60  ;;  %9795 = vst [vmem:[#allocation86_spill] sm:$0xff] %v9071_v62 }
 0x4fd   : > { %v9073_v8 = vpop.permute.xlu1 %4776  ;;  %v9075_v39 = vpop.permute.xlu0 %4778 }
 0x4fe   : > { %9796 = vst [vmem:[#allocation87_spill] sm:$0xff] %v9073_v8  ;;  %9797 = vst [vmem:[#allocation88_spill] sm:$0xff] %v9075_v39 }
 0x501   : > { %v9077_v22 = vpop.permute.xlu1 %4780  ;;  %v9079_v56 = vpop.permute.xlu0 %4782 }
 0x502   : > { %9798 = vst [vmem:[#allocation89_spill] sm:$0xff] %v9077_v22  ;;  %9799 = vst [vmem:[#allocation90_spill] sm:$0xff] %v9079_v56 }
 0x512   : > { %v4850_v24 = vpop.permute.xlu1 %4849  ;;  %v4854_v7 = vpop.permute.xlu0 %4853 }
 0x513   : > { %v4976_v28 = vmul.f32 %v4850_v24, %v8635_v61  ;;  %v4977_v58 = vmul.f32 %v4854_v7, %v8642_v29 }
 0x515   : > { %5040 = vrot.lane.b32.xlu0 %v4976_v28, %s7616_s4  ;;  %5042 = vrot.lane.b32.xlu1 %v4977_v58, %s7616_s4 }
 0x516   : > { %v4858_v62 = vpop.permute.xlu1 %4857  ;;  %v4866_v60 = vpop.permute.xlu0 %4865 }
 0x517   : > { %v4978_v8 = vmul.f32 %v4858_v62, %v8633_v41  ;;  %v4980_v56 = vmul.f32 %v4866_v60, %v8647_v0 }
 0x519   : > { %5044 = vrot.lane.b32.xlu0 %v4978_v8, %s7616_s4 }
 0x51a   : > { %v4862_v22 = vpop.permute.xlu1 %4861  ;;  %v4874_v39 = vpop.permute.xlu0 %4873 }
 0x51b   : > { %v4979_v51 = vmul.f32 %v4862_v22, %v8637_v3  ;;  %v4982_v24 = vmul.f32 %v4874_v39, %v8653_v44 }
 0x51d   : > { %5046 = vrot.lane.b32.xlu1 %v4979_v51, %s7616_s4  ;;  %5048 = vrot.lane.b32.xlu0 %v4980_v56, %s7616_s4 }
 0x51e   : > { %v4870_v61 = vpop.permute.xlu1 %4869  ;;  %v4882_v29 = vpop.permute.xlu0 %4881 }
 0x51f   : > { %v4981_v7 = vmul.f32 %v4870_v61, %v8644_v26  ;;  %v4984_v0 = vmul.f32 %v4882_v29, %v8659_v12 }
 0x521   : > { %5050 = vrot.lane.b32.xlu1 %v4981_v7, %s7616_s4  ;;  %5052 = vrot.lane.b32.xlu0 %v4982_v24, %s7616_s4 }
 0x522   : > { %v4878_v41 = vpop.permute.xlu1 %4877  ;;  %v4890_v8 = vpop.permute.xlu0 %4889 }
 0x523   : > { %v4983_v3 = vmul.f32 %v4878_v41, %v8651_v43  ;;  %v4986_v44 = vmul.f32 %v4890_v8, %v8673_v37 }
 0x525   : > { %5054 = vrot.lane.b32.xlu1 %v4983_v3, %s7616_s4  ;;  %5056 = vrot.lane.b32.xlu0 %v4984_v0, %s7616_s4 }
 0x526   : > { %v4886_v28 = vpop.permute.xlu1 %4885  ;;  %v4898_v58 = vpop.permute.xlu0 %4897 }
 0x527   : > { %v4985_v26 = vmul.f32 %v4886_v28, %v8657_v15  ;;  %v4988_v12 = vmul.f32 %v4898_v58, %v8685_v10 }
 0x529   : > { %5058 = vrot.lane.b32.xlu1 %v4985_v26, %s7616_s4  ;;  %5060 = vrot.lane.b32.xlu0 %v4986_v44, %s7616_s4 }
 0x52a   : > { %v4894_v51 = vpop.permute.xlu1 %4893  ;;  %v4906_v60 = vpop.permute.xlu0 %4905 }
 0x52b   : > { %v4987_v43 = vmul.f32 %v4894_v51, %v8668_v18  ;;  %v4990_v37 = vmul.f32 %v4906_v60, %v8697_v49 }
 0x52d   : > { %5062 = vrot.lane.b32.xlu1 %v4987_v43, %s7616_s4  ;;  %5064 = vrot.lane.b32.xlu0 %v4988_v12, %s7616_s4 }
 0x52e   : > { %v4902_v62 = vpop.permute.xlu1 %4901  ;;  %v4914_v39 = vpop.permute.xlu0 %4913 }
 0x52f   : > { %v4989_v15 = vmul.f32 %v4902_v62, %v8680_v40  ;;  %v4992_v10 = vmul.f32 %v4914_v39, %v8709_v2 }
 0x531   : > { %5066 = vrot.lane.b32.xlu1 %v4989_v15, %s7616_s4  ;;  %5068 = vrot.lane.b32.xlu0 %v4990_v37, %s7616_s4 }
 0x532   : > { %v4910_v22 = vpop.permute.xlu1 %4909  ;;  %v4922_v56 = vpop.permute.xlu0 %4921 }
 0x533   : > { %v4991_v18 = vmul.f32 %v4910_v22, %v8692_v30  ;;  %v4994_v49 = vmul.f32 %v4922_v56, %v8721_v23 }
 0x535   : > { %5070 = vrot.lane.b32.xlu1 %v4991_v18, %s7616_s4  ;;  %5072 = vrot.lane.b32.xlu0 %v4992_v10, %s7616_s4 }
 0x536   : > { %v4918_v61 = vpop.permute.xlu1 %4917  ;;  %v4930_v29 = vpop.permute.xlu0 %4929 }
 0x537   : > { %v4993_v40 = vmul.f32 %v4918_v61, %v8704_v53  ;;  %v4996_v2 = vmul.f32 %v4930_v29, %v8733_v21 }
 0x539   : > { %5074 = vrot.lane.b32.xlu1 %v4993_v40, %s7616_s4  ;;  %5076 = vrot.lane.b32.xlu0 %v4994_v49, %s7616_s4 }
 0x53a   : > { %v4926_v24 = vpop.permute.xlu1 %4925  ;;  %v4938_v7 = vpop.permute.xlu0 %4937 }
 0x53b   : > { %v4995_v30 = vmul.f32 %v4926_v24, %v8716_v55  ;;  %v4998_v23 = vmul.f32 %v4938_v7, %v8745_v47 }
 0x53d   : > { %5078 = vrot.lane.b32.xlu1 %v4995_v30, %s7616_s4  ;;  %5080 = vrot.lane.b32.xlu0 %v4996_v2, %s7616_s4 }
 0x53e   : > { %v4934_v41 = vpop.permute.xlu1 %4933  ;;  %v4946_v8 = vpop.permute.xlu0 %4945 }
 0x53f   : > { %v4997_v53 = vmul.f32 %v4934_v41, %v8728_v57  ;;  %v5000_v21 = vmul.f32 %v4946_v8, %v8757_v16  ;;  %v9241_v8 = vld [vmem:[#allocation2] sm:$0xff] }
 0x541   : > { %5082 = vrot.lane.b32.xlu1 %v4997_v53, %s7616_s4  ;;  %5084 = vrot.lane.b32.xlu0 %v4998_v23, %s7616_s4 }
 0x542   : > { %v4942_v0 = vpop.permute.xlu1 %4941  ;;  %v4954_v3 = vpop.permute.xlu0 %4953 }
 0x543   : > { %v4999_v55 = vmul.f32 %v4942_v0, %v8740_v6  ;;  %v5002_v47 = vmul.f32 %v4954_v3, %v8769_v32  ;;  %v9245_v3 = vld [vmem:[#allocation2 + $0x8] sm:$0xff] }
 0x545   : > { %5086 = vrot.lane.b32.xlu1 %v4999_v55, %s7616_s4  ;;  %5088 = vrot.lane.b32.xlu0 %v5000_v21, %s7616_s4 }
 0x546   : > { %v4950_v28 = vpop.permute.xlu1 %4949  ;;  %v4962_v58 = vpop.permute.xlu0 %4961 }
 0x547   : > { %v5001_v57 = vmul.f32 %v4950_v28, %v8752_v52  ;;  %v5004_v26 = vmul.f32 %v4962_v58, %v8781_v50  ;;  %v9249_v58 = vld [vmem:[#allocation2 + $0x18] sm:$0xff] }
 0x549   : > { %5090 = vrot.lane.b32.xlu1 %v5001_v57, %s7616_s4  ;;  %5092 = vrot.lane.b32.xlu0 %v5002_v47, %s7616_s4  ;;  %v9252_v57 = vld [vmem:[#allocation2 + $0x10] sm:$0xff] }
 0x54a   : > { %v4958_v44 = vpop.permute.xlu1 %4957  ;;  %v4970_v6 = vpop.permute.xlu0 %4969 }
 0x54b   : > { %v5003_v16 = vmul.f32 %v4958_v44, %v8764_v20  ;;  %v5006_v60 = vmul.f32 %v4970_v6, %v8793_v45  ;;  %v9257_v6 = vld [vmem:[#allocation2 + $0x28] sm:$0xff] }
 0x54d   : > { %5094 = vrot.lane.b32.xlu1 %v5003_v16, %s7616_s4  ;;  %5096 = vrot.lane.b32.xlu0 %v5004_v26, %s7616_s4 }
 0x54e   : > { %v4966_v51 = vpop.permute.xlu1 %4965 }
 0x54f   : > { %v5005_v32 = vmul.f32 %v4966_v51, %v8776_v38 }
 0x551   : > { %5098 = vrot.lane.b32.xlu1 %v5005_v32, %s7616_s4  ;;  %5100 = vrot.lane.b32.xlu0 %v5006_v60, %s7616_s4  ;;  %v9260_v60 = vld [vmem:[#allocation2 + $0x20] sm:$0xff] }
 0x552   : > { %v4974_v52 = vpop.permute.xlu1 %4973 }
 0x553   : > { %v5007_v12 = vmul.f32 %v4974_v52, %v9757_v11 }
 0x555   : > { %5102 = vrot.lane.b32.xlu1 %v5007_v12, %s7616_s4  ;;  %5169 = vperm.xlu0 %7294, %v8664_v4   ;;  %v9801_v4 = vld [vmem:[#allocation19_spill] sm:$0xff] }
 0x559   : > { %5173 = vperm.xlu1 %7295, %v8675_v5   ;;  %5181 = vperm.xlu0 %7294, %v8670_v19   ;;  %v9802_v19 = vld [vmem:[#allocation20_spill] sm:$0xff]  ;;  %v9803_v5 = vld [vmem:[#allocation21_spill] sm:$0xff] }
 0x55d   : > { %5177 = vperm.xlu1 %7295, %v8661_v46   ;;  %5189 = vperm.xlu0 %7294, %v8682_v14   ;;  %v9800_v46 = vld [vmem:[#allocation17_spill] sm:$0xff] }
 0x561   : > { %5185 = vperm.xlu1 %7295, %v8687_v25   ;;  %5197 = vperm.xlu0 %7294, %v8694_v35   ;;  %v9804_v25 = vld [vmem:[#allocation22_spill] sm:$0xff]  ;;  %v9805_v35 = vld [vmem:[#allocation23_spill] sm:$0xff] }
 0x565   : > { %5193 = vperm.xlu1 %7295, %v8699_v63   ;;  %5205 = vperm.xlu0 %7294, %v8706_v31  }
 0x569   : > { %5201 = vperm.xlu1 %7295, %v8711_v42   ;;  %5213 = vperm.xlu0 %7294, %v8718_v33   ;;  %v9806_v42 = vld [vmem:[#allocation24_spill] sm:$0xff]  ;;  %v9807_v33 = vld [vmem:[#allocation25_spill] sm:$0xff] }
 0x56d   : > { %5209 = vperm.xlu1 %7295, %v8723_v34   ;;  %5221 = vperm.xlu0 %7294, %v8730_v13  }
 0x571   : > { %5217 = vperm.xlu1 %7295, %v8735_v17   ;;  %5229 = vperm.xlu0 %7294, %v8742_v59   ;;  %v9808_v17 = vld [vmem:[#allocation26_spill] sm:$0xff]  ;;  %v9809_v59 = vld [vmem:[#allocation27_spill] sm:$0xff] }
 0x575   : > { %5225 = vperm.xlu1 %7295, %v8747_v1   ;;  %5237 = vperm.xlu0 %7294, %v8754_v48  }
 0x579   : > { %5233 = vperm.xlu1 %7295, %v8759_v36   ;;  %5245 = vperm.xlu0 %7294, %v8766_v54   ;;  %v9810_v36 = vld [vmem:[#allocation28_spill] sm:$0xff] }
 0x57d   : > { %5241 = vperm.xlu1 %7295, %v8771_v9   ;;  %5253 = vperm.xlu0 %7294, %v9758_v27  }
 0x581   : > { %5249 = vperm.xlu1 %7295, %v9800_v46   ;;  %5261 = vperm.xlu0 %7294, %v9801_v4   ;;  %v9265_v46 = vld [vmem:[#allocation2 + $0x38] sm:$0xff] }
 0x585   : > { %5257 = vperm.xlu1 %7295, %v9802_v19   ;;  %5269 = vperm.xlu0 %7294, %v9803_v5   ;;  %v9268_v19 = vld [vmem:[#allocation2 + $0x30] sm:$0xff] }
 0x587   : > { %v9170_v14 = vpop.permute.xlu0 %5040  ;;  %v9174_v63 = vpop.permute.xlu1 %5042 }
 0x589   : > { %5265 = vperm.xlu1 %7295, %v9804_v25   ;;  %5277 = vperm.xlu0 %7294, %v9805_v35  }
 0x58b   : > { %v9176_v31 = vpop.permute.xlu0 %5044 }
 0x58d   : > { %5273 = vperm.xlu1 %7295, %v9806_v42   ;;  %5285 = vperm.xlu0 %7294, %v9807_v33   ;;  %v9273_v42 = vld [vmem:[#allocation2 + $0x48] sm:$0xff] }
 0x58f   : > { %v9180_v34 = vpop.permute.xlu1 %5046  ;;  %v9182_v13 = vpop.permute.xlu0 %5048 }
 0x591   : > { %5281 = vperm.xlu1 %7295, %v9808_v17   ;;  %5293 = vperm.xlu0 %7294, %v9809_v59   ;;  %v9276_v17 = vld [vmem:[#allocation2 + $0x40] sm:$0xff] }
 0x593   : > { %v9186_v1 = vpop.permute.xlu1 %5050  ;;  %v9188_v48 = vpop.permute.xlu0 %5052 }
 0x595   : > { %5289 = vperm.xlu1 %7295, %v9810_v36  }
 0x597   : > { %v9191_v20 = vpop.permute.xlu1 %5054  ;;  %v9193_v54 = vpop.permute.xlu0 %5056 }
 0x59b   : > { %v9195_v9 = vpop.permute.xlu1 %5058  ;;  %v9197_v38 = vpop.permute.xlu0 %5060 }
 0x59f   : > { %v9199_v50 = vpop.permute.xlu1 %5062  ;;  %v9201_v45 = vpop.permute.xlu0 %5064 }
 0x5a3   : > { %v9203_v11 = vpop.permute.xlu1 %5066  ;;  %v9205_v27 = vpop.permute.xlu0 %5068 }
 0x5a7   : > { %v9207_v43 = vpop.permute.xlu1 %5070  ;;  %v9209_v62 = vpop.permute.xlu0 %5072 }
 0x5ab   : > { %v9211_v39 = vpop.permute.xlu1 %5074  ;;  %v9213_v37 = vpop.permute.xlu0 %5076 }
 0x5af   : > { %v9215_v15 = vpop.permute.xlu1 %5078  ;;  %v9217_v22 = vpop.permute.xlu0 %5080 }
 0x5b3   : > { %v9219_v56 = vpop.permute.xlu1 %5082  ;;  %v9221_v10 = vpop.permute.xlu0 %5084 }
 0x5b4   : > { %9811 = vst [vmem:[#allocation17_spill] sm:$0xff] %v9221_v10 }
 0x5b7   : > { %v9223_v18 = vpop.permute.xlu1 %5086  ;;  %v9225_v61 = vpop.permute.xlu0 %5088 }
 0x5b8   : > { %9812 = vst [vmem:[#allocation19_spill] sm:$0xff] %v9223_v18  ;;  %9813 = vst [vmem:[#allocation20_spill] sm:$0xff] %v9225_v61 }
 0x5bb   : > { %v9227_v29 = vpop.permute.xlu1 %5090  ;;  %v9229_v49 = vpop.permute.xlu0 %5092 }
 0x5bc   : > { %9814 = vst [vmem:[#allocation21_spill] sm:$0xff] %v9227_v29  ;;  %9815 = vst [vmem:[#allocation22_spill] sm:$0xff] %v9229_v49 }
 0x5bf   : > { %v9231_v40 = vpop.permute.xlu1 %5094  ;;  %v9233_v24 = vpop.permute.xlu0 %5096 }
 0x5c0   : > { %9816 = vst [vmem:[#allocation23_spill] sm:$0xff] %v9231_v40  ;;  %9817 = vst [vmem:[#allocation24_spill] sm:$0xff] %v9233_v24  ;;  %v9345_v24 = vld [vmem:[#allocation2 + $0xd8] sm:$0xff] }
 0x5c1   : > { %9821 = vst [vmem:[#allocation28_spill] sm:$0xff] %v9345_v24 }
 0x5c3   : > { %v9235_v7 = vpop.permute.xlu1 %5098  ;;  %v9237_v2 = vpop.permute.xlu0 %5100 }
 0x5c4   : > { %9818 = vst [vmem:[#allocation25_spill] sm:$0xff] %v9235_v7  ;;  %9819 = vst [vmem:[#allocation26_spill] sm:$0xff] %v9237_v2  ;;  %v9337_v2 = vld [vmem:[#allocation2 + $0xc8] sm:$0xff] }
 0x5c7   : > { %v9239_v30 = vpop.permute.xlu1 %5102 }
 0x5c8   : > { %9820 = vst [vmem:[#allocation27_spill] sm:$0xff] %v9239_v30 }
 0x5d4   : > { %v5170_v41 = vpop.permute.xlu0 %5169 }
 0x5d5   : > { %v5296_v23 = vmul.f32 %v9241_v8, %v5170_v41 }
 0x5d7   : > { %5360 = vrot.lane.b32.xlu1 %v5296_v23, %s7617_s25  ;;  %v9281_v23 = vld [vmem:[#allocation2 + $0x58] sm:$0xff] }
 0x5d8   : > { %v5174_v53 = vpop.permute.xlu1 %5173  ;;  %v5182_v0 = vpop.permute.xlu0 %5181 }
 0x5d9   : > { %v5297_v21 = vmul.f32 %v9245_v3, %v5174_v53  ;;  %v5299_v47 = vmul.f32 %v9249_v58, %v5182_v0  ;;  %v9284_v0 = vld [vmem:[#allocation2 + $0x50] sm:$0xff] }
 0x5db   : > { %5362 = vrot.lane.b32.xlu0 %v5297_v21, %s7617_s25 }
 0x5dc   : > { %v5178_v55 = vpop.permute.xlu1 %5177  ;;  %v5190_v28 = vpop.permute.xlu0 %5189 }
 0x5dd   : > { %v5298_v44 = vmul.f32 %v9252_v57, %v5178_v55  ;;  %v5301_v51 = vmul.f32 %v9257_v6, %v5190_v28 }
 0x5df   : > { %5364 = vrot.lane.b32.xlu1 %v5298_v44, %s7617_s25  ;;  %5366 = vrot.lane.b32.xlu0 %v5299_v47, %s7617_s25  ;;  %v9289_v47 = vld [vmem:[#allocation2 + $0x68] sm:$0xff] }
 0x5e0   : > { %v5186_v26 = vpop.permute.xlu1 %5185  ;;  %v5198_v16 = vpop.permute.xlu0 %5197 }
 0x5e1   : > { %v5300_v32 = vmul.f32 %v9260_v60, %v5186_v26  ;;  %v5303_v4 = vmul.f32 %v9265_v46, %v5198_v16  ;;  %v9292_v26 = vld [vmem:[#allocation2 + $0x60] sm:$0xff] }
 0x5e3   : > { %5368 = vrot.lane.b32.xlu1 %v5300_v32, %s7617_s25  ;;  %5370 = vrot.lane.b32.xlu0 %v5301_v51, %s7617_s25 }
 0x5e4   : > { %v5194_v52 = vpop.permute.xlu1 %5193  ;;  %v5206_v12 = vpop.permute.xlu0 %5205 }
 0x5e5   : > { %v5302_v5 = vmul.f32 %v9268_v19, %v5194_v52  ;;  %v5305_v33 = vmul.f32 %v9273_v42, %v5206_v12  ;;  %v9297_v52 = vld [vmem:[#allocation2 + $0x78] sm:$0xff] }
 0x5e7   : > { %5372 = vrot.lane.b32.xlu1 %v5302_v5, %s7617_s25  ;;  %5374 = vrot.lane.b32.xlu0 %v5303_v4, %s7617_s25  ;;  %v9300_v4 = vld [vmem:[#allocation2 + $0x70] sm:$0xff] }
 0x5e8   : > { %v5202_v25 = vpop.permute.xlu1 %5201  ;;  %v5214_v35 = vpop.permute.xlu0 %5213 }
 0x5e9   : > { %v5304_v59 = vmul.f32 %v9276_v17, %v5202_v25  ;;  %v5307_v53 = vmul.f32 %v9281_v23, %v5214_v35 }
 0x5eb   : > { %5376 = vrot.lane.b32.xlu1 %v5304_v59, %s7617_s25  ;;  %5378 = vrot.lane.b32.xlu0 %v5305_v33, %s7617_s25  ;;  %v9305_v33 = vld [vmem:[#allocation2 + $0x88] sm:$0xff] }
 0x5ec   : > { %v5210_v36 = vpop.permute.xlu1 %5209  ;;  %v5222_v41 = vpop.permute.xlu0 %5221 }
 0x5ed   : > { %v5306_v21 = vmul.f32 %v9284_v0, %v5210_v36  ;;  %v5309_v44 = vmul.f32 %v9289_v47, %v5222_v41  ;;  %v9308_v36 = vld [vmem:[#allocation2 + $0x80] sm:$0xff] }
 0x5ef   : > { %5380 = vrot.lane.b32.xlu1 %v5306_v21, %s7617_s25  ;;  %5382 = vrot.lane.b32.xlu0 %v5307_v53, %s7617_s25 }
 0x5f0   : > { %v5218_v55 = vpop.permute.xlu1 %5217  ;;  %v5230_v28 = vpop.permute.xlu0 %5229 }
 0x5f1   : > { %v5308_v16 = vmul.f32 %v9292_v26, %v5218_v55  ;;  %v5311_v12 = vmul.f32 %v9297_v52, %v5230_v28  ;;  %v9313_v55 = vld [vmem:[#allocation2 + $0x98] sm:$0xff] }
 0x5f3   : > { %5384 = vrot.lane.b32.xlu1 %v5308_v16, %s7617_s25  ;;  %5386 = vrot.lane.b32.xlu0 %v5309_v44, %s7617_s25  ;;  %v9316_v44 = vld [vmem:[#allocation2 + $0x90] sm:$0xff] }
 0x5f4   : > { %v5226_v51 = vpop.permute.xlu1 %5225  ;;  %v5238_v32 = vpop.permute.xlu0 %5237 }
 0x5f5   : > { %v5310_v5 = vmul.f32 %v9300_v4, %v5226_v51  ;;  %v5313_v59 = vmul.f32 %v9305_v33, %v5238_v32 }
 0x5f7   : > { %5388 = vrot.lane.b32.xlu1 %v5310_v5, %s7617_s25  ;;  %5390 = vrot.lane.b32.xlu0 %v5311_v12, %s7617_s25  ;;  %v9321_v12 = vld [vmem:[#allocation2 + $0xa8] sm:$0xff] }
 0x5f8   : > { %v5234_v25 = vpop.permute.xlu1 %5233  ;;  %v5246_v35 = vpop.permute.xlu0 %5245 }
 0x5f9   : > { %v5312_v41 = vmul.f32 %v9308_v36, %v5234_v25  ;;  %v5315_v28 = vmul.f32 %v9313_v55, %v5246_v35  ;;  %v9324_v25 = vld [vmem:[#allocation2 + $0xa0] sm:$0xff] }
 0x5fb   : > { %5392 = vrot.lane.b32.xlu1 %v5312_v41, %s7617_s25  ;;  %5394 = vrot.lane.b32.xlu0 %v5313_v59, %s7617_s25 }
 0x5fc   : > { %v5242_v53 = vpop.permute.xlu1 %5241  ;;  %v5254_v21 = vpop.permute.xlu0 %5253 }
 0x5fd   : > { %v5314_v16 = vmul.f32 %v9316_v44, %v5242_v53  ;;  %v5317_v5 = vmul.f32 %v9321_v12, %v5254_v21  ;;  %v9329_v53 = vld [vmem:[#allocation2 + $0xb8] sm:$0xff] }
 0x5ff   : > { %5396 = vrot.lane.b32.xlu1 %v5314_v16, %s7617_s25  ;;  %5398 = vrot.lane.b32.xlu0 %v5315_v28, %s7617_s25  ;;  %v9332_v16 = vld [vmem:[#allocation2 + $0xb0] sm:$0xff] }
 0x600   : > { %v5250_v51 = vpop.permute.xlu1 %5249  ;;  %v5262_v32 = vpop.permute.xlu0 %5261 }
 0x601   : > { %v5316_v59 = vmul.f32 %v9324_v25, %v5250_v51  ;;  %v5319_v28 = vmul.f32 %v9329_v53, %v5262_v32 }
 0x603   : > { %5400 = vrot.lane.b32.xlu1 %v5316_v59, %s7617_s25  ;;  %5402 = vrot.lane.b32.xlu0 %v5317_v5, %s7617_s25  ;;  %v9340_v59 = vld [vmem:[#allocation2 + $0xc0] sm:$0xff] }
 0x604   : > { %v5258_v35 = vpop.permute.xlu1 %5257  ;;  %v5270_v41 = vpop.permute.xlu0 %5269 }
 0x605   : > { %v5318_v30 = vmul.f32 %v9332_v16, %v5258_v35  ;;  %v5321_v5 = vmul.f32 %v9337_v2, %v5270_v41 }
 0x607   : > { %5404 = vrot.lane.b32.xlu1 %v5318_v30, %s7617_s25  ;;  %5406 = vrot.lane.b32.xlu0 %v5319_v28, %s7617_s25  ;;  %v9348_v28 = vld [vmem:[#allocation2 + $0xd0] sm:$0xff] }
 0x608   : > { %v5266_v21 = vpop.permute.xlu1 %5265  ;;  %v5278_v51 = vpop.permute.xlu0 %5277  ;;  %9822 = vst [vmem:[#allocation91_spill] sm:$0xff] %v9348_v28 }
 0x609   : > { %v5320_v7 = vmul.f32 %v9340_v59, %v5266_v21  ;;  %v5323_v30 = vmul.f32 %v9345_v24, %v5278_v51  ;;  %v9353_v21 = vld [vmem:[#allocation2 + $0xe8] sm:$0xff] }
 0x60a   : > { %9823 = vst [vmem:[#allocation92_spill] sm:$0xff] %v9353_v21 }
 0x60b   : > { %5408 = vrot.lane.b32.xlu1 %v5320_v7, %s7617_s25  ;;  %5410 = vrot.lane.b32.xlu0 %v5321_v5, %s7617_s25  ;;  %v9356_v5 = vld [vmem:[#allocation2 + $0xe0] sm:$0xff] }
 0x60c   : > { %v5274_v32 = vpop.permute.xlu1 %5273  ;;  %v5286_v35 = vpop.permute.xlu0 %5285  ;;  %9824 = vst [vmem:[#allocation93_spill] sm:$0xff] %v9356_v5 }
 0x60d   : > { %v5322_v40 = vmul.f32 %v9348_v28, %v5274_v32  ;;  %v5325_v7 = vmul.f32 %v9353_v21, %v5286_v35  ;;  %v9361_v32 = vld [vmem:[#allocation2 + $0xf8] sm:$0xff]  ;;  %v9827_v35 = vld [vmem:[#allocation30_spill] sm:$0xff]  ;;  %v9829_v21 = vld [vmem:[#allocation32_spill] sm:$0xff] }
 0x60e   : > { %9825 = vst [vmem:[#allocation94_spill] sm:$0xff] %v9361_v32 }
 0x60f   : > { %5412 = vrot.lane.b32.xlu1 %v5322_v40, %s7617_s25  ;;  %5414 = vrot.lane.b32.xlu0 %v5323_v30, %s7617_s25  ;;  %v9364_v30 = vld [vmem:[#allocation2 + $0xf0] sm:$0xff] }
 0x610   : > { %v5282_v41 = vpop.permute.xlu1 %5281  ;;  %v5294_v29 = vpop.permute.xlu0 %5293  ;;  %9826 = vst [vmem:[#allocation95_spill] sm:$0xff] %v9364_v30 }
 0x611   : > { %v5324_v49 = vmul.f32 %v9356_v5, %v5282_v41  ;;  %v5327_v40 = vmul.f32 %v9361_v32, %v5294_v29  ;;  %v4464_v41 = vmul.f32 %v9241_v8, %v9827_v35  ;;  %v9828_v5 = vld [vmem:[#allocation16_spill] sm:$0xff]  ;;  %v9830_v32 = vld [vmem:[#allocation18_spill] sm:$0xff] }
 0x613   : > { %5416 = vrot.lane.b32.xlu1 %v5324_v49, %s7617_s25  ;;  %5418 = vrot.lane.b32.xlu0 %v5325_v7, %s7617_s25  ;;  %v4816_v49 = vadd.f32 %v9828_v5, %v4464_v41  ;;  %v4465_v7 = vmul.f32 %v9245_v3, %v9829_v21  ;;  %v9833_v41 = vld [vmem:[#allocation61_spill] sm:$0xff]  ;;  %v9834_v21 = vld [vmem:[#allocation62_spill] sm:$0xff] }
 0x614   : > { %v5290_v51 = vpop.permute.xlu1 %5289 }
 0x615   : > { %v5326_v61 = vmul.f32 %v9364_v30, %v5290_v51  ;;  %v5136_v28 = vadd.f32 %v9170_v14, %v4816_v49  ;;  %v4817_v24 = vadd.f32 %v9830_v32, %v4465_v7  ;;  %v9831_v51 = vld [vmem:[#allocation29_spill] sm:$0xff]  ;;  %v9835_v32 = vld [vmem:[#allocation34_spill] sm:$0xff] }
 0x617   : > { %5420 = vrot.lane.b32.xlu1 %v5326_v61, %s7617_s25  ;;  %5422 = vrot.lane.b32.xlu0 %v5327_v40, %s7617_s25  ;;  %v4466_v61 = vmul.f32 %v9252_v57, %v9831_v51  ;;  %v9832_v40 = vld [vmem:[#allocation31_spill] sm:$0xff]  ;;  %v5137_v8 = vadd.f32 %v9174_v63, %v4817_v24  ;;  %v9836_v57 = vld [vmem:[#allocation33_spill] sm:$0xff] }
 0x618   : > { %v4467_v30 = vmul.f32 %v9249_v58, %v9832_v40  ;;  %v4469_v7 = vmul.f32 %v9257_v6, %v9836_v57  ;;  %v9837_v24 = vld [vmem:[#allocation63_spill] sm:$0xff] }
 0x619   : > { %v4818_v3 = vadd.f32 %v9833_v41, %v4466_v61  ;;  %v9838_v61 = vld [vmem:[#allocation64_spill] sm:$0xff] }
 0x61a   : > { %v4819_v10 = vadd.f32 %v9834_v21, %v4467_v30  ;;  %v4821_v40 = vadd.f32 %v9838_v61, %v4469_v7  ;;  %v9840_v21 = vld [vmem:[#allocation36_spill] sm:$0xff] }
 0x61b   : > { %v5138_v58 = vadd.f32 %v9176_v31, %v4818_v3  ;;  %v4470_v6 = vmul.f32 %v9268_v19, %v9840_v21 }
 0x61c   : > { %v5139_v63 = vadd.f32 %v9180_v34, %v4819_v10  ;;  %v5141_v34 = vadd.f32 %v9186_v1, %v4821_v40  ;;  %v9845_v40 = vld [vmem:[#allocation67_spill] sm:$0xff] }
 0x649   : > { %v5361_v29 = vpop.permute.xlu1 %5360 }
 0x64a   : > { %v5456_v18 = vadd.f32 %v5361_v29, %v5136_v28  ;;  %v4468_v28 = vmul.f32 %v9260_v60, %v9835_v32  ;;  %v9839_v60 = vld [vmem:[#allocation35_spill] sm:$0xff]  ;;  %v9842_v32 = vld [vmem:[#allocation66_spill] sm:$0xff] }
 0x64b   : > { %v4471_v41 = vmul.f32 %v9265_v46, %v9839_v60 }
 0x64c   : > { %v5488_v5 = vmul.f32 0.25, %v5456_v18  ;;  %v4820_v29 = vadd.f32 %v9837_v24, %v4468_v28 }
 0x64d   : > { %v5363_v35 = vpop.permute.xlu0 %5362  ;;  %v4823_v28 = vadd.f32 %v9842_v32, %v4471_v41  ;;  %v9849_v32 = vld [vmem:[#allocation69_spill] sm:$0xff] }
 0x64e   : > { %v5521_v14 = vsel %vm5520_vm0, %v5488_v5, 0.0  ;;  %v5457_v49 = vadd.f32 %v5363_v35, %v5137_v8  ;;  %v5140_v31 = vadd.f32 %v9182_v13, %v4820_v29  ;;  %v9844_v13 = vld [vmem:[#allocation38_spill] sm:$0xff] }
 0x64f   : > { %5553 = vst [vmem:[%s7901_s30] sm:$0xff] %v5521_v14  ;;  %v9841_v14 = vld [vmem:[#allocation65_spill] sm:$0xff]  ;;  %v4472_v1 = vmul.f32 %v9276_v17, %v9844_v13 }
 0x650   : > { %v5489_v18 = vmul.f32 0.25, %v5457_v49  ;;  %v4822_v49 = vadd.f32 %v9841_v14, %v4470_v6 }
 0x651   : > { %v5365_v51 = vpop.permute.xlu1 %5364  ;;  %v5367_v30 = vpop.permute.xlu0 %5366 }
 0x652   : > { %v5522_v8 = vsel %vm5520_vm0, %v5489_v18, 0.0  ;;  %v5458_v5 = vadd.f32 %v5365_v51, %v5138_v58  ;;  %v5459_v35 = vadd.f32 %v5367_v30, %v5139_v63  ;;  %v9843_v18 = vld [vmem:[#allocation37_spill] sm:$0xff]  ;;  %v5142_v29 = vadd.f32 %v9188_v48, %v4822_v49  ;;  %v9848_v48 = vld [vmem:[#allocation40_spill] sm:$0xff] }
 0x653   : > { %5554 = vst [vmem:[%s7901_s30 + $0x8] sm:$0xff] %v5522_v8  ;;  %v4473_v24 = vmul.f32 %v9273_v42, %v9843_v18  ;;  %v5143_v51 = vadd.f32 %v9191_v20, %v4823_v28  ;;  %v4824_v8 = vadd.f32 %v9845_v40, %v4472_v1  ;;  %v4474_v20 = vmul.f32 %v9284_v0, %v9848_v48  ;;  %v9851_v18 = vld [vmem:[#allocation41_spill] sm:$0xff]  ;;  %v9854_v40 = vld [vmem:[#allocation72_spill] sm:$0xff] }
 0x654   : > { %v5490_v10 = vmul.f32 0.25, %v5458_v5  ;;  %v5491_v3 = vmul.f32 0.25, %v5459_v35  ;;  %v9846_v5 = vld [vmem:[#allocation68_spill] sm:$0xff]  ;;  %v9857_v48 = vld [vmem:[#allocation73_spill] sm:$0xff] }
 0x655   : > { %v5369_v57 = vpop.permute.xlu1 %5368  ;;  %v5371_v7 = vpop.permute.xlu0 %5370  ;;  %v4825_v35 = vadd.f32 %v9846_v5, %v4473_v24  ;;  %v4826_v28 = vadd.f32 %v9849_v32, %v4474_v20  ;;  %v4477_v24 = vmul.f32 %v9289_v47, %v9851_v18  ;;  %v9862_v18 = vld [vmem:[#allocation76_spill] sm:$0xff] }
 0x656   : > { %v5523_v46 = vsel %vm5520_vm0, %v5490_v10, 0.0  ;;  %v5524_v58 = vsel %vm5520_vm0, %v5491_v3, 0.0  ;;  %v5460_v19 = vadd.f32 %v5369_v57, %v5140_v31  ;;  %v5461_v63 = vadd.f32 %v5371_v7, %v5141_v34  ;;  %v9847_v31 = vld [vmem:[#allocation39_spill] sm:$0xff]  ;;  %v9850_v57 = vld [vmem:[#allocation70_spill] sm:$0xff] }
 0x657   : > { %5555 = vst [vmem:[%s7901_s30 + $0x10] sm:$0xff] %v5523_v46  ;;  %5556 = vst [vmem:[%s7901_s30 + $0x18] sm:$0xff] %v5524_v58  ;;  %v4475_v34 = vmul.f32 %v9281_v23, %v9847_v31  ;;  %v5144_v10 = vadd.f32 %v9193_v54, %v4824_v8  ;;  %v5145_v3 = vadd.f32 %v9195_v9, %v4825_v35  ;;  %v9852_v54 = vld [vmem:[#allocation42_spill] sm:$0xff] }
 0x658   : > { %v5492_v30 = vmul.f32 0.25, %v5460_v19  ;;  %v5493_v61 = vmul.f32 0.25, %v5461_v63  ;;  %v4476_v9 = vmul.f32 %v9292_v26, %v9852_v54  ;;  %v5146_v13 = vadd.f32 %v9197_v38, %v4826_v28  ;;  %v9856_v38 = vld [vmem:[#allocation44_spill] sm:$0xff] }
 0x659   : > { %v5373_v60 = vpop.permute.xlu1 %5372  ;;  %v5375_v41 = vpop.permute.xlu0 %5374  ;;  %v4827_v7 = vadd.f32 %v9850_v57, %v4475_v34  ;;  %v4829_v8 = vadd.f32 %v9854_v40, %v4477_v24  ;;  %v9859_v57 = vld [vmem:[#allocation45_spill] sm:$0xff] }
 0x65a   : > { %v5525_v42 = vsel %vm5520_vm0, %v5492_v30, 0.0  ;;  %v5526_v17 = vsel %vm5520_vm0, %v5493_v61, 0.0  ;;  %v5462_v21 = vadd.f32 %v5373_v60, %v5142_v29  ;;  %v5463_v6 = vadd.f32 %v5375_v41, %v5143_v51  ;;  %v9853_v30 = vld [vmem:[#allocation71_spill] sm:$0xff] }
 0x65b   : > { %5557 = vst [vmem:[%s7901_s30 + $0x20] sm:$0xff] %v5525_v42  ;;  %5558 = vst [vmem:[%s7901_s30 + $0x28] sm:$0xff] %v5526_v17  ;;  %v5147_v1 = vadd.f32 %v9199_v50, %v4827_v7  ;;  %v4828_v61 = vadd.f32 %v9853_v30, %v4476_v9  ;;  %v9855_v42 = vld [vmem:[#allocation43_spill] sm:$0xff]  ;;  %v4478_v50 = vmul.f32 %v9300_v4, %v9856_v38  ;;  %v9867_v38 = vld [vmem:[#allocation49_spill] sm:$0xff] }
 0x65c   : > { %v5494_v14 = vmul.f32 0.25, %v5462_v21  ;;  %v5495_v49 = vmul.f32 0.25, %v5463_v6  ;;  %v4479_v17 = vmul.f32 %v9297_v52, %v9855_v42  ;;  %v5149_v6 = vadd.f32 %v9203_v11, %v4829_v8 }
 0x65d   : > { %v5377_v46 = vpop.permute.xlu1 %5376  ;;  %v5379_v58 = vpop.permute.xlu0 %5378  ;;  %v5148_v21 = vadd.f32 %v9201_v45, %v4828_v61  ;;  %v4830_v20 = vadd.f32 %v9857_v48, %v4478_v50  ;;  %v4481_v7 = vmul.f32 %v9305_v33, %v9859_v57  ;;  %v9860_v45 = vld [vmem:[#allocation46_spill] sm:$0xff]  ;;  %v4485_v50 = vmul.f32 %v9321_v12, %v9867_v38  ;;  %v9869_v48 = vld [vmem:[#allocation79_spill] sm:$0xff]  ;;  %v9886_v38 = vld [vmem:[#allocation21_spill] sm:$0xff] }
 0x65e   : > { %v5527_v23 = vsel %vm5520_vm0, %v5494_v14, 0.0  ;;  %v5528_v0 = vsel %vm5520_vm0, %v5495_v49, 0.0  ;;  %v5464_v19 = vadd.f32 %v5377_v46, %v5144_v10  ;;  %v5465_v63 = vadd.f32 %v5379_v58, %v5145_v3  ;;  %v9858_v10 = vld [vmem:[#allocation74_spill] sm:$0xff] }
 0x65f   : > { %5559 = vst [vmem:[%s7901_s30 + $0x30] sm:$0xff] %v5527_v23  ;;  %5560 = vst [vmem:[%s7901_s30 + $0x38] sm:$0xff] %v5528_v0  ;;  %v4831_v3 = vadd.f32 %v9858_v10, %v4479_v17  ;;  %v4480_v11 = vmul.f32 %v9308_v36, %v9860_v45  ;;  %v5150_v46 = vadd.f32 %v9205_v27, %v4830_v20  ;;  %v9864_v27 = vld [vmem:[#allocation48_spill] sm:$0xff] }
 0x660   : > { %v5496_v29 = vmul.f32 0.25, %v5464_v19  ;;  %v5497_v51 = vmul.f32 0.25, %v5465_v63  ;;  %v9861_v19 = vld [vmem:[#allocation75_spill] sm:$0xff]  ;;  %v4833_v24 = vadd.f32 %v9862_v18, %v4481_v7  ;;  %v9870_v10 = vld [vmem:[#allocation80_spill] sm:$0xff] }
 0x661   : > { %v5381_v5 = vpop.permute.xlu1 %5380  ;;  %v5383_v35 = vpop.permute.xlu0 %5382  ;;  %v5151_v58 = vadd.f32 %v9207_v43, %v4831_v3  ;;  %v4832_v63 = vadd.f32 %v9861_v19, %v4480_v11  ;;  %v4482_v43 = vmul.f32 %v9316_v44, %v9864_v27  ;;  %v4837_v3 = vadd.f32 %v9870_v10, %v4485_v50  ;;  %v9879_v27 = vld [vmem:[#allocation83_spill] sm:$0xff] }
 0x662   : > { %v5529_v47 = vsel %vm5520_vm0, %v5496_v29, 0.0  ;;  %v5530_v26 = vsel %vm5520_vm0, %v5497_v51, 0.0  ;;  %v5466_v60 = vadd.f32 %v5381_v5, %v5146_v13  ;;  %v5467_v41 = vadd.f32 %v5383_v35, %v5147_v1  ;;  %v9863_v29 = vld [vmem:[#allocation47_spill] sm:$0xff]  ;;  %v9865_v5 = vld [vmem:[#allocation77_spill] sm:$0xff] }
 0x663   : > { %5561 = vst [vmem:[%s7901_s30 + $0x40] sm:$0xff] %v5529_v47  ;;  %5562 = vst [vmem:[%s7901_s30 + $0x48] sm:$0xff] %v5530_v26  ;;  %v4483_v51 = vmul.f32 %v9313_v55, %v9863_v29  ;;  %v5152_v30 = vadd.f32 %v9209_v62, %v4832_v63  ;;  %v5153_v61 = vadd.f32 %v9211_v39, %v4833_v24  ;;  %v9866_v47 = vld [vmem:[#allocation78_spill] sm:$0xff] }
 0x664   : > { %v5498_v31 = vmul.f32 0.25, %v5466_v60  ;;  %v5499_v34 = vmul.f32 0.25, %v5467_v41  ;;  %v4834_v35 = vadd.f32 %v9865_v5, %v4482_v43  ;;  %v9868_v62 = vld [vmem:[#allocation50_spill] sm:$0xff]  ;;  %v5157_v7 = vadd.f32 %v9219_v56, %v4837_v3 }
 0x665   : > { %v5385_v14 = vpop.permute.xlu1 %5384  ;;  %v5387_v49 = vpop.permute.xlu0 %5386  ;;  %v4835_v26 = vadd.f32 %v9866_v47, %v4483_v51  ;;  %v4484_v39 = vmul.f32 %v9324_v25, %v9868_v62  ;;  %v9881_v47 = vld [vmem:[#allocation55_spill] sm:$0xff] }
 0x666   : > { %v5531_v52 = vsel %vm5520_vm0, %v5498_v31, 0.0  ;;  %v5532_v4 = vsel %vm5520_vm0, %v5499_v34, 0.0  ;;  %v5468_v32 = vadd.f32 %v5385_v14, %v5148_v21  ;;  %v5469_v28 = vadd.f32 %v5387_v49, %v5149_v6 }
 0x667   : > { %5563 = vst [vmem:[%s7901_s30 + $0x50] sm:$0xff] %v5531_v52  ;;  %5564 = vst [vmem:[%s7901_s30 + $0x58] sm:$0xff] %v5532_v4  ;;  %v5154_v21 = vadd.f32 %v9213_v37, %v4834_v35  ;;  %v5155_v6 = vadd.f32 %v9215_v15, %v4835_v26  ;;  %v4836_v20 = vadd.f32 %v9869_v48, %v4484_v39  ;;  %v9872_v37 = vld [vmem:[#allocation52_spill] sm:$0xff] }
 0x668   : > { %v5500_v23 = vmul.f32 0.25, %v5468_v32  ;;  %v5501_v0 = vmul.f32 0.25, %v5469_v28  ;;  %v9871_v32 = vld [vmem:[#allocation51_spill] sm:$0xff]  ;;  %v4486_v15 = vmul.f32 %v9332_v16, %v9872_v37  ;;  %v9882_v26 = vld [vmem:[#allocation28_spill] sm:$0xff]  ;;  %v9893_v37 = vld [vmem:[#allocation22_spill] sm:$0xff] }
 0x669   : > { %v5389_v54 = vpop.permute.xlu1 %5388  ;;  %v5391_v9 = vpop.permute.xlu0 %5390  ;;  %v4487_v28 = vmul.f32 %v9329_v53, %v9871_v32  ;;  %v5156_v57 = vadd.f32 %v9217_v22, %v4836_v20  ;;  %v9876_v22 = vld [vmem:[#allocation54_spill] sm:$0xff]  ;;  %v9892_v32 = vld [vmem:[#allocation93_spill] sm:$0xff] }
 0x66a   : > { %v5533_v33 = vsel %vm5520_vm0, %v5500_v23, 0.0  ;;  %v5534_v36 = vsel %vm5520_vm0, %v5501_v0, 0.0  ;;  %v5470_v13 = vadd.f32 %v5389_v54, %v5150_v46  ;;  %v5471_v1 = vadd.f32 %v5391_v9, %v5151_v58  ;;  %v9873_v46 = vld [vmem:[#allocation81_spill] sm:$0xff]  ;;  %v9874_v23 = vld [vmem:[#allocation82_spill] sm:$0xff] }
 0x66b   : > { %5565 = vst [vmem:[%s7901_s30 + $0x60] sm:$0xff] %v5533_v33  ;;  %5566 = vst [vmem:[%s7901_s30 + $0x68] sm:$0xff] %v5534_v36  ;;  %v4838_v58 = vadd.f32 %v9873_v46, %v4486_v15  ;;  %v4839_v0 = vadd.f32 %v9874_v23, %v4487_v28  ;;  %v9875_v54 = vld [vmem:[#allocation53_spill] sm:$0xff]  ;;  %v4488_v56 = vmul.f32 %v9340_v59, %v9876_v22  ;;  %v9895_v46 = vld [vmem:[#allocation87_spill] sm:$0xff] }
 0x66c   : > { %v5502_v40 = vmul.f32 0.25, %v5470_v13  ;;  %v5503_v8 = vmul.f32 0.25, %v5471_v1  ;;  %v4489_v9 = vmul.f32 %v9337_v2, %v9875_v54  ;;  %v9877_v33 = vld [vmem:[#allocation17_spill] sm:$0xff]  ;;  %v9878_v13 = vld [vmem:[#allocation19_spill] sm:$0xff]  ;;  %v9896_v23 = vld [vmem:[#allocation88_spill] sm:$0xff] }
 0x66d   : > { %v5393_v60 = vpop.permute.xlu1 %5392  ;;  %v5395_v41 = vpop.permute.xlu0 %5394  ;;  %v5158_v36 = vadd.f32 %v9877_v33, %v4838_v58  ;;  %v5159_v1 = vadd.f32 %v9878_v13, %v4839_v0  ;;  %v4840_v43 = vadd.f32 %v9879_v27, %v4488_v56  ;;  %v9897_v54 = vld [vmem:[#allocation59_spill] sm:$0xff]  ;;  %v9899_v56 = vld [vmem:[#allocation60_spill] sm:$0xff] }
 0x66e   : > { %v5535_v55 = vsel %vm5520_vm0, %v5502_v40, 0.0  ;;  %v5536_v44 = vsel %vm5520_vm0, %v5503_v8, 0.0  ;;  %v5472_v42 = vadd.f32 %v5393_v60, %v5152_v30  ;;  %v5473_v17 = vadd.f32 %v5395_v41, %v5153_v61  ;;  %v9880_v30 = vld [vmem:[#allocation84_spill] sm:$0xff]  ;;  %v9900_v33 = vld [vmem:[#allocation95_spill] sm:$0xff] }
 0x66f   : > { %5567 = vst [vmem:[%s7901_s30 + $0x70] sm:$0xff] %v5535_v55  ;;  %5568 = vst [vmem:[%s7901_s30 + $0x78] sm:$0xff] %v5536_v44  ;;  %v4841_v61 = vadd.f32 %v9880_v30, %v4489_v9  ;;  %v4491_v60 = vmul.f32 %v9882_v26, %v9881_v47  ;;  %v9883_v41 = vld [vmem:[#allocation56_spill] sm:$0xff]  ;;  %v9884_v55 = vld [vmem:[#allocation91_spill] sm:$0xff] }
 0x670   : > { %v5504_v31 = vmul.f32 0.25, %v5472_v42  ;;  %v5505_v34 = vmul.f32 0.25, %v5473_v17  ;;  %v4490_v44 = vmul.f32 %v9884_v55, %v9883_v41  ;;  %v9885_v42 = vld [vmem:[#allocation20_spill] sm:$0xff]  ;;  %v9898_v9 = vld [vmem:[#allocation94_spill] sm:$0xff]  ;;  %v9903_v30 = vld [vmem:[#allocation89_spill] sm:$0xff] }
 0x671   : > { %v5397_v14 = vpop.permute.xlu1 %5396  ;;  %v5399_v49 = vpop.permute.xlu0 %5398  ;;  %v5160_v17 = vadd.f32 %v9885_v42, %v4840_v43  ;;  %v5161_v50 = vadd.f32 %v9886_v38, %v4841_v61  ;;  %v4495_v22 = vmul.f32 %v9898_v9, %v9897_v54  ;;  %v9901_v13 = vld [vmem:[#allocation24_spill] sm:$0xff]  ;;  %v9906_v55 = vld [vmem:[#allocation27_spill] sm:$0xff] }
 0x672   : > { %v5537_v12 = vsel %vm5520_vm0, %v5504_v31, 0.0  ;;  %v5538_v25 = vsel %vm5520_vm0, %v5505_v34, 0.0  ;;  %v5474_v52 = vadd.f32 %v5397_v14, %v5154_v21  ;;  %v5475_v4 = vadd.f32 %v5399_v49, %v5155_v6  ;;  %v9887_v21 = vld [vmem:[#allocation85_spill] sm:$0xff]  ;;  %v9888_v31 = vld [vmem:[#allocation86_spill] sm:$0xff] }
 0x673   : > { %5569 = vst [vmem:[%s7901_s30 + $0x80] sm:$0xff] %v5537_v12  ;;  %5570 = vst [vmem:[%s7901_s30 + $0x88] sm:$0xff] %v5538_v25  ;;  %v4842_v6 = vadd.f32 %v9887_v21, %v4490_v44  ;;  %v4843_v34 = vadd.f32 %v9888_v31, %v4491_v60  ;;  %v9889_v12 = vld [vmem:[#allocation57_spill] sm:$0xff]  ;;  %v9890_v25 = vld [vmem:[#allocation92_spill] sm:$0xff] }
 0x674   : > { %v5506_v45 = vmul.f32 0.25, %v5474_v52  ;;  %v5507_v11 = vmul.f32 0.25, %v5475_v4  ;;  %v4493_v52 = vmul.f32 %v9890_v25, %v9889_v12  ;;  %v9891_v4 = vld [vmem:[#allocation58_spill] sm:$0xff] }
 0x675   : > { %v5401_v19 = vpop.permute.xlu1 %5400  ;;  %v5403_v63 = vpop.permute.xlu0 %5402  ;;  %v4492_v28 = vmul.f32 %v9892_v32, %v9891_v4  ;;  %v5162_v15 = vadd.f32 %v9893_v37, %v4842_v6  ;;  %v9905_v60 = vld [vmem:[#allocation26_spill] sm:$0xff] }
 0x676   : > { %v5539_v53 = vsel %vm5520_vm0, %v5506_v45, 0.0  ;;  %v5540_v16 = vsel %vm5520_vm0, %v5507_v11, 0.0  ;;  %v5476_v18 = vadd.f32 %v5401_v19, %v5156_v57  ;;  %v5477_v24 = vadd.f32 %v5403_v63, %v5157_v7  ;;  %v9894_v57 = vld [vmem:[#allocation23_spill] sm:$0xff] }
 0x677   : > { %5571 = vst [vmem:[%s7901_s30 + $0x90] sm:$0xff] %v5539_v53  ;;  %5572 = vst [vmem:[%s7901_s30 + $0x98] sm:$0xff] %v5540_v16  ;;  %v5163_v7 = vadd.f32 %v9894_v57, %v4843_v34  ;;  %v4844_v58 = vadd.f32 %v9895_v46, %v4492_v28  ;;  %v4845_v0 = vadd.f32 %v9896_v23, %v4493_v52 }
 0x678   : > { %v5508_v29 = vmul.f32 0.25, %v5476_v18  ;;  %v5509_v51 = vmul.f32 0.25, %v5477_v24 }
 0x679   : > { %v5405_v40 = vpop.permute.xlu1 %5404  ;;  %v5407_v8 = vpop.permute.xlu0 %5406 }
 0x67a   : > { %v5541_v2 = vsel %vm5520_vm0, %v5508_v29, 0.0  ;;  %v5542_v59 = vsel %vm5520_vm0, %v5509_v51, 0.0  ;;  %v5478_v5 = vadd.f32 %v5405_v40, %v5158_v36  ;;  %v5479_v35 = vadd.f32 %v5407_v8, %v5159_v1  ;;  %v9902_v29 = vld [vmem:[#allocation25_spill] sm:$0xff]  ;;  %v9904_v40 = vld [vmem:[#allocation90_spill] sm:$0xff] }
 0x67b   : > { %5573 = vst [vmem:[%s7901_s30 + $0xa0] sm:$0xff] %v5541_v2  ;;  %5574 = vst [vmem:[%s7901_s30 + $0xa8] sm:$0xff] %v5542_v59  ;;  %v4494_v36 = vmul.f32 %v9900_v33, %v9899_v56  ;;  %v5164_v1 = vadd.f32 %v9901_v13, %v4844_v58  ;;  %v5165_v51 = vadd.f32 %v9902_v29, %v4845_v0 }
 0x67c   : > { %v5510_v62 = vmul.f32 0.25, %v5478_v5  ;;  %v5511_v39 = vmul.f32 0.25, %v5479_v35  ;;  %v4847_v8 = vadd.f32 %v9904_v40, %v4495_v22 }
 0x67d   : > { %v5409_v48 = vpop.permute.xlu1 %5408  ;;  %v5411_v20 = vpop.permute.xlu0 %5410  ;;  %v4846_v61 = vadd.f32 %v9903_v30, %v4494_v36 }
 0x67e   : > { %v5543_v10 = vsel %vm5520_vm0, %v5510_v62, 0.0  ;;  %v5544_v3 = vsel %vm5520_vm0, %v5511_v39, 0.0  ;;  %v5480_v14 = vadd.f32 %v5409_v48, %v5160_v17  ;;  %v5481_v49 = vadd.f32 %v5411_v20, %v5161_v50 }
 0x67f   : > { %5575 = vst [vmem:[%s7901_s30 + $0xb0] sm:$0xff] %v5543_v10  ;;  %5576 = vst [vmem:[%s7901_s30 + $0xb8] sm:$0xff] %v5544_v3  ;;  %v5166_v41 = vadd.f32 %v9905_v60, %v4846_v61  ;;  %v5167_v44 = vadd.f32 %v9906_v55, %v4847_v8 }
 0x680   : > { %v5512_v45 = vmul.f32 0.25, %v5480_v14  ;;  %v5513_v11 = vmul.f32 0.25, %v5481_v49 }
 0x681   : > { %v5413_v19 = vpop.permute.xlu1 %5412  ;;  %v5415_v63 = vpop.permute.xlu0 %5414 }
 0x682   : > { %v5545_v53 = vsel %vm5520_vm0, %v5512_v45, 0.0  ;;  %v5546_v16 = vsel %vm5520_vm0, %v5513_v11, 0.0  ;;  %v5482_v18 = vadd.f32 %v5413_v19, %v5162_v15  ;;  %v5483_v24 = vadd.f32 %v5415_v63, %v5163_v7 }
 0x683   : > { %5577 = vst [vmem:[%s7901_s30 + $0xc0] sm:$0xff] %v5545_v53  ;;  %5578 = vst [vmem:[%s7901_s30 + $0xc8] sm:$0xff] %v5546_v16 }
 0x684   : > { %v5514_v27 = vmul.f32 0.25, %v5482_v18  ;;  %v5515_v43 = vmul.f32 0.25, %v5483_v24 }
 0x685   : > { %v5417_v2 = vpop.permute.xlu1 %5416  ;;  %v5419_v59 = vpop.permute.xlu0 %5418 }
 0x686   : > { %v5547_v5 = vsel %vm5520_vm0, %v5514_v27, 0.0  ;;  %v5548_v35 = vsel %vm5520_vm0, %v5515_v43, 0.0  ;;  %v5484_v47 = vadd.f32 %v5417_v2, %v5164_v1  ;;  %v5485_v26 = vadd.f32 %v5419_v59, %v5165_v51 }
 0x687   : > { %5579 = vst [vmem:[%s7901_s30 + $0xd0] sm:$0xff] %v5547_v5  ;;  %5580 = vst [vmem:[%s7901_s30 + $0xd8] sm:$0xff] %v5548_v35 }
 0x688   : > { %v5516_v42 = vmul.f32 0.25, %v5484_v47  ;;  %v5517_v17 = vmul.f32 0.25, %v5485_v26 }
 0x689   : > { %v5421_v38 = vpop.permute.xlu1 %5420  ;;  %v5423_v50 = vpop.permute.xlu0 %5422 }
 0x68a   : > { %v5549_v62 = vsel %vm5520_vm0, %v5516_v42, 0.0  ;;  %v5550_v39 = vsel %vm5520_vm0, %v5517_v17, 0.0  ;;  %v5486_v21 = vadd.f32 %v5421_v38, %v5166_v41  ;;  %v5487_v6 = vadd.f32 %v5423_v50, %v5167_v44 }
 0x68b   : > { %5581 = vst [vmem:[%s7901_s30 + $0xe0] sm:$0xff] %v5549_v62  ;;  %5582 = vst [vmem:[%s7901_s30 + $0xe8] sm:$0xff] %v5550_v39 }
 0x68c   : > { %v5518_v31 = vmul.f32 0.25, %v5486_v21  ;;  %v5519_v34 = vmul.f32 0.25, %v5487_v6 }
 0x68e   : > { %v5551_v48 = vsel %vm5520_vm0, %v5518_v31, 0.0  ;;  %v5552_v20 = vsel %vm5520_vm0, %v5519_v34, 0.0 }
 0x68f   : > { %5583 = vst [vmem:[%s7901_s30 + $0xf0] sm:$0xff] %v5551_v48  ;;  %5584 = vst [vmem:[%s7901_s30 + $0xf8] sm:$0xff] %v5552_v20 }
 0x690 PF: > { %s9907_s12 = sld [smem:[#allocation13_spill]]  ;;  %s9908_s28 = sld [smem:[#allocation96_spill]] }
 0x691   : > { %s5599_s7 = sshll.u32 %s7901_s30, 4  ;;  %s9572_s24 = scalar_lea.sflag [#allocation5], %s216_s18  ;;  %s9568_s7 = int_to_ptr.vmem [resolvable:$true] %s5599_s7 }
 0x692   : > { %s7452_s26 = scalar_lea.vmem %s9568_s7, 4096  ;;  %p9909_p0 = scmp.ne.s32.totalorder %s9703_s15, 0 }
 0x693   : > { %p7453_p12 = scmp.ne.s32.totalorder %s9568_s7, %s7452_s26  ;;  %s7618_s3 = smov [#allocation8]  }
 0x694   : > { %s7456_s4 = sshll.u32 %s7618_s3, 4  ;;  %s7457_s4 = int_to_ptr.vmem [resolvable:$false] %s7456_s4 }
 0x695   : > { %p7454_p10 = pnand %p7453_p12, %p9909_p0  ;;  %s7458_s25 = scalar_lea.vmem %s7457_s4, 8192 }
 0x696   : > { %s6118_s8 = sshll.u32 %s9907_s12, 12  ;;  %p7459_p6 = scmp.lt.s32.totalorder %s9568_s7, %s7457_s4 }
 0x697   : > { %s9565_s27 = scalar_lea.hbm %s9908_s28, %s6118_s8  ;;  %p7455_p3 = pneg %p7454_p10 }
 0x698   : > { %p7460_p9 = scmp.lt.s32.totalorder %s7458_s25, %s7452_s26 }
 0x69a   : > { %p7461_p1 = por %p7460_p9, %p7459_p6 }
 0x69c   : > { %p7462_p11 = pnand %p7461_p1, %p7455_p3 }
 0x69e   : > { %7465 = shalt.err (!%p7462_p11)
}
 0x69f   : > { %s7466_s18 = scalar_lea.hbm %s9565_s27, 4096  ;;  %s7470_s8 = scalar_lea.hbm %s9908_s28, 8192 }
 0x6a0   : > { %p7467_p4 = scmp.ne.s32.totalorder %s9565_s27, %s7466_s18  ;;  %p7471_p5 = scmp.lt.u32.totalorder %s9565_s27, %s9908_s28 }
 0x6a1   : > { %p7472_p13 = scmp.lt.u32.totalorder %s7470_s8, %s7466_s18  ;;  %p7474_p12 = scmp.lt.u32.totalorder %s7466_s18, %s9565_s27 }
 0x6a2   : > { %p7468_p2 = pnand %p7467_p4, %p9909_p0 }
 0x6a3   : > { %p7473_p7 = por %p7472_p13, %p7471_p5 }
 0x6a4   : > { %p7469_p8 = pneg %p7468_p2 }
 0x6a5   : > { %p7475_p10 = por %p7474_p12, %p7473_p7 }
 0x6a7   : > { %p7476_p3 = pnand %p7475_p10, %p7469_p8 }
 0x6a9   : > { %7479 = shalt.err (!%p7476_p3)
}
 0x6aa   : > { %s7619_s26 = smov 128   ;;  %s7620_s3 = smov 8  }
 0x6ab   : > { %7019 = dma.vmem_to_hbm [thread:$0]  (%p9909_p0), %s9568_s7, 4096, %s9565_s27, %s9572_s24, %s7619_s26, %s7619_s26, %s7620_s3  }
 0x6ac PF: > { %p7033_p6 = scmp.ge.s32.totalorder %s7602_s22, 2  ;;  %s5614_s4 = sand.u32 1, %s7550_s9  }
 0x6ad   : > { %p9910_p9 = scmp.ne.s32.totalorder %s9704_s23, 0  ;;  %s5615_s25 = scalar_lea.sflag [#allocation5], %s5614_s4 }
 0x6af   : > { %p7029_p1 = pnand %p7033_p6, %p9910_p9 }
 0x6b1   : > { %7545 = dma.done.wait (!%p7029_p1), %s5615_s25, 4096  }
 0x6b2   : > { %7547 = vsyncadd (!%p7029_p1), %s5615_s25, 4294963200  ;;  %s21_s22 = sadd.s32 1, %s7602_s22   ;;  %s9912_s23 = sld [smem:[#allocation14_spill]] }
 0x6b3   : > { %p9601_p11 = scmp.ge.s32.totalorder %s21_s22, 6   ;;  %s9913_s27 = sld [smem:[#allocation15_spill]] }
 0x6b4   : > { %s9915_s9 = smov %s7554_s10  ;;  %s9916_s10 = smov %s7558_s11 }
 0x6b5   : > { %s9917_s11 = smov %s7736_s5  ;;  %s9918_s12 = smov %s7566_s13 }
 0x6b6   : > { %s9919_s13 = smov %s7570_s14  ;;  %s9920_s14 = smov %s7811_s2 }
 0x6b7   : > { %s9921_s15 = smov %s7578_s16  ;;  %s9922_s16 = smov %s7582_s17 }
 0x6b8   : > { %s9923_s17 = smov %s7739_s6  ;;  %s9924_s18 = smov %s7594_s20 }
 0x6b9   : > { %s9925_s19 = smov %s7598_s21  ;;  %s9926_s20 = smov %s9912_s23 }
 0x6ba   : > { %s9927_s21 = smov %s9913_s27  ;;  %20 = sbr.rel (!%p9601_p11) target bundleno = 14 (0xe), region = 94 }
 0x6c1   :  { %5620 = vsyncpa [#allocation4], 1 }
 0x6c2   :  { %5622 = vsyncpa [#allocation4 + $0x1], 1 }
 0x6c3   :  { %5623 = vsyncpa [#allocation7], 1 }
 0x6c4   :  { %5625 = vsyncpa [#allocation7 + $0x1], 1 }
 0x6c5   :  { %5626 = vsyncpa [#allocation5], 1 }
 0x6c6   :  { %5628 = vsyncpa [#allocation5 + $0x1], 1 }

</bundles_post_ra>
